<compile_context>
chip_gen: v6e
topology: v6e:2x2x1
jax: 0.10.0
libtpu: 0.0.40
codegen_flags: <defaults>
</compile_context>

<pallas_src>
import math

import jax
import jax.numpy as jnp
from jax.experimental import pallas as pl
from jax.experimental.pallas import tpu as pltpu

# ----- model_config (small, synthetic) -----
DIM = 32              # model_config.dim
HEAD_NUM = 4          # model_config.head_num
HEAD_DIM = DIM // HEAD_NUM
FFN_DIM = 2048        # hard-coded Linear(dim, 2048) in TransformerBlock
NUM_LAYERS = 2        # model_config.transformer_num
SEQ = 8
BATCH = 2
ROWS = BATCH * SEQ    # flattened (batch * seq) rows
LN_EPS = 1e-5         # nn.LayerNorm default

# ----- packed f32 parameter-slab layout (per layer): (SLAB_ROWS, SLAB_COLS) -----
SLAB_COLS = 128           # lane-dense: q|k|v packed into cols [0, 96), cols [96, 128) zero
ROW_WQKV = 0              # rows [0, 32)  : fused (wq|wk|wv); 1/sqrt(DIM) folded into q cols
ROW_WO = DIM              # rows [32, 64) : wo in cols [0, 32)
ROW_VEC = 2 * DIM         # rows [64, 72) : one aligned 8-row block of per-row vectors
SLAB_ROWS = ROW_VEC + 8   # 72
# row offsets inside the ROW_VEC block
V_BQKV, V_BO, V_LN1W, V_LN1B, V_LN2W, V_LN2B, V_B2 = range(7)

FFN_CHUNK = 512
N_FFN_CHUNKS = FFN_DIM // FFN_CHUNK


def transformer_kernel(x_ref, a_ref, b1_ref, wff_ref, o_ref):
    """Whole Transformer in one invocation; NUM_LAYERS blocks statically unrolled."""

    def layernorm(v, w, b):
        mu = jnp.mean(v, axis=-1, keepdims=True)
        var = jnp.mean((v - mu) ** 2, axis=-1, keepdims=True)
        return (v - mu) * jax.lax.rsqrt(var + LN_EPS) * w + b

    def split_heads(t2d):
        # (ROWS, DIM) -> (BATCH*HEAD_NUM, SEQ, HEAD_DIM); single transpose per tensor.
        t4 = t2d.reshape(BATCH, SEQ, HEAD_NUM, HEAD_DIM)
        t4 = pltpu.einshape("bnhd->bhnd", t4)
        return t4.reshape(BATCH * HEAD_NUM, SEQ, HEAD_DIM)

    def merge_heads(t3d):
        # (BATCH*HEAD_NUM, SEQ, HEAD_DIM) -> (ROWS, DIM)
        t4 = t3d.reshape(BATCH, HEAD_NUM, SEQ, HEAD_DIM)
        t4 = pltpu.einshape("bhnd->bnhd", t4)
        return t4.reshape(ROWS, DIM)

    x = x_ref[...]                                        # (ROWS, DIM) f32

    for l in range(NUM_LAYERS):                           # static unroll over layers
        # ---- per-layer packed params (static ref views; one aligned load for vectors) ----
        wqkv = a_ref[l, ROW_WQKV:ROW_WQKV + DIM, :]       # (DIM, 128) f32: q|k|v|0
        wo = a_ref[l, ROW_WO:ROW_WO + DIM, 0:DIM]         # (DIM, DIM)
        vecs = a_ref[l, ROW_VEC:ROW_VEC + 8, :]           # (8, 128) aligned block
        bqkv = vecs[V_BQKV:V_BQKV + 1, :]                 # (1, 128)
        bo = vecs[V_BO:V_BO + 1, 0:DIM]
        ln1_w = vecs[V_LN1W:V_LN1W + 1, 0:DIM]
        ln1_b = vecs[V_LN1B:V_LN1B + 1, 0:DIM]
        ln2_w = vecs[V_LN2W:V_LN2W + 1, 0:DIM]
        ln2_b = vecs[V_LN2B:V_LN2B + 1, 0:DIM]
        b2 = vecs[V_B2:V_B2 + 1, 0:DIM]

        # ---- norm_1 + multi-head attention (pre-LN, as in the PyTorch block) ----
        # NOTE: the 1/sqrt(DIM) score scale is folded into the q columns of wqkv / bqkv at init.
        xn = layernorm(x, ln1_w, ln1_b)
        qkv = jnp.dot(xn, wqkv, preferred_element_type=jnp.float32) + bqkv  # (ROWS, 128)
        qh = split_heads(qkv[:, 0:DIM])
        kh = split_heads(qkv[:, DIM:2 * DIM])
        vh = split_heads(qkv[:, 2 * DIM:3 * DIM])

        s = jnp.einsum("gnd,gmd->gnm", qh, kh, preferred_element_type=jnp.float32)
        s = s - jnp.max(s, axis=-1, keepdims=True)
        p = jnp.exp(s)
        p = p * pl.reciprocal(jnp.sum(p, axis=-1, keepdims=True), approx=True)
        oh = jnp.einsum("gnm,gmd->gnd", p, vh, preferred_element_type=jnp.float32)
        attn = merge_heads(oh)                            # (ROWS, DIM)

        attn = jnp.dot(attn, wo, preferred_element_type=jnp.float32) + bo
        # TODO(synk): dropout_{1,2,3} are identity in eval mode; no RNG dropout implemented.
        res1 = x + attn

        # ---- norm_2 + SiLU MLP: bf16 weights, f32 accumulation, chunked over FFN_DIM ----
        xn2 = layernorm(res1, ln2_w, ln2_b).astype(jnp.bfloat16)
        acc = jnp.zeros((ROWS, DIM), jnp.float32)
        for c in range(N_FFN_CHUNKS):                     # static unroll (4 chunks of 512)
            lo = c * FFN_CHUNK
            w1_c = wff_ref[l, 0, :, lo:lo + FFN_CHUNK]    # (DIM, CHUNK) bf16
            b1_c = b1_ref[l, :, lo:lo + FFN_CHUNK]        # (1, CHUNK) f32
            h1_c = jnp.dot(xn2, w1_c, preferred_element_type=jnp.float32) + b1_c
            h1_c = h1_c * jax.nn.sigmoid(h1_c)            # silu
            w2_c = wff_ref[l, 1, :, lo:lo + FFN_CHUNK]    # (DIM, CHUNK) bf16 (pre-transposed)
            acc = acc + jax.lax.dot_general(
                h1_c.astype(jnp.bfloat16), w2_c,
                dimension_numbers=(((1,), (1,)), ((), ())),   # contract CHUNK dims: h1 @ w2^T
                preferred_element_type=jnp.float32)
        x = res1 + acc + b2

    o_ref[...] = x


def transformer_forward(x, slab, b1, wff):
    """x: (BATCH, SEQ, DIM) f32; slab/(b1)/wff: stacked per-layer parameter slabs."""
    B, N, D = x.shape
    x2 = x.reshape(B * N, D)
    vmem = pl.BlockSpec(memory_space=pltpu.MemorySpace.VMEM)
    out = pl.pallas_call(
        transformer_kernel,
        out_shape=jax.ShapeDtypeStruct((B * N, D), jnp.float32),
        in_specs=[vmem, vmem, vmem, vmem],
        out_specs=vmem,
    )(x2, slab, b1, wff)
    return out.reshape(B, N, D)


# ---------- deterministic parameter init (synthetic; no checkpoint) ----------
def _xavier_uniform(key, fan_in, fan_out):
    bound = math.sqrt(6.0 / (fan_in + fan_out))
    # stored as (in, out) so the kernel computes x @ W (== PyTorch x @ W_torch.T)
    return jax.random.uniform(key, (fan_in, fan_out), jnp.float32, -bound, bound)


def _default_linear_w(key, fan_in, fan_out):
    bound = math.sqrt(1.0 / fan_in)  # PyTorch default (kaiming_uniform, a=sqrt(5))
    return jax.random.uniform(key, (fan_in, fan_out), jnp.float32, -bound, bound)


def _default_linear_b(key, fan_in, fan_out):
    bound = math.sqrt(1.0 / fan_in)
    return jax.random.uniform(key, (1, fan_out), jnp.float32, -bound, bound)


def init_block_params(key):
    ks = jax.random.split(key, 12)
    inv_sqrt_dim = 1.0 / math.sqrt(DIM)  # PyTorch divides scores by sqrt(dim), not sqrt(head_dim)
    wq = _xavier_uniform(ks[0], DIM, DIM) * inv_sqrt_dim   # score scale folded in (free, at init)
    bq = _default_linear_b(ks[1], DIM, DIM) * inv_sqrt_dim
    wk = _xavier_uniform(ks[2], DIM, DIM)
    bk = _default_linear_b(ks[3], DIM, DIM)
    wv = _xavier_uniform(ks[4], DIM, DIM)
    bv = _default_linear_b(ks[5], DIM, DIM)
    wo = _default_linear_w(ks[6], DIM, DIM)
    bo = _default_linear_b(ks[7], DIM, DIM)
    ln1_w = jnp.ones((DIM,), jnp.float32)
    ln1_b = jnp.zeros((DIM,), jnp.float32)
    ln2_w = jnp.ones((DIM,), jnp.float32)
    ln2_b = jnp.zeros((DIM,), jnp.float32)
    w1 = _default_linear_w(ks[8], DIM, FFN_DIM)            # (32, 2048), x @ w1
    b1 = _default_linear_b(ks[9], DIM, FFN_DIM)            # (1, 2048) f32
    w2t = _default_linear_w(ks[10], FFN_DIM, DIM).T        # (32, 2048) lane-dense, h1 @ w2t^T
    b2 = _default_linear_b(ks[11], FFN_DIM, DIM)           # (1, 32)

    slab = jnp.zeros((SLAB_ROWS, SLAB_COLS), jnp.float32)
    slab = slab.at[ROW_WQKV:ROW_WQKV + DIM, 0:DIM].set(wq)
    slab = slab.at[ROW_WQKV:ROW_WQKV + DIM, DIM:2 * DIM].set(wk)
    slab = slab.at[ROW_WQKV:ROW_WQKV + DIM, 2 * DIM:3 * DIM].set(wv)
    slab = slab.at[ROW_WO:ROW_WO + DIM, 0:DIM].set(wo)
    slab = slab.at[ROW_VEC + V_BQKV, 0:DIM].set(bq[0])
    slab = slab.at[ROW_VEC + V_BQKV, DIM:2 * DIM].set(bk[0])
    slab = slab.at[ROW_VEC + V_BQKV, 2 * DIM:3 * DIM].set(bv[0])
    slab = slab.at[ROW_VEC + V_BO, 0:DIM].set(bo[0])
    slab = slab.at[ROW_VEC + V_LN1W, 0:DIM].set(ln1_w)
    slab = slab.at[ROW_VEC + V_LN1B, 0:DIM].set(ln1_b)
    slab = slab.at[ROW_VEC + V_LN2W, 0:DIM].set(ln2_w)
    slab = slab.at[ROW_VEC + V_LN2B, 0:DIM].set(ln2_b)
    slab = slab.at[ROW_VEC + V_B2, 0:DIM].set(b2[0])

    # FFN weights dominate traffic -> bf16; biases / accumulation stay f32
    wff = jnp.stack([w1, w2t], axis=0).astype(jnp.bfloat16)   # (2, 32, 2048)
    return slab, b1, wff


def init_stacked_params(key):
    """Stack the coalesced per-layer slabs along a leading (NUM_LAYERS,) axis."""
    layer_keys = jax.random.split(key, NUM_LAYERS)
    per_layer = [init_block_params(k) for k in layer_keys]
    slab = jnp.stack([p[0] for p in per_layer], axis=0)   # (L, 72, 128)   f32
    b1 = jnp.stack([p[1] for p in per_layer], axis=0)      # (L, 1, 2048)   f32
    wff = jnp.stack([p[2] for p in per_layer], axis=0)     # (L, 2, 32, 2048) bf16
    return slab, b1, wff


if __name__ == "__main__":
    key = jax.random.PRNGKey(0)
    xkey, pkey = jax.random.split(key)
    x = jax.random.normal(xkey, (BATCH, SEQ, DIM), jnp.float32)
    slab, b1, wff = init_stacked_params(pkey)

    out = transformer_forward(x, slab, b1, wff)
    jax.block_until_ready(out)
    assert out.shape == (BATCH, SEQ, DIM)
    assert bool(jnp.all(jnp.isfinite(out)))
    print("KERNEL_OK")
</pallas_src>

<mosaic_0001>
module attributes {stable_mosaic.version = 11 : i64} {
  func.func @transformer_kernel(%arg0: memref<16x32xf32, #tpu.memory_space<vmem>>, %arg1: memref<2x72x128xf32, #tpu.memory_space<vmem>>, %arg2: memref<2x1x2048xf32, #tpu.memory_space<vmem>>, %arg3: memref<2x2x32x2048xbf16, #tpu.memory_space<vmem>>, %arg4: memref<16x32xf32, #tpu.memory_space<vmem>>) attributes {dimension_semantics = [], scalar_prefetch = 0 : i64, scratch_operands = 0 : i64, tpu.core_type = #tpu.core_type<tc>} {
    %c0 = arith.constant 0 : index
    %c0_0 = arith.constant 0 : index
    %0 = vector.load %arg0[%c0, %c0_0] : memref<16x32xf32, #tpu.memory_space<vmem>>, vector<16x32xf32>
    %c0_1 = arith.constant 0 : index
    %c0_2 = arith.constant 0 : index
    %c0_3 = arith.constant 0 : index
    %1 = vector.load %arg1[%c0_1, %c0_2, %c0_3] : memref<2x72x128xf32, #tpu.memory_space<vmem>>, vector<1x32x128xf32>
    %2 = vector.shape_cast %1 : vector<1x32x128xf32> to vector<32x128xf32>
    %c0_4 = arith.constant 0 : index
    %c32 = arith.constant 32 : index
    %c0_5 = arith.constant 0 : index
    %3 = vector.load %arg1[%c0_4, %c32, %c0_5] : memref<2x72x128xf32, #tpu.memory_space<vmem>>, vector<1x32x32xf32>
    %4 = vector.shape_cast %3 : vector<1x32x32xf32> to vector<32x32xf32>
    %c0_6 = arith.constant 0 : index
    %c64 = arith.constant 64 : index
    %c0_7 = arith.constant 0 : index
    %5 = vector.load %arg1[%c0_6, %c64, %c0_7] : memref<2x72x128xf32, #tpu.memory_space<vmem>>, vector<1x8x128xf32>
    %6 = vector.shape_cast %5 : vector<1x8x128xf32> to vector<8x128xf32>
    %7 = vector.extract_strided_slice %6 {offsets = [0, 0], sizes = [1, 128], strides = [1, 1]} : vector<8x128xf32> to vector<1x128xf32>
    %8 = vector.extract_strided_slice %6 {offsets = [1, 0], sizes = [1, 32], strides = [1, 1]} : vector<8x128xf32> to vector<1x32xf32>
    %9 = vector.extract_strided_slice %6 {offsets = [2, 0], sizes = [1, 32], strides = [1, 1]} : vector<8x128xf32> to vector<1x32xf32>
    %10 = vector.extract_strided_slice %6 {offsets = [3, 0], sizes = [1, 32], strides = [1, 1]} : vector<8x128xf32> to vector<1x32xf32>
    %11 = vector.extract_strided_slice %6 {offsets = [4, 0], sizes = [1, 32], strides = [1, 1]} : vector<8x128xf32> to vector<1x32xf32>
    %12 = vector.extract_strided_slice %6 {offsets = [5, 0], sizes = [1, 32], strides = [1, 1]} : vector<8x128xf32> to vector<1x32xf32>
    %13 = vector.extract_strided_slice %6 {offsets = [6, 0], sizes = [1, 32], strides = [1, 1]} : vector<8x128xf32> to vector<1x32xf32>
    %cst = arith.constant dense<0.000000e+00> : vector<16xf32>
    %14 = vector.multi_reduction <add>, %0, %cst [1] : vector<16x32xf32> to vector<16xf32>
    %15 = vector.shape_cast %14 : vector<16xf32> to vector<16x1xf32>
    %cst_8 = arith.constant 3.200000e+01 : f32
    %16 = vector.broadcast %cst_8 : f32 to vector<16x1xf32>
    %17 = arith.divf %15, %16 : vector<16x1xf32>
    %18 = vector.broadcast %17 : vector<16x1xf32> to vector<16x32xf32>
    %19 = arith.subf %0, %18 : vector<16x32xf32>
    %20 = arith.mulf %19, %19 : vector<16x32xf32>
    %cst_9 = arith.constant dense<0.000000e+00> : vector<16xf32>
    %21 = vector.multi_reduction <add>, %20, %cst_9 [1] : vector<16x32xf32> to vector<16xf32>
    %22 = vector.shape_cast %21 : vector<16xf32> to vector<16x1xf32>
    %cst_10 = arith.constant 3.200000e+01 : f32
    %23 = vector.broadcast %cst_10 : f32 to vector<16x1xf32>
    %24 = arith.divf %22, %23 : vector<16x1xf32>
    %25 = vector.broadcast %17 : vector<16x1xf32> to vector<16x32xf32>
    %26 = arith.subf %0, %25 : vector<16x32xf32>
    %cst_11 = arith.constant 9.99999974E-6 : f32
    %27 = vector.broadcast %cst_11 : f32 to vector<16x1xf32>
    %28 = arith.addf %24, %27 : vector<16x1xf32>
    %29 = math.rsqrt %28 : vector<16x1xf32>
    %30 = vector.broadcast %29 : vector<16x1xf32> to vector<16x32xf32>
    %31 = arith.mulf %26, %30 : vector<16x32xf32>
    %32 = vector.broadcast %9 : vector<1x32xf32> to vector<16x32xf32>
    %33 = arith.mulf %31, %32 : vector<16x32xf32>
    %34 = vector.broadcast %10 : vector<1x32xf32> to vector<16x32xf32>
    %35 = arith.addf %33, %34 : vector<16x32xf32>
    %cst_12 = arith.constant dense<0.000000e+00> : vector<16x128xf32>
    %36 = tpu.matmul %35, %2, %cst_12 {dimension_numbers = #tpu.dot_dimension_numbers<[1], [0], [0], [1], [0, 0, 1, 1], [], []>} : vector<16x32xf32>, vector<32x128xf32>, vector<16x128xf32> -> vector<16x128xf32>
    %37 = vector.broadcast %7 : vector<1x128xf32> to vector<16x128xf32>
    %38 = arith.addf %36, %37 : vector<16x128xf32>
    %39 = vector.extract_strided_slice %38 {offsets = [0, 0], sizes = [16, 32], strides = [1, 1]} : vector<16x128xf32> to vector<16x32xf32>
    %40 = vector.shape_cast %39 : vector<16x32xf32> to vector<2x8x4x8xf32>
    %41 = tpu.transpose %40, [0, 2, 1, 3] : vector<2x8x4x8xf32> -> vector<2x4x8x8xf32>
    %42 = vector.shape_cast %41 : vector<2x4x8x8xf32> to vector<8x8x8xf32>
    %43 = vector.extract_strided_slice %38 {offsets = [0, 32], sizes = [16, 32], strides = [1, 1]} : vector<16x128xf32> to vector<16x32xf32>
    %44 = vector.shape_cast %43 : vector<16x32xf32> to vector<2x8x4x8xf32>
    %45 = tpu.transpose %44, [0, 2, 1, 3] : vector<2x8x4x8xf32> -> vector<2x4x8x8xf32>
    %46 = vector.shape_cast %45 : vector<2x4x8x8xf32> to vector<8x8x8xf32>
    %47 = vector.extract_strided_slice %38 {offsets = [0, 64], sizes = [16, 32], strides = [1, 1]} : vector<16x128xf32> to vector<16x32xf32>
    %48 = vector.shape_cast %47 : vector<16x32xf32> to vector<2x8x4x8xf32>
    %49 = tpu.transpose %48, [0, 2, 1, 3] : vector<2x8x4x8xf32> -> vector<2x4x8x8xf32>
    %50 = vector.shape_cast %49 : vector<2x4x8x8xf32> to vector<8x8x8xf32>
    "tpu.trace_start"() <{level = 10 : i32, message = "gnd,gmd->gnm"}> : () -> ()
    %cst_13 = arith.constant dense<0.000000e+00> : vector<8x8x8xf32>
    %51 = tpu.matmul %42, %46, %cst_13 {dimension_numbers = #tpu.dot_dimension_numbers<[2], [2], [1], [1], [0, 0, 0, 1, 1, 1], [0], [0]>} : vector<8x8x8xf32>, vector<8x8x8xf32>, vector<8x8x8xf32> -> vector<8x8x8xf32>
    "tpu.trace_stop"() : () -> ()
    %cst_14 = arith.constant dense<0xFF800000> : vector<8x8xf32>
    %52 = vector.multi_reduction <maximumf>, %51, %cst_14 [2] : vector<8x8x8xf32> to vector<8x8xf32>
    %53 = vector.shape_cast %52 : vector<8x8xf32> to vector<8x8x1xf32>
    %54 = vector.broadcast %53 : vector<8x8x1xf32> to vector<8x8x8xf32>
    %55 = arith.subf %51, %54 : vector<8x8x8xf32>
    %56 = math.exp %55 : vector<8x8x8xf32>
    %cst_15 = arith.constant dense<0.000000e+00> : vector<8x8xf32>
    %57 = vector.multi_reduction <add>, %56, %cst_15 [2] : vector<8x8x8xf32> to vector<8x8xf32>
    %58 = vector.shape_cast %57 : vector<8x8xf32> to vector<8x8x1xf32>
    %59 = tpu.reciprocal %58 {approx = true} : vector<8x8x1xf32> -> vector<8x8x1xf32>
    %60 = vector.broadcast %59 : vector<8x8x1xf32> to vector<8x8x8xf32>
    %61 = arith.mulf %56, %60 : vector<8x8x8xf32>
    "tpu.trace_start"() <{level = 10 : i32, message = "gnm,gmd->gnd"}> : () -> ()
    %cst_16 = arith.constant dense<0.000000e+00> : vector<8x8x8xf32>
    %62 = tpu.matmul %61, %50, %cst_16 {dimension_numbers = #tpu.dot_dimension_numbers<[2], [1], [1], [2], [0, 0, 0, 1, 1, 2], [0], [0]>} : vector<8x8x8xf32>, vector<8x8x8xf32>, vector<8x8x8xf32> -> vector<8x8x8xf32>
    "tpu.trace_stop"() : () -> ()
    %63 = vector.shape_cast %62 : vector<8x8x8xf32> to vector<2x4x8x8xf32>
    %64 = tpu.transpose %63, [0, 2, 1, 3] : vector<2x4x8x8xf32> -> vector<2x8x4x8xf32>
    %65 = vector.shape_cast %64 : vector<2x8x4x8xf32> to vector<16x32xf32>
    %cst_17 = arith.constant dense<0.000000e+00> : vector<16x32xf32>
    %66 = tpu.matmul %65, %4, %cst_17 {dimension_numbers = #tpu.dot_dimension_numbers<[1], [0], [0], [1], [0, 0, 1, 1], [], []>} : vector<16x32xf32>, vector<32x32xf32>, vector<16x32xf32> -> vector<16x32xf32>
    %67 = vector.broadcast %8 : vector<1x32xf32> to vector<16x32xf32>
    %68 = arith.addf %66, %67 : vector<16x32xf32>
    %69 = arith.addf %0, %68 : vector<16x32xf32>
    %cst_18 = arith.constant dense<0.000000e+00> : vector<16xf32>
    %70 = vector.multi_reduction <add>, %69, %cst_18 [1] : vector<16x32xf32> to vector<16xf32>
    %71 = vector.shape_cast %70 : vector<16xf32> to vector<16x1xf32>
    %cst_19 = arith.constant 3.200000e+01 : f32
    %72 = vector.broadcast %cst_19 : f32 to vector<16x1xf32>
    %73 = arith.divf %71, %72 : vector<16x1xf32>
    %74 = vector.broadcast %73 : vector<16x1xf32> to vector<16x32xf32>
    %75 = arith.subf %69, %74 : vector<16x32xf32>
    %76 = arith.mulf %75, %75 : vector<16x32xf32>
    %cst_20 = arith.constant dense<0.000000e+00> : vector<16xf32>
    %77 = vector.multi_reduction <add>, %76, %cst_20 [1] : vector<16x32xf32> to vector<16xf32>
    %78 = vector.shape_cast %77 : vector<16xf32> to vector<16x1xf32>
    %cst_21 = arith.constant 3.200000e+01 : f32
    %79 = vector.broadcast %cst_21 : f32 to vector<16x1xf32>
    %80 = arith.divf %78, %79 : vector<16x1xf32>
    %81 = vector.broadcast %73 : vector<16x1xf32> to vector<16x32xf32>
    %82 = arith.subf %69, %81 : vector<16x32xf32>
    %cst_22 = arith.constant 9.99999974E-6 : f32
    %83 = vector.broadcast %cst_22 : f32 to vector<16x1xf32>
    %84 = arith.addf %80, %83 : vector<16x1xf32>
    %85 = math.rsqrt %84 : vector<16x1xf32>
    %86 = vector.broadcast %85 : vector<16x1xf32> to vector<16x32xf32>
    %87 = arith.mulf %82, %86 : vector<16x32xf32>
    %88 = vector.broadcast %11 : vector<1x32xf32> to vector<16x32xf32>
    %89 = arith.mulf %87, %88 : vector<16x32xf32>
    %90 = vector.broadcast %12 : vector<1x32xf32> to vector<16x32xf32>
    %91 = arith.addf %89, %90 : vector<16x32xf32>
    %92 = arith.truncf %91 : vector<16x32xf32> to vector<16x32xbf16>
    %cst_23 = arith.constant 0.000000e+00 : f32
    %93 = vector.broadcast %cst_23 : f32 to vector<16x32xf32>
    %c0_24 = arith.constant 0 : index
    %c0_25 = arith.constant 0 : index
    %c0_26 = arith.constant 0 : index
    %c0_27 = arith.constant 0 : index
    %94 = vector.load %arg3[%c0_24, %c0_25, %c0_26, %c0_27] : memref<2x2x32x2048xbf16, #tpu.memory_space<vmem>>, vector<1x1x32x512xbf16>
    %95 = vector.shape_cast %94 : vector<1x1x32x512xbf16> to vector<32x512xbf16>
    %c0_28 = arith.constant 0 : index
    %c0_29 = arith.constant 0 : index
    %c0_30 = arith.constant 0 : index
    %96 = vector.load %arg2[%c0_28, %c0_29, %c0_30] : memref<2x1x2048xf32, #tpu.memory_space<vmem>>, vector<1x1x512xf32>
    %97 = vector.shape_cast %96 : vector<1x1x512xf32> to vector<1x512xf32>
    %cst_31 = arith.constant dense<0.000000e+00> : vector<16x512xf32>
    %98 = tpu.matmul %92, %95, %cst_31 {dimension_numbers = #tpu.dot_dimension_numbers<[1], [0], [0], [1], [0, 0, 1, 1], [], []>} : vector<16x32xbf16>, vector<32x512xbf16>, vector<16x512xf32> -> vector<16x512xf32>
    %99 = vector.broadcast %97 : vector<1x512xf32> to vector<16x512xf32>
    %100 = arith.addf %98, %99 : vector<16x512xf32>
    %101 = arith.negf %100 : vector<16x512xf32>
    %102 = math.exp %101 : vector<16x512xf32>
    %cst_32 = arith.constant 1.000000e+00 : f32
    %103 = vector.broadcast %cst_32 : f32 to vector<16x512xf32>
    %104 = arith.addf %103, %102 : vector<16x512xf32>
    %105 = arith.divf %103, %104 : vector<16x512xf32>
    %106 = arith.mulf %100, %105 : vector<16x512xf32>
    %c0_33 = arith.constant 0 : index
    %c1 = arith.constant 1 : index
    %c0_34 = arith.constant 0 : index
    %c0_35 = arith.constant 0 : index
    %107 = vector.load %arg3[%c0_33, %c1, %c0_34, %c0_35] : memref<2x2x32x2048xbf16, #tpu.memory_space<vmem>>, vector<1x1x32x512xbf16>
    %108 = vector.shape_cast %107 : vector<1x1x32x512xbf16> to vector<32x512xbf16>
    %109 = arith.truncf %106 : vector<16x512xf32> to vector<16x512xbf16>
    %cst_36 = arith.constant dense<0.000000e+00> : vector<16x32xf32>
    %110 = tpu.matmul %109, %108, %cst_36 {dimension_numbers = #tpu.dot_dimension_numbers<[1], [1], [0], [0], [0, 0, 1, 0], [], []>} : vector<16x512xbf16>, vector<32x512xbf16>, vector<16x32xf32> -> vector<16x32xf32>
    %111 = arith.addf %93, %110 : vector<16x32xf32>
    %c0_37 = arith.constant 0 : index
    %c0_38 = arith.constant 0 : index
    %c0_39 = arith.constant 0 : index
    %c512 = arith.constant 512 : index
    %112 = vector.load %arg3[%c0_37, %c0_38, %c0_39, %c512] : memref<2x2x32x2048xbf16, #tpu.memory_space<vmem>>, vector<1x1x32x512xbf16>
    %113 = vector.shape_cast %112 : vector<1x1x32x512xbf16> to vector<32x512xbf16>
    %c0_40 = arith.constant 0 : index
    %c0_41 = arith.constant 0 : index
    %c512_42 = arith.constant 512 : index
    %114 = vector.load %arg2[%c0_40, %c0_41, %c512_42] : memref<2x1x2048xf32, #tpu.memory_space<vmem>>, vector<1x1x512xf32>
    %115 = vector.shape_cast %114 : vector<1x1x512xf32> to vector<1x512xf32>
    %cst_43 = arith.constant dense<0.000000e+00> : vector<16x512xf32>
    %116 = tpu.matmul %92, %113, %cst_43 {dimension_numbers = #tpu.dot_dimension_numbers<[1], [0], [0], [1], [0, 0, 1, 1], [], []>} : vector<16x32xbf16>, vector<32x512xbf16>, vector<16x512xf32> -> vector<16x512xf32>
    %117 = vector.broadcast %115 : vector<1x512xf32> to vector<16x512xf32>
    %118 = arith.addf %116, %117 : vector<16x512xf32>
    %119 = arith.negf %118 : vector<16x512xf32>
    %120 = math.exp %119 : vector<16x512xf32>
    %cst_44 = arith.constant 1.000000e+00 : f32
    %121 = vector.broadcast %cst_44 : f32 to vector<16x512xf32>
    %122 = arith.addf %121, %120 : vector<16x512xf32>
    %123 = arith.divf %121, %122 : vector<16x512xf32>
    %124 = arith.mulf %118, %123 : vector<16x512xf32>
    %c0_45 = arith.constant 0 : index
    %c1_46 = arith.constant 1 : index
    %c0_47 = arith.constant 0 : index
    %c512_48 = arith.constant 512 : index
    %125 = vector.load %arg3[%c0_45, %c1_46, %c0_47, %c512_48] : memref<2x2x32x2048xbf16, #tpu.memory_space<vmem>>, vector<1x1x32x512xbf16>
    %126 = vector.shape_cast %125 : vector<1x1x32x512xbf16> to vector<32x512xbf16>
    %127 = arith.truncf %124 : vector<16x512xf32> to vector<16x512xbf16>
    %cst_49 = arith.constant dense<0.000000e+00> : vector<16x32xf32>
    %128 = tpu.matmul %127, %126, %cst_49 {dimension_numbers = #tpu.dot_dimension_numbers<[1], [1], [0], [0], [0, 0, 1, 0], [], []>} : vector<16x512xbf16>, vector<32x512xbf16>, vector<16x32xf32> -> vector<16x32xf32>
    %129 = arith.addf %111, %128 : vector<16x32xf32>
    %c0_50 = arith.constant 0 : index
    %c0_51 = arith.constant 0 : index
    %c0_52 = arith.constant 0 : index
    %c1024 = arith.constant 1024 : index
    %130 = vector.load %arg3[%c0_50, %c0_51, %c0_52, %c1024] : memref<2x2x32x2048xbf16, #tpu.memory_space<vmem>>, vector<1x1x32x512xbf16>
    %131 = vector.shape_cast %130 : vector<1x1x32x512xbf16> to vector<32x512xbf16>
    %c0_53 = arith.constant 0 : index
    %c0_54 = arith.constant 0 : index
    %c1024_55 = arith.constant 1024 : index
    %132 = vector.load %arg2[%c0_53, %c0_54, %c1024_55] : memref<2x1x2048xf32, #tpu.memory_space<vmem>>, vector<1x1x512xf32>
    %133 = vector.shape_cast %132 : vector<1x1x512xf32> to vector<1x512xf32>
    %cst_56 = arith.constant dense<0.000000e+00> : vector<16x512xf32>
    %134 = tpu.matmul %92, %131, %cst_56 {dimension_numbers = #tpu.dot_dimension_numbers<[1], [0], [0], [1], [0, 0, 1, 1], [], []>} : vector<16x32xbf16>, vector<32x512xbf16>, vector<16x512xf32> -> vector<16x512xf32>
    %135 = vector.broadcast %133 : vector<1x512xf32> to vector<16x512xf32>
    %136 = arith.addf %134, %135 : vector<16x512xf32>
    %137 = arith.negf %136 : vector<16x512xf32>
    %138 = math.exp %137 : vector<16x512xf32>
    %cst_57 = arith.constant 1.000000e+00 : f32
    %139 = vector.broadcast %cst_57 : f32 to vector<16x512xf32>
    %140 = arith.addf %139, %138 : vector<16x512xf32>
    %141 = arith.divf %139, %140 : vector<16x512xf32>
    %142 = arith.mulf %136, %141 : vector<16x512xf32>
    %c0_58 = arith.constant 0 : index
    %c1_59 = arith.constant 1 : index
    %c0_60 = arith.constant 0 : index
    %c1024_61 = arith.constant 1024 : index
    %143 = vector.load %arg3[%c0_58, %c1_59, %c0_60, %c1024_61] : memref<2x2x32x2048xbf16, #tpu.memory_space<vmem>>, vector<1x1x32x512xbf16>
    %144 = vector.shape_cast %143 : vector<1x1x32x512xbf16> to vector<32x512xbf16>
    %145 = arith.truncf %142 : vector<16x512xf32> to vector<16x512xbf16>
    %cst_62 = arith.constant dense<0.000000e+00> : vector<16x32xf32>
    %146 = tpu.matmul %145, %144, %cst_62 {dimension_numbers = #tpu.dot_dimension_numbers<[1], [1], [0], [0], [0, 0, 1, 0], [], []>} : vector<16x512xbf16>, vector<32x512xbf16>, vector<16x32xf32> -> vector<16x32xf32>
    %147 = arith.addf %129, %146 : vector<16x32xf32>
    %c0_63 = arith.constant 0 : index
    %c0_64 = arith.constant 0 : index
    %c0_65 = arith.constant 0 : index
    %c1536 = arith.constant 1536 : index
    %148 = vector.load %arg3[%c0_63, %c0_64, %c0_65, %c1536] : memref<2x2x32x2048xbf16, #tpu.memory_space<vmem>>, vector<1x1x32x512xbf16>
    %149 = vector.shape_cast %148 : vector<1x1x32x512xbf16> to vector<32x512xbf16>
    %c0_66 = arith.constant 0 : index
    %c0_67 = arith.constant 0 : index
    %c1536_68 = arith.constant 1536 : index
    %150 = vector.load %arg2[%c0_66, %c0_67, %c1536_68] : memref<2x1x2048xf32, #tpu.memory_space<vmem>>, vector<1x1x512xf32>
    %151 = vector.shape_cast %150 : vector<1x1x512xf32> to vector<1x512xf32>
    %cst_69 = arith.constant dense<0.000000e+00> : vector<16x512xf32>
    %152 = tpu.matmul %92, %149, %cst_69 {dimension_numbers = #tpu.dot_dimension_numbers<[1], [0], [0], [1], [0, 0, 1, 1], [], []>} : vector<16x32xbf16>, vector<32x512xbf16>, vector<16x512xf32> -> vector<16x512xf32>
    %153 = vector.broadcast %151 : vector<1x512xf32> to vector<16x512xf32>
    %154 = arith.addf %152, %153 : vector<16x512xf32>
    %155 = arith.negf %154 : vector<16x512xf32>
    %156 = math.exp %155 : vector<16x512xf32>
    %cst_70 = arith.constant 1.000000e+00 : f32
    %157 = vector.broadcast %cst_70 : f32 to vector<16x512xf32>
    %158 = arith.addf %157, %156 : vector<16x512xf32>
    %159 = arith.divf %157, %158 : vector<16x512xf32>
    %160 = arith.mulf %154, %159 : vector<16x512xf32>
    %c0_71 = arith.constant 0 : index
    %c1_72 = arith.constant 1 : index
    %c0_73 = arith.constant 0 : index
    %c1536_74 = arith.constant 1536 : index
    %161 = vector.load %arg3[%c0_71, %c1_72, %c0_73, %c1536_74] : memref<2x2x32x2048xbf16, #tpu.memory_space<vmem>>, vector<1x1x32x512xbf16>
    %162 = vector.shape_cast %161 : vector<1x1x32x512xbf16> to vector<32x512xbf16>
    %163 = arith.truncf %160 : vector<16x512xf32> to vector<16x512xbf16>
    %cst_75 = arith.constant dense<0.000000e+00> : vector<16x32xf32>
    %164 = tpu.matmul %163, %162, %cst_75 {dimension_numbers = #tpu.dot_dimension_numbers<[1], [1], [0], [0], [0, 0, 1, 0], [], []>} : vector<16x512xbf16>, vector<32x512xbf16>, vector<16x32xf32> -> vector<16x32xf32>
    %165 = arith.addf %147, %164 : vector<16x32xf32>
    %166 = arith.addf %69, %165 : vector<16x32xf32>
    %167 = vector.broadcast %13 : vector<1x32xf32> to vector<16x32xf32>
    %168 = arith.addf %166, %167 : vector<16x32xf32>
    %c1_76 = arith.constant 1 : index
    %c0_77 = arith.constant 0 : index
    %c0_78 = arith.constant 0 : index
    %169 = vector.load %arg1[%c1_76, %c0_77, %c0_78] : memref<2x72x128xf32, #tpu.memory_space<vmem>>, vector<1x32x128xf32>
    %170 = vector.shape_cast %169 : vector<1x32x128xf32> to vector<32x128xf32>
    %c1_79 = arith.constant 1 : index
    %c32_80 = arith.constant 32 : index
    %c0_81 = arith.constant 0 : index
    %171 = vector.load %arg1[%c1_79, %c32_80, %c0_81] : memref<2x72x128xf32, #tpu.memory_space<vmem>>, vector<1x32x32xf32>
    %172 = vector.shape_cast %171 : vector<1x32x32xf32> to vector<32x32xf32>
    %c1_82 = arith.constant 1 : index
    %c64_83 = arith.constant 64 : index
    %c0_84 = arith.constant 0 : index
    %173 = vector.load %arg1[%c1_82, %c64_83, %c0_84] : memref<2x72x128xf32, #tpu.memory_space<vmem>>, vector<1x8x128xf32>
    %174 = vector.shape_cast %173 : vector<1x8x128xf32> to vector<8x128xf32>
    %175 = vector.extract_strided_slice %174 {offsets = [0, 0], sizes = [1, 128], strides = [1, 1]} : vector<8x128xf32> to vector<1x128xf32>
    %176 = vector.extract_strided_slice %174 {offsets = [1, 0], sizes = [1, 32], strides = [1, 1]} : vector<8x128xf32> to vector<1x32xf32>
    %177 = vector.extract_strided_slice %174 {offsets = [2, 0], sizes = [1, 32], strides = [1, 1]} : vector<8x128xf32> to vector<1x32xf32>
    %178 = vector.extract_strided_slice %174 {offsets = [3, 0], sizes = [1, 32], strides = [1, 1]} : vector<8x128xf32> to vector<1x32xf32>
    %179 = vector.extract_strided_slice %174 {offsets = [4, 0], sizes = [1, 32], strides = [1, 1]} : vector<8x128xf32> to vector<1x32xf32>
    %180 = vector.extract_strided_slice %174 {offsets = [5, 0], sizes = [1, 32], strides = [1, 1]} : vector<8x128xf32> to vector<1x32xf32>
    %181 = vector.extract_strided_slice %174 {offsets = [6, 0], sizes = [1, 32], strides = [1, 1]} : vector<8x128xf32> to vector<1x32xf32>
    %cst_85 = arith.constant dense<0.000000e+00> : vector<16xf32>
    %182 = vector.multi_reduction <add>, %168, %cst_85 [1] : vector<16x32xf32> to vector<16xf32>
    %183 = vector.shape_cast %182 : vector<16xf32> to vector<16x1xf32>
    %cst_86 = arith.constant 3.200000e+01 : f32
    %184 = vector.broadcast %cst_86 : f32 to vector<16x1xf32>
    %185 = arith.divf %183, %184 : vector<16x1xf32>
    %186 = vector.broadcast %185 : vector<16x1xf32> to vector<16x32xf32>
    %187 = arith.subf %168, %186 : vector<16x32xf32>
    %188 = arith.mulf %187, %187 : vector<16x32xf32>
    %cst_87 = arith.constant dense<0.000000e+00> : vector<16xf32>
    %189 = vector.multi_reduction <add>, %188, %cst_87 [1] : vector<16x32xf32> to vector<16xf32>
    %190 = vector.shape_cast %189 : vector<16xf32> to vector<16x1xf32>
    %cst_88 = arith.constant 3.200000e+01 : f32
    %191 = vector.broadcast %cst_88 : f32 to vector<16x1xf32>
    %192 = arith.divf %190, %191 : vector<16x1xf32>
    %193 = vector.broadcast %185 : vector<16x1xf32> to vector<16x32xf32>
    %194 = arith.subf %168, %193 : vector<16x32xf32>
    %cst_89 = arith.constant 9.99999974E-6 : f32
    %195 = vector.broadcast %cst_89 : f32 to vector<16x1xf32>
    %196 = arith.addf %192, %195 : vector<16x1xf32>
    %197 = math.rsqrt %196 : vector<16x1xf32>
    %198 = vector.broadcast %197 : vector<16x1xf32> to vector<16x32xf32>
    %199 = arith.mulf %194, %198 : vector<16x32xf32>
    %200 = vector.broadcast %177 : vector<1x32xf32> to vector<16x32xf32>
    %201 = arith.mulf %199, %200 : vector<16x32xf32>
    %202 = vector.broadcast %178 : vector<1x32xf32> to vector<16x32xf32>
    %203 = arith.addf %201, %202 : vector<16x32xf32>
    %cst_90 = arith.constant dense<0.000000e+00> : vector<16x128xf32>
    %204 = tpu.matmul %203, %170, %cst_90 {dimension_numbers = #tpu.dot_dimension_numbers<[1], [0], [0], [1], [0, 0, 1, 1], [], []>} : vector<16x32xf32>, vector<32x128xf32>, vector<16x128xf32> -> vector<16x128xf32>
    %205 = vector.broadcast %175 : vector<1x128xf32> to vector<16x128xf32>
    %206 = arith.addf %204, %205 : vector<16x128xf32>
    %207 = vector.extract_strided_slice %206 {offsets = [0, 0], sizes = [16, 32], strides = [1, 1]} : vector<16x128xf32> to vector<16x32xf32>
    %208 = vector.shape_cast %207 : vector<16x32xf32> to vector<2x8x4x8xf32>
    %209 = tpu.transpose %208, [0, 2, 1, 3] : vector<2x8x4x8xf32> -> vector<2x4x8x8xf32>
    %210 = vector.shape_cast %209 : vector<2x4x8x8xf32> to vector<8x8x8xf32>
    %211 = vector.extract_strided_slice %206 {offsets = [0, 32], sizes = [16, 32], strides = [1, 1]} : vector<16x128xf32> to vector<16x32xf32>
    %212 = vector.shape_cast %211 : vector<16x32xf32> to vector<2x8x4x8xf32>
    %213 = tpu.transpose %212, [0, 2, 1, 3] : vector<2x8x4x8xf32> -> vector<2x4x8x8xf32>
    %214 = vector.shape_cast %213 : vector<2x4x8x8xf32> to vector<8x8x8xf32>
    %215 = vector.extract_strided_slice %206 {offsets = [0, 64], sizes = [16, 32], strides = [1, 1]} : vector<16x128xf32> to vector<16x32xf32>
    %216 = vector.shape_cast %215 : vector<16x32xf32> to vector<2x8x4x8xf32>
    %217 = tpu.transpose %216, [0, 2, 1, 3] : vector<2x8x4x8xf32> -> vector<2x4x8x8xf32>
    %218 = vector.shape_cast %217 : vector<2x4x8x8xf32> to vector<8x8x8xf32>
    "tpu.trace_start"() <{level = 10 : i32, message = "gnd,gmd->gnm"}> : () -> ()
    %cst_91 = arith.constant dense<0.000000e+00> : vector<8x8x8xf32>
    %219 = tpu.matmul %210, %214, %cst_91 {dimension_numbers = #tpu.dot_dimension_numbers<[2], [2], [1], [1], [0, 0, 0, 1, 1, 1], [0], [0]>} : vector<8x8x8xf32>, vector<8x8x8xf32>, vector<8x8x8xf32> -> vector<8x8x8xf32>
    "tpu.trace_stop"() : () -> ()
    %cst_92 = arith.constant dense<0xFF800000> : vector<8x8xf32>
    %220 = vector.multi_reduction <maximumf>, %219, %cst_92 [2] : vector<8x8x8xf32> to vector<8x8xf32>
    %221 = vector.shape_cast %220 : vector<8x8xf32> to vector<8x8x1xf32>
    %222 = vector.broadcast %221 : vector<8x8x1xf32> to vector<8x8x8xf32>
    %223 = arith.subf %219, %222 : vector<8x8x8xf32>
    %224 = math.exp %223 : vector<8x8x8xf32>
    %cst_93 = arith.constant dense<0.000000e+00> : vector<8x8xf32>
    %225 = vector.multi_reduction <add>, %224, %cst_93 [2] : vector<8x8x8xf32> to vector<8x8xf32>
    %226 = vector.shape_cast %225 : vector<8x8xf32> to vector<8x8x1xf32>
    %227 = tpu.reciprocal %226 {approx = true} : vector<8x8x1xf32> -> vector<8x8x1xf32>
    %228 = vector.broadcast %227 : vector<8x8x1xf32> to vector<8x8x8xf32>
    %229 = arith.mulf %224, %228 : vector<8x8x8xf32>
    "tpu.trace_start"() <{level = 10 : i32, message = "gnm,gmd->gnd"}> : () -> ()
    %cst_94 = arith.constant dense<0.000000e+00> : vector<8x8x8xf32>
    %230 = tpu.matmul %229, %218, %cst_94 {dimension_numbers = #tpu.dot_dimension_numbers<[2], [1], [1], [2], [0, 0, 0, 1, 1, 2], [0], [0]>} : vector<8x8x8xf32>, vector<8x8x8xf32>, vector<8x8x8xf32> -> vector<8x8x8xf32>
    "tpu.trace_stop"() : () -> ()
    %231 = vector.shape_cast %230 : vector<8x8x8xf32> to vector<2x4x8x8xf32>
    %232 = tpu.transpose %231, [0, 2, 1, 3] : vector<2x4x8x8xf32> -> vector<2x8x4x8xf32>
    %233 = vector.shape_cast %232 : vector<2x8x4x8xf32> to vector<16x32xf32>
    %cst_95 = arith.constant dense<0.000000e+00> : vector<16x32xf32>
    %234 = tpu.matmul %233, %172, %cst_95 {dimension_numbers = #tpu.dot_dimension_numbers<[1], [0], [0], [1], [0, 0, 1, 1], [], []>} : vector<16x32xf32>, vector<32x32xf32>, vector<16x32xf32> -> vector<16x32xf32>
    %235 = vector.broadcast %176 : vector<1x32xf32> to vector<16x32xf32>
    %236 = arith.addf %234, %235 : vector<16x32xf32>
    %237 = arith.addf %168, %236 : vector<16x32xf32>
    %cst_96 = arith.constant dense<0.000000e+00> : vector<16xf32>
    %238 = vector.multi_reduction <add>, %237, %cst_96 [1] : vector<16x32xf32> to vector<16xf32>
    %239 = vector.shape_cast %238 : vector<16xf32> to vector<16x1xf32>
    %cst_97 = arith.constant 3.200000e+01 : f32
    %240 = vector.broadcast %cst_97 : f32 to vector<16x1xf32>
    %241 = arith.divf %239, %240 : vector<16x1xf32>
    %242 = vector.broadcast %241 : vector<16x1xf32> to vector<16x32xf32>
    %243 = arith.subf %237, %242 : vector<16x32xf32>
    %244 = arith.mulf %243, %243 : vector<16x32xf32>
    %cst_98 = arith.constant dense<0.000000e+00> : vector<16xf32>
    %245 = vector.multi_reduction <add>, %244, %cst_98 [1] : vector<16x32xf32> to vector<16xf32>
    %246 = vector.shape_cast %245 : vector<16xf32> to vector<16x1xf32>
    %cst_99 = arith.constant 3.200000e+01 : f32
    %247 = vector.broadcast %cst_99 : f32 to vector<16x1xf32>
    %248 = arith.divf %246, %247 : vector<16x1xf32>
    %249 = vector.broadcast %241 : vector<16x1xf32> to vector<16x32xf32>
    %250 = arith.subf %237, %249 : vector<16x32xf32>
    %cst_100 = arith.constant 9.99999974E-6 : f32
    %251 = vector.broadcast %cst_100 : f32 to vector<16x1xf32>
    %252 = arith.addf %248, %251 : vector<16x1xf32>
    %253 = math.rsqrt %252 : vector<16x1xf32>
    %254 = vector.broadcast %253 : vector<16x1xf32> to vector<16x32xf32>
    %255 = arith.mulf %250, %254 : vector<16x32xf32>
    %256 = vector.broadcast %179 : vector<1x32xf32> to vector<16x32xf32>
    %257 = arith.mulf %255, %256 : vector<16x32xf32>
    %258 = vector.broadcast %180 : vector<1x32xf32> to vector<16x32xf32>
    %259 = arith.addf %257, %258 : vector<16x32xf32>
    %260 = arith.truncf %259 : vector<16x32xf32> to vector<16x32xbf16>
    %cst_101 = arith.constant 0.000000e+00 : f32
    %261 = vector.broadcast %cst_101 : f32 to vector<16x32xf32>
    %c1_102 = arith.constant 1 : index
    %c0_103 = arith.constant 0 : index
    %c0_104 = arith.constant 0 : index
    %c0_105 = arith.constant 0 : index
    %262 = vector.load %arg3[%c1_102, %c0_103, %c0_104, %c0_105] : memref<2x2x32x2048xbf16, #tpu.memory_space<vmem>>, vector<1x1x32x512xbf16>
    %263 = vector.shape_cast %262 : vector<1x1x32x512xbf16> to vector<32x512xbf16>
    %c1_106 = arith.constant 1 : index
    %c0_107 = arith.constant 0 : index
    %c0_108 = arith.constant 0 : index
    %264 = vector.load %arg2[%c1_106, %c0_107, %c0_108] : memref<2x1x2048xf32, #tpu.memory_space<vmem>>, vector<1x1x512xf32>
    %265 = vector.shape_cast %264 : vector<1x1x512xf32> to vector<1x512xf32>
    %cst_109 = arith.constant dense<0.000000e+00> : vector<16x512xf32>
    %266 = tpu.matmul %260, %263, %cst_109 {dimension_numbers = #tpu.dot_dimension_numbers<[1], [0], [0], [1], [0, 0, 1, 1], [], []>} : vector<16x32xbf16>, vector<32x512xbf16>, vector<16x512xf32> -> vector<16x512xf32>
    %267 = vector.broadcast %265 : vector<1x512xf32> to vector<16x512xf32>
    %268 = arith.addf %266, %267 : vector<16x512xf32>
    %269 = arith.negf %268 : vector<16x512xf32>
    %270 = math.exp %269 : vector<16x512xf32>
    %cst_110 = arith.constant 1.000000e+00 : f32
    %271 = vector.broadcast %cst_110 : f32 to vector<16x512xf32>
    %272 = arith.addf %271, %270 : vector<16x512xf32>
    %273 = arith.divf %271, %272 : vector<16x512xf32>
    %274 = arith.mulf %268, %273 : vector<16x512xf32>
    %c1_111 = arith.constant 1 : index
    %c1_112 = arith.constant 1 : index
    %c0_113 = arith.constant 0 : index
    %c0_114 = arith.constant 0 : index
    %275 = vector.load %arg3[%c1_111, %c1_112, %c0_113, %c0_114] : memref<2x2x32x2048xbf16, #tpu.memory_space<vmem>>, vector<1x1x32x512xbf16>
    %276 = vector.shape_cast %275 : vector<1x1x32x512xbf16> to vector<32x512xbf16>
    %277 = arith.truncf %274 : vector<16x512xf32> to vector<16x512xbf16>
    %cst_115 = arith.constant dense<0.000000e+00> : vector<16x32xf32>
    %278 = tpu.matmul %277, %276, %cst_115 {dimension_numbers = #tpu.dot_dimension_numbers<[1], [1], [0], [0], [0, 0, 1, 0], [], []>} : vector<16x512xbf16>, vector<32x512xbf16>, vector<16x32xf32> -> vector<16x32xf32>
    %279 = arith.addf %261, %278 : vector<16x32xf32>
    %c1_116 = arith.constant 1 : index
    %c0_117 = arith.constant 0 : index
    %c0_118 = arith.constant 0 : index
    %c512_119 = arith.constant 512 : index
    %280 = vector.load %arg3[%c1_116, %c0_117, %c0_118, %c512_119] : memref<2x2x32x2048xbf16, #tpu.memory_space<vmem>>, vector<1x1x32x512xbf16>
    %281 = vector.shape_cast %280 : vector<1x1x32x512xbf16> to vector<32x512xbf16>
    %c1_120 = arith.constant 1 : index
    %c0_121 = arith.constant 0 : index
    %c512_122 = arith.constant 512 : index
    %282 = vector.load %arg2[%c1_120, %c0_121, %c512_122] : memref<2x1x2048xf32, #tpu.memory_space<vmem>>, vector<1x1x512xf32>
    %283 = vector.shape_cast %282 : vector<1x1x512xf32> to vector<1x512xf32>
    %cst_123 = arith.constant dense<0.000000e+00> : vector<16x512xf32>
    %284 = tpu.matmul %260, %281, %cst_123 {dimension_numbers = #tpu.dot_dimension_numbers<[1], [0], [0], [1], [0, 0, 1, 1], [], []>} : vector<16x32xbf16>, vector<32x512xbf16>, vector<16x512xf32> -> vector<16x512xf32>
    %285 = vector.broadcast %283 : vector<1x512xf32> to vector<16x512xf32>
    %286 = arith.addf %284, %285 : vector<16x512xf32>
    %287 = arith.negf %286 : vector<16x512xf32>
    %288 = math.exp %287 : vector<16x512xf32>
    %cst_124 = arith.constant 1.000000e+00 : f32
    %289 = vector.broadcast %cst_124 : f32 to vector<16x512xf32>
    %290 = arith.addf %289, %288 : vector<16x512xf32>
    %291 = arith.divf %289, %290 : vector<16x512xf32>
    %292 = arith.mulf %286, %291 : vector<16x512xf32>
    %c1_125 = arith.constant 1 : index
    %c1_126 = arith.constant 1 : index
    %c0_127 = arith.constant 0 : index
    %c512_128 = arith.constant 512 : index
    %293 = vector.load %arg3[%c1_125, %c1_126, %c0_127, %c512_128] : memref<2x2x32x2048xbf16, #tpu.memory_space<vmem>>, vector<1x1x32x512xbf16>
    %294 = vector.shape_cast %293 : vector<1x1x32x512xbf16> to vector<32x512xbf16>
    %295 = arith.truncf %292 : vector<16x512xf32> to vector<16x512xbf16>
    %cst_129 = arith.constant dense<0.000000e+00> : vector<16x32xf32>
    %296 = tpu.matmul %295, %294, %cst_129 {dimension_numbers = #tpu.dot_dimension_numbers<[1], [1], [0], [0], [0, 0, 1, 0], [], []>} : vector<16x512xbf16>, vector<32x512xbf16>, vector<16x32xf32> -> vector<16x32xf32>
    %297 = arith.addf %279, %296 : vector<16x32xf32>
    %c1_130 = arith.constant 1 : index
    %c0_131 = arith.constant 0 : index
    %c0_132 = arith.constant 0 : index
    %c1024_133 = arith.constant 1024 : index
    %298 = vector.load %arg3[%c1_130, %c0_131, %c0_132, %c1024_133] : memref<2x2x32x2048xbf16, #tpu.memory_space<vmem>>, vector<1x1x32x512xbf16>
    %299 = vector.shape_cast %298 : vector<1x1x32x512xbf16> to vector<32x512xbf16>
    %c1_134 = arith.constant 1 : index
    %c0_135 = arith.constant 0 : index
    %c1024_136 = arith.constant 1024 : index
    %300 = vector.load %arg2[%c1_134, %c0_135, %c1024_136] : memref<2x1x2048xf32, #tpu.memory_space<vmem>>, vector<1x1x512xf32>
    %301 = vector.shape_cast %300 : vector<1x1x512xf32> to vector<1x512xf32>
    %cst_137 = arith.constant dense<0.000000e+00> : vector<16x512xf32>
    %302 = tpu.matmul %260, %299, %cst_137 {dimension_numbers = #tpu.dot_dimension_numbers<[1], [0], [0], [1], [0, 0, 1, 1], [], []>} : vector<16x32xbf16>, vector<32x512xbf16>, vector<16x512xf32> -> vector<16x512xf32>
    %303 = vector.broadcast %301 : vector<1x512xf32> to vector<16x512xf32>
    %304 = arith.addf %302, %303 : vector<16x512xf32>
    %305 = arith.negf %304 : vector<16x512xf32>
    %306 = math.exp %305 : vector<16x512xf32>
    %cst_138 = arith.constant 1.000000e+00 : f32
    %307 = vector.broadcast %cst_138 : f32 to vector<16x512xf32>
    %308 = arith.addf %307, %306 : vector<16x512xf32>
    %309 = arith.divf %307, %308 : vector<16x512xf32>
    %310 = arith.mulf %304, %309 : vector<16x512xf32>
    %c1_139 = arith.constant 1 : index
    %c1_140 = arith.constant 1 : index
    %c0_141 = arith.constant 0 : index
    %c1024_142 = arith.constant 1024 : index
    %311 = vector.load %arg3[%c1_139, %c1_140, %c0_141, %c1024_142] : memref<2x2x32x2048xbf16, #tpu.memory_space<vmem>>, vector<1x1x32x512xbf16>
    %312 = vector.shape_cast %311 : vector<1x1x32x512xbf16> to vector<32x512xbf16>
    %313 = arith.truncf %310 : vector<16x512xf32> to vector<16x512xbf16>
    %cst_143 = arith.constant dense<0.000000e+00> : vector<16x32xf32>
    %314 = tpu.matmul %313, %312, %cst_143 {dimension_numbers = #tpu.dot_dimension_numbers<[1], [1], [0], [0], [0, 0, 1, 0], [], []>} : vector<16x512xbf16>, vector<32x512xbf16>, vector<16x32xf32> -> vector<16x32xf32>
    %315 = arith.addf %297, %314 : vector<16x32xf32>
    %c1_144 = arith.constant 1 : index
    %c0_145 = arith.constant 0 : index
    %c0_146 = arith.constant 0 : index
    %c1536_147 = arith.constant 1536 : index
    %316 = vector.load %arg3[%c1_144, %c0_145, %c0_146, %c1536_147] : memref<2x2x32x2048xbf16, #tpu.memory_space<vmem>>, vector<1x1x32x512xbf16>
    %317 = vector.shape_cast %316 : vector<1x1x32x512xbf16> to vector<32x512xbf16>
    %c1_148 = arith.constant 1 : index
    %c0_149 = arith.constant 0 : index
    %c1536_150 = arith.constant 1536 : index
    %318 = vector.load %arg2[%c1_148, %c0_149, %c1536_150] : memref<2x1x2048xf32, #tpu.memory_space<vmem>>, vector<1x1x512xf32>
    %319 = vector.shape_cast %318 : vector<1x1x512xf32> to vector<1x512xf32>
    %cst_151 = arith.constant dense<0.000000e+00> : vector<16x512xf32>
    %320 = tpu.matmul %260, %317, %cst_151 {dimension_numbers = #tpu.dot_dimension_numbers<[1], [0], [0], [1], [0, 0, 1, 1], [], []>} : vector<16x32xbf16>, vector<32x512xbf16>, vector<16x512xf32> -> vector<16x512xf32>
    %321 = vector.broadcast %319 : vector<1x512xf32> to vector<16x512xf32>
    %322 = arith.addf %320, %321 : vector<16x512xf32>
    %323 = arith.negf %322 : vector<16x512xf32>
    %324 = math.exp %323 : vector<16x512xf32>
    %cst_152 = arith.constant 1.000000e+00 : f32
    %325 = vector.broadcast %cst_152 : f32 to vector<16x512xf32>
    %326 = arith.addf %325, %324 : vector<16x512xf32>
    %327 = arith.divf %325, %326 : vector<16x512xf32>
    %328 = arith.mulf %322, %327 : vector<16x512xf32>
    %c1_153 = arith.constant 1 : index
    %c1_154 = arith.constant 1 : index
    %c0_155 = arith.constant 0 : index
    %c1536_156 = arith.constant 1536 : index
    %329 = vector.load %arg3[%c1_153, %c1_154, %c0_155, %c1536_156] : memref<2x2x32x2048xbf16, #tpu.memory_space<vmem>>, vector<1x1x32x512xbf16>
    %330 = vector.shape_cast %329 : vector<1x1x32x512xbf16> to vector<32x512xbf16>
    %331 = arith.truncf %328 : vector<16x512xf32> to vector<16x512xbf16>
    %cst_157 = arith.constant dense<0.000000e+00> : vector<16x32xf32>
    %332 = tpu.matmul %331, %330, %cst_157 {dimension_numbers = #tpu.dot_dimension_numbers<[1], [1], [0], [0], [0, 0, 1, 0], [], []>} : vector<16x512xbf16>, vector<32x512xbf16>, vector<16x32xf32> -> vector<16x32xf32>
    %333 = arith.addf %315, %332 : vector<16x32xf32>
    %334 = arith.addf %237, %333 : vector<16x32xf32>
    %335 = vector.broadcast %181 : vector<1x32xf32> to vector<16x32xf32>
    %336 = arith.addf %334, %335 : vector<16x32xf32>
    %c0_158 = arith.constant 0 : index
    %c0_159 = arith.constant 0 : index
    %337 = vector.load %arg4[%c0_158, %c0_159] : memref<16x32xf32, #tpu.memory_space<vmem>>, vector<16x32xf32>
    tpu.vector_store %arg4[%c0_158, %c0_159], %336 {strides = array<i32>} : memref<16x32xf32, #tpu.memory_space<vmem>>, vector<16x32xf32>,
    return
  }
}

</mosaic_0001>

<bundles_post_ra>
// kernel: tpu_custom_call.1
= control target key start
LH: loop header
LB: loop body
LE: loop exit
PB: predicated region body
PF: predicated region fallthrough
CT: control target
= control target key end

     0   :  { %9 = vsyncpa [#allocation3], 0  ;;  %s10704_s0 = inlined_call_operand.hbm [shape: f32[16,32], index: 0, kind: input, shape index: {}]   ;;  %s10705_s1 = inlined_call_operand.hbm [shape: f32[2,72,128], index: 1, kind: input, shape index: {}]   ;;  %s10706_s2 = inlined_call_operand.hbm [shape: f32[2,1,2048], index: 2, kind: input, shape index: {}]   ;;  %s10707_s3 = inlined_call_operand.hbm [shape: bf16[2,2,32,2048], index: 3, kind: input, shape index: {}]   ;;  %s10708_s4 = inlined_call_operand.hbm [shape: f32[16,32], index: 4, kind: output, shape index: {}]  }
   0x1   :  { %10 = vsyncpa [#allocation6], 0 }
   0x2   :  { %11 = vsyncpa [#allocation9], 0 }
   0x3   :  { %12 = vsyncpa [#allocation4], 0  ;;  %s9412_s15 = smov [#allocation5]   ;;  %s9413_s17 = smov [#allocation2]  }
   0x4   :  { %s30_s16 = sshll.u32 %s9412_s15, 4  ;;  %s18_s18 = sshll.u32 %s9413_s17, 4  ;;  %s31_s16 = int_to_ptr.vmem [resolvable:$true] %s30_s16  ;;  %s19_s18 = int_to_ptr.vmem [resolvable:$true] %s18_s18 }
   0x5   :  { %s9312_s19 = scalar_lea.vmem %s31_s16, 2304  ;;  %p9317_p1 = scmp.lt.s32.totalorder %s31_s16, %s31_s16 }
   0x6   :  { %p9313_p0 = scmp.ne.s32.totalorder %s31_s16, %s9312_s19  ;;  %p9318_p2 = scmp.lt.s32.totalorder %s9312_s19, %s9312_s19 }
   0x8   :  { %p9319_p3 = por %p9318_p2, %p9317_p1 }
   0xa   :  { %p9320_p4 = pnand %p9319_p3, %p9313_p0 }
   0xc   :  { %9323 = shalt.err (!%p9320_p4)
}
   0xd   :  { %s9414_s20 = smov 128   ;;  %s9415_s21 = smov 8  }
   0xe   :  { %36 = dma.hbm_to_vmem [thread:$0]  %s10705_s1, 2304, %s31_s16, [#allocation6], %s9414_s20, %s9414_s20, %s9415_s21  }
   0xf   :  { %s9332_s24 = scalar_lea.vmem %s19_s18, 256  ;;  %p9337_p6 = scmp.lt.s32.totalorder %s19_s18, %s19_s18 }
  0x10   :  { %p9333_p5 = scmp.ne.s32.totalorder %s19_s18, %s9332_s24  ;;  %p9338_p7 = scmp.lt.s32.totalorder %s9332_s24, %s9332_s24 }
  0x12   :  { %p9339_p8 = por %p9338_p7, %p9337_p6 }
  0x14   :  { %p9340_p9 = pnand %p9339_p8, %p9333_p5 }
  0x16   :  { %9343 = shalt.err (!%p9340_p9)
}
  0x17   :  { %24 = dma.hbm_to_vmem [thread:$0]  %s10704_s0, 256, %s19_s18, [#allocation3], %s9414_s20, %s9414_s20, %s9415_s21  }
  0x18   :  { %s9416_s27 = smov [#allocation7]  }
  0x19   :  { %s42_s28 = sshll.u32 %s9416_s27, 4  ;;  %s43_s28 = int_to_ptr.vmem [resolvable:$true] %s42_s28 }
  0x1a   :  { %s9352_s29 = scalar_lea.vmem %s43_s28, 512  ;;  %p9357_p11 = scmp.lt.s32.totalorder %s43_s28, %s43_s28 }
  0x1b   :  { %p9353_p10 = scmp.ne.s32.totalorder %s43_s28, %s9352_s29  ;;  %p9358_p12 = scmp.lt.s32.totalorder %s9352_s29, %s9352_s29 }
  0x1d   :  { %p9359_p13 = por %p9358_p12, %p9357_p11 }
  0x1f   :  { %p9360_p0 = pnand %p9359_p13, %p9353_p10 }
  0x21   :  { %9363 = shalt.err (!%p9360_p0)
}
  0x22   :  { %s9417_s1 = smov 256   ;;  %s9418_s30 = smov 16  }
  0x23   :  { %48 = dma.hbm_to_vmem [thread:$0]  %s10706_s2, 512, %s43_s28, [#allocation6], %s9417_s1, %s9417_s1, %s9418_s30  }
  0x24   :  { %s9419_s7 = smov [#allocation8]  }
  0x25   :  { %s54_s8 = sshll.u32 %s9419_s7, 4  ;;  %s55_s8 = int_to_ptr.vmem [resolvable:$true] %s54_s8 }
  0x26   :  { %s9372_s0 = scalar_lea.vmem %s55_s8, 16384  ;;  %p9377_p2 = scmp.lt.s32.totalorder %s55_s8, %s55_s8 }
  0x27   :  { %p9373_p1 = scmp.ne.s32.totalorder %s55_s8, %s9372_s0  ;;  %p9378_p3 = scmp.lt.s32.totalorder %s9372_s0, %s9372_s0 }
  0x29   :  { %p9379_p4 = por %p9378_p3, %p9377_p2 }
  0x2b   :  { %p9380_p5 = pnand %p9379_p4, %p9373_p1 }
  0x2d   :  { %9383 = shalt.err (!%p9380_p5)
}
  0x2e   :  { %s9420_s9 = smov 1024   ;;  %s9421_s10 = smov 64  }
  0x2f   :  { %60 = dma.hbm_to_vmem [thread:$0]  %s10707_s3, 16384, %s55_s8, [#allocation9], %s9420_s9, %s9420_s9, %s9421_s10  }
  0x30   :  { %9404 = dma.done.wait [#allocation3], 256  }
  0x31   :  { %9405 = vsyncadd [#allocation3], 4294967040 }
  0x32   :  { %9406 = dma.done.wait [#allocation6], 2816  }
  0x33   :  { %9407 = vsyncadd [#allocation6], 4294964480 }
  0x34   :  { %9408 = dma.done.wait [#allocation9], 16384  }
  0x35   :  { %9409 = vsyncadd [#allocation9], 4294950912  ;;  %vm85_vm0 = vcmask 261120   ;;  %v74_v0 = vld [vmem:[#allocation2] sm:$0xff]  ;;  %v75_v1 = vld [vmem:[#allocation2 + $0x8] sm:$0xff]  ;;  %v113_v23 = vlaneseq  ;;  %s9422_s2 = smov 112  }
  0x36   :  { %v86_v2 = vsel %vm85_vm0, %v74_v0, 0.0  ;;  %v89_v3 = vsel %vm85_vm0, %v75_v1, 0.0  ;;  %v79_v14 = vld [vmem:[#allocation5 + $0x18] sm:$0xff]  ;;  %v78_v15 = vld [vmem:[#allocation5 + $0x10] sm:$0xff]  ;;  %v77_v16 = vld [vmem:[#allocation5 + $0x8] sm:$0xff]  ;;  %s9423_s3 = smov 120  }
  0x37   :  { %87 = vadd.xlane.f32.xlu0 %v86_v2  ;;  %8737 = vmatprep.subr.mxu0 %v79_v14  ;;  %v76_v17 = vld [vmem:[#allocation5] sm:$0xff]  ;;  %v9482_v25 = vshrl.u32 %v113_v23, 7  ;;  %s9424_s13 = smov 104   ;;  %s9425_s14 = smov 96   ;;  %v9426_v50 = vmov 0.0   ;;  %vm9427_vm1 = vmmov 0  }
  0x38   :  { %8738 = vmatpush3.msra.mxu0 %v79_v14  ;;  %v84_v27 = vld [vmem:[#allocation5 + $0x40] sm:$0xff]  ;;  %8748 = vmatprep.subr.mxu1 %v9426_v50  ;;  %v9428_v52 = vmov 1983009808   ;;  %v9429_v55 = vmov 1934713408   ;;  %vm1094_vm2 = vcmask 64512  }
  0x39   :  { %8739 = vmatprep.subr.mxu0 %v78_v15  ;;  %v9485_v26 = vsub.s32 2, %v9482_v25  ;;  %v9488_v28 = vsub.s32 3, %v9482_v25  ;;  %v9495_v39 = vsub.s32 0, %v9482_v25  ;;  %8750 = vmatprep.mubr.msk.f32.mxu1 %vm9427_vm1, %v9426_v50  ;;  %v233_v53 = vunpack.c.l.s4 %v9428_v52  ;;  %s9430_s15 = smov 24   ;;  %s9432_s16 = smov [#allocation10]  }
  0x3a   :  { %8740 = vmatpush3.msra.mxu0 %v78_v15  ;;  %v265_v56 = vunpack.c.l.s4 %v9429_v55  ;;  %vm2673_vm3 = vcmask 130048   ;;  %vm2676_vm4 = vcmask 195584   ;;  %s8339_s17 = sshll.u32 %s9432_s16, 4  ;;  %s8340_s17 = int_to_ptr.vmem [resolvable:$true] %s8339_s17 }
  0x3b   :  { %90 = vadd.xlane.f32.xlu0 %v89_v3  ;;  %8741 = vmatprep.subr.mxu0 %v77_v16  ;;  %v116_v29 = vrot.slane %v84_v27, %v9485_v26  ;;  %v122_v32 = vrot.slane %v84_v27, %v9488_v28  ;;  %v128_v41 = vrot.slane %v84_v27, %v9495_v39  ;;  %v234_v54 = vunpack.c.0.s8 %v233_v53  ;;  %s9384_s18 = scalar_lea.vmem %s8340_s17, 256  ;;  %p9389_p7 = scmp.lt.s32.totalorder %s8340_s17, %s8340_s17 }
  0x3c   :  { %8742 = vmatpush3.msra.mxu0 %v77_v16  ;;  %v266_v61 = vunpack.c.0.s8 %v265_v56  ;;  %p9385_p6 = scmp.ne.s32.totalorder %s8340_s17, %s9384_s18  ;;  %p9390_p8 = scmp.lt.s32.totalorder %s9384_s18, %s9384_s18 }
  0x3d   :  { %8743 = vmatprep.subr.mxu0 %v76_v17  ;;  %v9551_v58 = vsub.s32 %v234_v54, %v9482_v25 }
  0x3e   :  { %8744 = vmatpush3.msra.mxu0 %v76_v17  ;;  %v9563_v2 = vsub.s32 %v266_v61, %v9482_v25  ;;  %p9391_p9 = por %p9390_p8, %p9389_p7 }
  0x3f   :  { %8758 = vmatprep.subr.mxu0 %v9426_v50 }
  0x40   :  { %p9392_p10 = pnand %p9391_p9, %p9385_p6 }
  0xc0   :  { %v88_v4 = vpop.xlane.xlu0 %87 }
  0xc1   :  { %v93_v5 = vmul.f32 0.03125, %v88_v4 }
  0xc3   :  { %v95_v6 = vsub.f32 %v74_v0, %v93_v5 }
  0xc4   :  { %v91_v7 = vpop.xlane.xlu0 %90 }
  0xc5   :  { %v94_v8 = vmul.f32 0.03125, %v91_v7  ;;  %v97_v9 = vmul.f32 %v95_v6, %v95_v6 }
  0xc7   :  { %v96_v10 = vsub.f32 %v75_v1, %v94_v8  ;;  %v99_v11 = vsel %vm85_vm0, %v97_v9, 0.0 }
  0xc8   :  { %100 = vadd.xlane.f32.xlu1 %v99_v11 }
  0xc9   :  { %v98_v12 = vmul.f32 %v96_v10, %v96_v10 }
  0xcb   :  { %v102_v13 = vsel %vm85_vm0, %v98_v12, 0.0 }
  0xcc   :  { %103 = vadd.xlane.f32.xlu1 %v102_v13 }
 0x151   :  { %v101_v18 = vpop.xlane.xlu1 %100 }
 0x152   :  { %v105_v19 = vmul.f32 0.03125, %v101_v18 }
 0x154   :  { %v107_v20 = vadd.f32 1e-05, %v105_v19 }
 0x155   :  { %v104_v21 = vpop.xlane.xlu1 %103 }
 0x156   :  { %8962 = vrsqrt.f32 %v107_v20  ;;  %v106_v22 = vmul.f32 0.03125, %v104_v21 }
 0x158   :  { %v108_v24 = vadd.f32 1e-05, %v106_v22 }
 0x15a   :  { %8964 = vrsqrt.f32 %v108_v24 }
 0x163   :  { %v8963_v30 = vpop.eup %8962 }
 0x164   :  { %v111_v31 = vmul.f32 %v8963_v30, %v95_v6 }
 0x166   :  { %v117_v33 = vmul.f32 %v116_v29, %v111_v31 }
 0x167   :  { %v8965_v34 = vpop.eup %8964 }
 0x168   :  { %v112_v35 = vmul.f32 %v8965_v34, %v96_v10  ;;  %v123_v36 = vadd.f32 %v122_v32, %v117_v33 }
 0x16a   :  { %v118_v37 = vmul.f32 %v116_v29, %v112_v35  ;;  %8745 = vmatprep.mubr.msk.f32.mxu0 %vm85_vm0, %v123_v36 }
 0x16c   :  { %v124_v38 = vadd.f32 %v122_v32, %v118_v37 }
 0x16e   :  { %8746 = vmatmul.mubr.msk.f32.vlgmr.msra.gmra.mxu0 %vm85_vm0, %v124_v38 }
 0x16f   :  { %8760 = vmatprep.mubr.msk.f32.mxu0 %vm9427_vm1, %v9426_v50 }
 0x22e   :  { %v8747_v40 = vpop.f32.mrf.mxu0 }
 0x22f   :  { %v9504_v44 = vadd.f32 %v8747_v40, %v128_v41 }
 0x230   :  { %v201_v42 = vpop.f32.mrf.mxu0 }
 0x231   :  { %v9498_v43 = vadd.f32 %v201_v42, %v128_v41 }
 0x233   :  { %218 = vrot.lane.b32.xlu1 %v9498_v43, %s9422_s2  ;;  %212 = vrot.lane.b32.xlu0 %v9498_v43, %s9423_s3 }
 0x237   :  { %224 = vrot.lane.b32.xlu1 %v9498_v43, %s9424_s13  ;;  %220 = vrot.lane.b32.xlu0 %v9504_v44, %s9422_s2 }
 0x23b   :  { %214 = vrot.lane.b32.xlu1 %v9504_v44, %s9423_s3  ;;  %502 = vrot.lane.b32.xlu0 %v9498_v43, %s9425_s14 }
 0x23f   :  { %226 = vrot.lane.b32.xlu1 %v9504_v44, %s9424_s13 }
 0x2a5   :  { %v9516_v45 = vpop.permute.xlu1 %218  ;;  %v9518_v46 = vpop.permute.xlu0 %212 }
 0x2a6   :  { %510 = vrot.lane.b32.xlu0 %v9516_v45, %s9425_s14  ;;  %506 = vrot.lane.b32.xlu1 %v9518_v46, %s9425_s14  ;;  %v230_v59 = vcombine.low %v9498_v43, %v9516_v45  ;;  %v231_v62 = vcombine.high %v9498_v43, %v9516_v45 }
 0x2a8   :  { %v238_v0 = vrot.slane %v230_v59, %v9551_v58  ;;  %v245_v3 = vrot.slane %v231_v62, %v9551_v58 }
 0x2a9   :  { %v9524_v47 = vpop.permute.xlu1 %224  ;;  %v9530_v48 = vpop.permute.xlu0 %220 }
 0x2aa   :  { %504 = vrot.lane.b32.xlu0 %v9504_v44, %s9425_s14  ;;  %514 = vrot.lane.b32.xlu1 %v9524_v47, %s9425_s14  ;;  %v246_v57 = vcombine.low %v9518_v46, %v9524_v47  ;;  %v247_v60 = vcombine.high %v9518_v46, %v9524_v47  ;;  %v298_v16 = vcombine.low %v9504_v44, %v9530_v48 }
 0x2ab   :  { %v299_v18 = vcombine.high %v9504_v44, %v9530_v48 }
 0x2ac   :  { %v254_v63 = vrot.slane %v246_v57, %v9551_v58  ;;  %v261_v1 = vrot.slane %v247_v60, %v9551_v58  ;;  %v306_v24 = vrot.slane %v298_v16, %v9551_v58 }
 0x2ad   :  { %v9532_v49 = vpop.permute.xlu1 %214  ;;  %v503_v13 = vpop.permute.xlu0 %502  ;;  %v313_v31 = vrot.slane %v299_v18, %v9551_v58 }
 0x2ae   :  { %512 = vrot.lane.b32.xlu0 %v9530_v48, %s9425_s14  ;;  %508 = vrot.lane.b32.xlu1 %v9532_v49, %s9425_s14  ;;  %v262_v4 = vcombine.low %v238_v0, %v254_v63  ;;  %v263_v5 = vcombine.high %v238_v0, %v254_v63  ;;  %v278_v6 = vcombine.low %v245_v3, %v261_v1 }
 0x2af   :  { %v279_v7 = vcombine.high %v245_v3, %v261_v1 }
 0x2b0   :  { %v270_v8 = vrot.slane %v262_v4, %v9563_v2  ;;  %v277_v9 = vrot.slane %v263_v5, %v9563_v2  ;;  %v286_v10 = vrot.slane %v278_v6, %v9563_v2 }
 0x2b1   :  { %v9539_v51 = vpop.permute.xlu1 %226  ;;  %v293_v11 = vrot.slane %v279_v7, %v9563_v2 }
 0x2b2   :  { %516 = vrot.lane.b32.xlu1 %v9539_v51, %s9425_s14  ;;  %v314_v12 = vcombine.low %v9532_v49, %v9539_v51  ;;  %v366_v14 = vcombine.low %v270_v8, %v277_v9  ;;  %v8355_v15 = vcombine.high %v270_v8, %v277_v9  ;;  %v315_v17 = vcombine.high %v9532_v49, %v9539_v51 }
 0x2b3   :  { %v382_v19 = vcombine.low %v286_v10, %v293_v11  ;;  %v8356_v20 = vcombine.high %v286_v10, %v293_v11 }
 0x2b4   :  { %v322_v21 = vrot.slane %v314_v12, %v9551_v58  ;;  %v329_v27 = vrot.slane %v315_v17, %v9551_v58  ;;  %v373_v29 = vrot.slane %v366_v14, %v9551_v58  ;;  %v381_v30 = vrot.slane %v8355_v15, %v9551_v58 }
 0x2b5   :  { %v389_v34 = vrot.slane %v382_v19, %v9551_v58  ;;  %v397_v35 = vrot.slane %v8356_v20, %v9551_v58 }
 0x2b6   :  { %v330_v32 = vcombine.low %v306_v24, %v322_v21  ;;  %v331_v33 = vcombine.high %v306_v24, %v322_v21  ;;  %v346_v40 = vcombine.low %v313_v31, %v329_v27  ;;  %v347_v41 = vcombine.high %v313_v31, %v329_v27 }
 0x2b7   :  { %v398_v52 = vcombine.low %v373_v29, %v381_v30  ;;  %v399_v53 = vcombine.high %v373_v29, %v381_v30  ;;  %v414_v59 = vcombine.low %v389_v34, %v397_v35  ;;  %v415_v60 = vcombine.high %v389_v34, %v397_v35 }
 0x2b8   :  { %v338_v56 = vrot.slane %v330_v32, %v9563_v2  ;;  %v345_v57 = vrot.slane %v331_v33, %v9563_v2  ;;  %v354_v1 = vrot.slane %v346_v40, %v9563_v2  ;;  %v361_v3 = vrot.slane %v347_v41, %v9563_v2 }
 0x2b9   :  { %v9595_v5 = vrot.slane %v398_v52, %v9563_v2  ;;  %v9598_v6 = vrot.slane %v399_v53, %v9563_v2  ;;  %v9601_v14 = vrot.slane %v414_v59, %v9563_v2  ;;  %v9604_v15 = vrot.slane %v415_v60, %v9563_v2 }
 0x2ba   :  { %v434_v12 = vcombine.low %v338_v56, %v345_v57  ;;  %v450_v20 = vcombine.low %v354_v1, %v361_v3  ;;  %v8358_v21 = vcombine.high %v354_v1, %v361_v3 }
 0x2bc   :  { %v9611_v32 = vrot.slane %v434_v12, %v9551_v58 }
 0x318   :  { %v507_v22 = vpop.permute.xlu1 %506  ;;  %v511_v23 = vpop.permute.xlu0 %510 }
 0x319   :  { %v526_v36 = vcombine.low %v503_v13, %v511_v23  ;;  %v527_v37 = vcombine.high %v503_v13, %v511_v23  ;;  %v8357_v13 = vcombine.high %v338_v56, %v345_v57 }
 0x31b   :  { %v534_v61 = vrot.slane %v526_v36, %v9551_v58  ;;  %v541_v62 = vrot.slane %v527_v37, %v9551_v58  ;;  %v9614_v33 = vrot.slane %v8357_v13, %v9551_v58 }
 0x31c   :  { %v505_v38 = vpop.permute.xlu0 %504  ;;  %v515_v42 = vpop.permute.xlu1 %514 }
 0x31d   :  { %v542_v54 = vcombine.low %v507_v22, %v515_v42  ;;  %v543_v55 = vcombine.high %v507_v22, %v515_v42 }
 0x31f   :  { %v550_v63 = vrot.slane %v542_v54, %v9551_v58  ;;  %v557_v0 = vrot.slane %v543_v55, %v9551_v58 }
 0x320   :  { %v509_v4 = vpop.permute.xlu1 %508  ;;  %v513_v11 = vpop.permute.xlu0 %512 }
 0x321   :  { %v558_v7 = vcombine.low %v534_v61, %v550_v63  ;;  %v559_v8 = vcombine.high %v534_v61, %v550_v63  ;;  %v574_v9 = vcombine.low %v541_v62, %v557_v0  ;;  %v575_v10 = vcombine.high %v541_v62, %v557_v0 }
 0x322   :  { %v594_v22 = vcombine.low %v505_v38, %v513_v11  ;;  %v595_v23 = vcombine.high %v505_v38, %v513_v11  ;;  %v465_v11 = vrot.slane %v8358_v21, %v9551_v58 }
 0x323   :  { %v566_v16 = vrot.slane %v558_v7, %v9563_v2  ;;  %v573_v17 = vrot.slane %v559_v8, %v9563_v2  ;;  %v582_v18 = vrot.slane %v574_v9, %v9563_v2  ;;  %v589_v19 = vrot.slane %v575_v10, %v9563_v2 }
 0x324   :  { %v517_v24 = vpop.permute.xlu1 %516  ;;  %v602_v41 = vrot.slane %v594_v22, %v9551_v58  ;;  %v609_v42 = vrot.slane %v595_v23, %v9551_v58  ;;  %v457_v10 = vrot.slane %v450_v20, %v9551_v58  ;;  %v430_v22 = vcombine.low %v9595_v5, %v9601_v14 }
 0x325   :  { %v662_v27 = vcombine.low %v566_v16, %v573_v17  ;;  %v8359_v29 = vcombine.high %v566_v16, %v573_v17  ;;  %v678_v30 = vcombine.low %v582_v18, %v589_v19  ;;  %v8360_v31 = vcombine.high %v582_v18, %v589_v19 }
 0x326   :  { %v610_v34 = vcombine.low %v509_v4, %v517_v24  ;;  %v611_v35 = vcombine.high %v509_v4, %v517_v24 }
 0x327   :  { %v669_v36 = vrot.slane %v662_v27, %v9551_v58  ;;  %v677_v37 = vrot.slane %v8359_v29, %v9551_v58  ;;  %v685_v38 = vrot.slane %v678_v30, %v9551_v58  ;;  %v693_v40 = vrot.slane %v8360_v31, %v9551_v58 }
 0x328   :  { %v618_v52 = vrot.slane %v610_v34, %v9551_v58  ;;  %v625_v53 = vrot.slane %v611_v35, %v9551_v58  ;;  %v432_v29 = vcombine.low %v9598_v6, %v9604_v15  ;;  %v466_v30 = vcombine.low %v9611_v32, %v9614_v33 }
 0x329   :  { %v694_v54 = vcombine.low %v669_v36, %v677_v37  ;;  %v695_v55 = vcombine.high %v669_v36, %v677_v37  ;;  %v710_v56 = vcombine.low %v685_v38, %v693_v40  ;;  %v711_v57 = vcombine.high %v685_v38, %v693_v40 }
 0x32a   :  { %v626_v59 = vcombine.low %v602_v41, %v618_v52  ;;  %v627_v60 = vcombine.high %v602_v41, %v618_v52  ;;  %v642_v61 = vcombine.low %v609_v42, %v625_v53  ;;  %v643_v62 = vcombine.high %v609_v42, %v625_v53 }
 0x32b   :  { %v702_v63 = vrot.slane %v694_v54, %v9563_v2  ;;  %v718_v0 = vrot.slane %v710_v56, %v9563_v2  ;;  %v709_v1 = vrot.slane %v695_v55, %v9563_v2  ;;  %v725_v3 = vrot.slane %v711_v57, %v9563_v2 }
 0x32c   :  { %v634_v4 = vrot.slane %v626_v59, %v9563_v2  ;;  %v641_v7 = vrot.slane %v627_v60, %v9563_v2  ;;  %v650_v8 = vrot.slane %v642_v61, %v9563_v2  ;;  %v657_v9 = vrot.slane %v643_v62, %v9563_v2 }
 0x32d   :  { %v726_v12 = vcombine.low %v702_v63, %v718_v0  ;;  %v728_v13 = vcombine.low %v709_v1, %v725_v3  ;;  %v727_v27 = vcombine.high %v702_v63, %v718_v0  ;;  %v482_v31 = vcombine.low %v457_v10, %v465_v11 }
 0x32e   :  { %v730_v16 = vcombine.low %v634_v4, %v641_v7  ;;  %v8361_v17 = vcombine.high %v634_v4, %v641_v7  ;;  %v746_v18 = vcombine.low %v650_v8, %v657_v9  ;;  %v8362_v19 = vcombine.high %v650_v8, %v657_v9 }
 0x32f   :  { %8749 = vmatpush3.xpose.msk.msra.mxu1 %vm1094_vm2, %v726_v12  ;;  %8759 = vmatpush3.xpose.msk.msra.mxu0 %vm1094_vm2, %v728_v13  ;;  %v431_v38 = vcombine.high %v9595_v5, %v9601_v14  ;;  %v467_v42 = vcombine.high %v9611_v32, %v9614_v33  ;;  %v729_v52 = vcombine.high %v709_v1, %v725_v3 }
 0x330   :  { %v737_v23 = vrot.slane %v730_v16, %v9551_v58  ;;  %v745_v24 = vrot.slane %v8361_v17, %v9551_v58  ;;  %v753_v20 = vrot.slane %v746_v18, %v9551_v58  ;;  %v761_v21 = vrot.slane %v8362_v19, %v9551_v58  ;;  %8753 = vmatprep.subr.mxu1 %v9426_v50 }
 0x331   :  { %8768 = vmatprep.subr.mxu0 %v9426_v50  ;;  %v474_v5 = vrot.slane %v466_v30, %v9563_v2  ;;  %v490_v14 = vrot.slane %v482_v31, %v9563_v2  ;;  %v483_v53 = vcombine.high %v457_v10, %v465_v11  ;;  %v433_v32 = vcombine.high %v9598_v6, %v9604_v15 }
 0x332   :  { %v762_v34 = vcombine.low %v737_v23, %v745_v24  ;;  %v763_v35 = vcombine.high %v737_v23, %v745_v24  ;;  %v778_v36 = vcombine.low %v753_v20, %v761_v21  ;;  %v779_v37 = vcombine.high %v753_v20, %v761_v21  ;;  %8751 = vmatmul.mubr.msk.f32.vlgmr.msra.gmra.mxu1 %vm1094_vm2, %v430_v22 }
 0x333   :  { %8761 = vmatmul.mubr.msk.f32.vlgmr.msra.gmra.mxu0 %vm1094_vm2, %v432_v29  ;;  %8754 = vmatpush3.xpose.msk.msra.mxu1 %vm1094_vm2, %v727_v27  ;;  %v498_v33 = vcombine.low %v474_v5, %v490_v14  ;;  %v481_v59 = vrot.slane %v467_v42, %v9563_v2  ;;  %v497_v60 = vrot.slane %v483_v53, %v9563_v2 }
 0x334   :  { %8755 = vmatprep.mubr.msk.f32.mxu1 %vm9427_vm1, %v9426_v50  ;;  %8763 = vmatprep.subr.mxu1 %v9426_v50  ;;  %v770_v40 = vrot.slane %v762_v34, %v9563_v2  ;;  %v786_v41 = vrot.slane %v778_v36, %v9563_v2  ;;  %v777_v55 = vrot.slane %v763_v35, %v9563_v2 }
 0x335   :  { %8770 = vmatprep.mubr.msk.f32.mxu0 %vm9427_vm1, %v9426_v50  ;;  %v793_v56 = vrot.slane %v779_v37, %v9563_v2  ;;  %v499_v6 = vcombine.high %v474_v5, %v490_v14  ;;  %v500_v15 = vcombine.low %v481_v59, %v497_v60  ;;  %v501_v63 = vcombine.high %v481_v59, %v497_v60 }
 0x336   :  { %8756 = vmatmul.mubr.msk.f32.vlgmr.msra.gmra.mxu1 %vm1094_vm2, %v431_v38  ;;  %v794_v54 = vcombine.low %v770_v40, %v786_v41  ;;  %v795_v57 = vcombine.high %v770_v40, %v786_v41 }
 0x337   :  { %8764 = vmatpush3.xpose.msk.msra.mxu1 %vm1094_vm2, %v729_v52  ;;  %8765 = vmatprep.mubr.msk.f32.mxu1 %vm9427_vm1, %v9426_v50  ;;  %v796_v61 = vcombine.low %v777_v55, %v793_v56  ;;  %v797_v62 = vcombine.high %v777_v55, %v793_v56 }
 0x338   :  { %8769 = vmatpush3.xpose.msk.msra.mxu0 %vm1094_vm2, %v794_v54  ;;  %8773 = vmatprep.subr.mxu1 %v9426_v50 }
 0x339   :  { %8778 = vmatprep.subr.mxu0 %v9426_v50 }
 0x33a   :  { %8766 = vmatmul.mubr.msk.f32.vlgmr.msra.gmra.mxu1 %vm1094_vm2, %v433_v32 }
 0x33b   :  { %8771 = vmatmul.mubr.msk.f32.vlgmr.msra.gmra.mxu0 %vm1094_vm2, %v498_v33  ;;  %8774 = vmatpush3.xpose.msk.msra.mxu1 %vm1094_vm2, %v795_v57 }
 0x33c   :  { %8779 = vmatpush3.xpose.msk.msra.mxu0 %vm1094_vm2, %v796_v61  ;;  %8775 = vmatprep.mubr.msk.f32.mxu1 %vm9427_vm1, %v9426_v50 }
 0x33d   :  { %8780 = vmatprep.mubr.msk.f32.mxu0 %vm9427_vm1, %v9426_v50  ;;  %8783 = vmatprep.subr.mxu1 %v9426_v50 }
 0x33e   :  { %8776 = vmatmul.mubr.msk.f32.vlgmr.msra.gmra.mxu1 %vm1094_vm2, %v499_v6  ;;  %8788 = vmatprep.subr.mxu0 %v9426_v50 }
 0x33f   :  { %8781 = vmatmul.mubr.msk.f32.vlgmr.msra.gmra.mxu0 %vm1094_vm2, %v500_v15  ;;  %8784 = vmatpush3.xpose.msk.msra.mxu1 %vm1094_vm2, %v797_v62 }
 0x340   :  { %8785 = vmatprep.mubr.msk.f32.mxu1 %vm9427_vm1, %v9426_v50  ;;  %8793 = vmatprep.subr.mxu1 %v9426_v50 }
 0x341   :  { %8790 = vmatprep.mubr.msk.f32.mxu0 %vm9427_vm1, %v9426_v50 }
 0x342   :  { %8786 = vmatmul.mubr.msk.f32.vlgmr.msra.gmra.mxu1 %vm1094_vm2, %v501_v63 }
 0x343   :  { %8795 = vmatprep.mubr.msk.f32.mxu1 %vm9427_vm1, %v9426_v50 }
 0x3f2   :  { %v1167_v0 = vpop.f32.mrf.mxu1 }
 0x3f3   :  { %v1319_v1 = vpop.f32.mrf.mxu0  ;;  %v1703_v3 = vsel %vm1094_vm2, %v1167_v0, -inf }
 0x3f4   :  { %1704 = vmax.xlane.f32.xlu0 %v1703_v3  ;;  %v8752_v4 = vpop.f32.mrf.mxu1  ;;  %v1709_v9 = vsel %vm1094_vm2, %v1319_v1, -inf }
 0x3f5   :  { %v8762_v7 = vpop.f32.mrf.mxu0 }
 0x3f6   :  { %v1243_v8 = vpop.f32.mrf.mxu1 }
 0x3f7   :  { %v1706_v10 = vsel %vm1094_vm2, %v1243_v8, -inf }
 0x3f8   :  { %1710 = vmax.xlane.f32.xlu0 %v1709_v9  ;;  %1707 = vmax.xlane.f32.xlu1 %v1706_v10  ;;  %v8757_v11 = vpop.f32.mrf.mxu1 }
 0x3fa   :  { %v1395_v12 = vpop.f32.mrf.mxu1 }
 0x3fb   :  { %v1471_v13 = vpop.f32.mrf.mxu0  ;;  %v1712_v24 = vsel %vm1094_vm2, %v1395_v12, -inf }
 0x3fc   :  { %v8767_v16 = vpop.f32.mrf.mxu1  ;;  %v1715_v17 = vsel %vm1094_vm2, %v1471_v13, -inf }
 0x3fd   :  { %1716 = vmax.xlane.f32.xlu0 %v1715_v17  ;;  %v8772_v18 = vpop.f32.mrf.mxu0 }
 0x3fe   :  { %v9702_v19 = vpop.f32.mrf.mxu1 }
 0x3ff   :  { %v9704_v22 = vpop.f32.mrf.mxu0  ;;  %v1718_v29 = vsel %vm1094_vm2, %v9702_v19, -inf }
 0x400   :  { %v8777_v23 = vpop.f32.mrf.mxu1  ;;  %v1721_v30 = vsel %vm1094_vm2, %v9704_v22, -inf }
 0x401   :  { %1713 = vmax.xlane.f32.xlu0 %v1712_v24  ;;  %v8782_v20 = vpop.f32.mrf.mxu0 }
 0x402   :  { %v9707_v21 = vpop.f32.mrf.mxu1 }
 0x404   :  { %v8787_v27 = vpop.f32.mrf.mxu1 }
 0x409   :  { %802 = vrot.lane.b32.xlu1 %v9518_v46, %s9421_s10  ;;  %v1724_v46 = vsel %vm1094_vm2, %v9707_v21, -inf }
 0x40d   :  { %806 = vrot.lane.b32.xlu1 %v9516_v45, %s9421_s10 }
 0x411   :  { %810 = vrot.lane.b32.xlu1 %v9524_v47, %s9421_s10 }
 0x417   :  { %798 = vrot.lane.b32.xlu0 %v9498_v43, %s9421_s10 }
 0x435   :  { %1719 = vmax.xlane.f32.xlu1 %v1718_v29 }
 0x436   :  { %1722 = vmax.xlane.f32.xlu0 %v1721_v30 }
 0x439   :  { %1725 = vmax.xlane.f32.xlu1 %v1724_v46 }
 0x44a   :  { %804 = vrot.lane.b32.xlu1 %v9532_v49, %s9421_s10 }
 0x44c   :  { %800 = vrot.lane.b32.xlu0 %v9504_v44, %s9421_s10 }
 0x47d   :  { %v1705_v45 = vpop.xlane.xlu0 %1704 }
 0x47e   :  { %v1727_v43 = vsub.f32 %v1167_v0, %v1705_v45 }
 0x480   :  { %v1735_v47 = vmul.f32 1.442695, %v1727_v43 }
 0x481   :  { %v1708_v31 = vpop.xlane.xlu1 %1707  ;;  %v1711_v34 = vpop.xlane.xlu0 %1710 }
 0x482   :  { %8966 = vpow2.f32 %v1735_v47  ;;  %v1728_v35 = vsub.f32 %v1243_v8, %v1708_v31  ;;  %v1729_v36 = vsub.f32 %v1319_v1, %v1711_v34 }
 0x484   :  { %v1737_v37 = vmul.f32 1.442695, %v1728_v35  ;;  %v1739_v38 = vmul.f32 1.442695, %v1729_v36 }
 0x485   :  { %v803_v40 = vpop.permute.xlu1 %802 }
 0x486   :  { %8968 = vpow2.f32 %v1737_v37  ;;  %v1717_v41 = vpop.xlane.xlu0 %1716 }
 0x487   :  { %8970 = vpow2.f32 %v1739_v38  ;;  %v1731_v42 = vsub.f32 %v1471_v13, %v1717_v41 }
 0x489   :  { %v1743_v52 = vmul.f32 1.442695, %v1731_v42  ;;  %v807_v49 = vpop.permute.xlu1 %806 }
 0x48a   :  { %v1714_v5 = vpop.xlane.xlu0 %1713 }
 0x48b   :  { %8972 = vpow2.f32 %v1743_v52  ;;  %v1730_v44 = vsub.f32 %v1395_v12, %v1714_v5 }
 0x48d   :  { %v1741_v14 = vmul.f32 1.442695, %v1730_v44  ;;  %v811_v53 = vpop.permute.xlu1 %810 }
 0x48e   :  { %v838_v54 = vcombine.low %v803_v40, %v811_v53  ;;  %v839_v55 = vcombine.high %v803_v40, %v811_v53  ;;  %v799_v56 = vpop.permute.xlu0 %798 }
 0x48f   :  { %v9727_v32 = vpop.eup %8966  ;;  %8974 = vpow2.f32 %v1741_v14  ;;  %v822_v33 = vcombine.low %v799_v56, %v807_v49  ;;  %v823_v57 = vcombine.high %v799_v56, %v807_v49 }
 0x490   :  { %v846_v59 = vrot.slane %v838_v54, %v9551_v58  ;;  %v853_v60 = vrot.slane %v839_v55, %v9551_v58  ;;  %v1751_v61 = vsel %vm1094_vm2, %v9727_v32, 0.0 }
 0x491   :  { %v830_v6 = vrot.slane %v822_v33, %v9551_v58  ;;  %v837_v15 = vrot.slane %v823_v57, %v9551_v58  ;;  %1752 = vadd.xlane.f32.xlu0 %v1751_v61 }
 0x493   :  { %v9735_v62 = vpop.eup %8968  ;;  %v854_v63 = vcombine.low %v830_v6, %v846_v59  ;;  %v855_v0 = vcombine.high %v830_v6, %v846_v59  ;;  %v870_v1 = vcombine.low %v837_v15, %v853_v60  ;;  %v871_v3 = vcombine.high %v837_v15, %v853_v60 }
 0x494   :  { %v9737_v4 = vpop.eup %8970  ;;  %v1754_v7 = vsel %vm1094_vm2, %v9735_v62, 0.0 }
 0x495   :  { %v862_v8 = vrot.slane %v854_v63, %v9563_v2  ;;  %v869_v9 = vrot.slane %v855_v0, %v9563_v2  ;;  %v878_v10 = vrot.slane %v870_v1, %v9563_v2  ;;  %v885_v11 = vrot.slane %v871_v3, %v9563_v2  ;;  %1755 = vadd.xlane.f32.xlu1 %v1754_v7 }
 0x496   :  { %v1757_v12 = vsel %vm1094_vm2, %v9737_v4, 0.0 }
 0x497   :  { %v958_v13 = vcombine.low %v862_v8, %v869_v9  ;;  %v8363_v16 = vcombine.high %v862_v8, %v869_v9  ;;  %v974_v17 = vcombine.low %v878_v10, %v885_v11  ;;  %v8364_v18 = vcombine.high %v878_v10, %v885_v11  ;;  %1758 = vadd.xlane.f32.xlu0 %v1757_v12 }
 0x498   :  { %v9747_v23 = vpop.eup %8972 }
 0x499   :  { %v965_v24 = vrot.slane %v958_v13, %v9551_v58  ;;  %v973_v20 = vrot.slane %v8363_v16, %v9551_v58  ;;  %v981_v27 = vrot.slane %v974_v17, %v9551_v58  ;;  %v989_v29 = vrot.slane %v8364_v18, %v9551_v58 }
 0x49a   :  { %v1763_v30 = vsel %vm1094_vm2, %v9747_v23, 0.0 }
 0x49b   :  { %1764 = vadd.xlane.f32.xlu0 %v1763_v30  ;;  %v990_v46 = vcombine.low %v965_v24, %v973_v20  ;;  %v1006_v45 = vcombine.low %v981_v27, %v989_v29  ;;  %v991_v43 = vcombine.high %v965_v24, %v973_v20  ;;  %v1007_v47 = vcombine.high %v981_v27, %v989_v29 }
 0x49c   :  { %v9755_v31 = vpop.eup %8974 }
 0x49d   :  { %v1760_v34 = vsel %vm1094_vm2, %v9755_v31, 0.0  ;;  %v998_v35 = vrot.slane %v990_v46, %v9563_v2  ;;  %v1014_v36 = vrot.slane %v1006_v45, %v9563_v2  ;;  %v1005_v37 = vrot.slane %v991_v43, %v9563_v2 }
 0x49e   :  { %1761 = vadd.xlane.f32.xlu1 %v1760_v34  ;;  %v1021_v38 = vrot.slane %v1007_v47, %v9563_v2 }
 0x49f   :  { %v1022_v40 = vcombine.low %v998_v35, %v1014_v36  ;;  %v1023_v41 = vcombine.high %v998_v35, %v1014_v36 }
 0x4a0   :  { %v1024_v42 = vcombine.low %v1005_v37, %v1021_v38  ;;  %v1025_v52 = vcombine.high %v1005_v37, %v1021_v38 }
 0x4a1   :  { %8789 = vmatpush3.msra.mxu0 %v1022_v40  ;;  %8794 = vmatpush3.msra.mxu1 %v1023_v41 }
 0x4a2   :  { %8798 = vmatprep.subr.mxu0 %v9426_v50  ;;  %8803 = vmatprep.subr.mxu1 %v9426_v50 }
 0x4be   :  { %v1720_v49 = vpop.xlane.xlu1 %1719 }
 0x4bf   :  { %v1732_v5 = vsub.f32 %v9702_v19, %v1720_v49  ;;  %v1723_v44 = vpop.xlane.xlu0 %1722 }
 0x4c0   :  { %v1733_v14 = vsub.f32 %v9704_v22, %v1723_v44 }
 0x4c1   :  { %v1745_v53 = vmul.f32 1.442695, %v1732_v5 }
 0x4c2   :  { %v1747_v54 = vmul.f32 1.442695, %v1733_v14  ;;  %v1726_v55 = vpop.xlane.xlu1 %1725 }
 0x4c3   :  { %8976 = vpow2.f32 %v1745_v53  ;;  %v1734_v56 = vsub.f32 %v9707_v21, %v1726_v55  ;;  %v801_v61 = vpop.permute.xlu0 %800 }
 0x4c4   :  { %8978 = vpow2.f32 %v1747_v54 }
 0x4c5   :  { %v1749_v33 = vmul.f32 1.442695, %v1734_v56 }
 0x4c6   :  { %v805_v6 = vpop.permute.xlu1 %804 }
 0x4c7   :  { %8980 = vpow2.f32 %v1749_v33 }
 0x4d0   :  { %v9768_v57 = vpop.eup %8976 }
 0x4d1   :  { %v9770_v59 = vpop.eup %8978  ;;  %v1766_v60 = vsel %vm1094_vm2, %v9768_v57, 0.0 }
 0x4d2   :  { %1767 = vadd.xlane.f32.xlu1 %v1766_v60  ;;  %v1769_v19 = vsel %vm1094_vm2, %v9770_v59, 0.0 }
 0x4d3   :  { %1770 = vadd.xlane.f32.xlu0 %v1769_v19 }
 0x4d4   :  { %v9776_v22 = vpop.eup %8980 }
 0x4d5   :  { %v1772_v21 = vsel %vm1094_vm2, %v9776_v22, 0.0 }
 0x4d6   :  { %1773 = vadd.xlane.f32.xlu1 %v1772_v21 }
 0x4e7   :  { %812 = vrot.lane.b32.xlu1 %v9539_v51, %s9421_s10 }
 0x4e9   :  { %808 = vrot.lane.b32.xlu0 %v9530_v48, %s9421_s10 }
 0x51a   :  { %v1753_v15 = vpop.xlane.xlu0 %1752 }
 0x51b   :  { %8982 = vrcp.f32 %v1753_v15 }
 0x51e   :  { %v1756_v63 = vpop.xlane.xlu1 %1755 }
 0x51f   :  { %8984 = vrcp.f32 %v1756_v63 }
 0x520   :  { %v1759_v0 = vpop.xlane.xlu0 %1758 }
 0x521   :  { %8986 = vrcp.f32 %v1759_v0 }
 0x527   :  { %v1762_v1 = vpop.xlane.xlu1 %1761 }
 0x528   :  { %v8983_v3 = vpop.eup %8982  ;;  %8988 = vrcp.f32 %v1762_v1 }
 0x529   :  { %v1783_v7 = vmul.f32 %v8983_v3, %v9727_v32 }
 0x52b   :  { %8791 = vmatmul.mubr.msk.f32.vlgmr.msra.gmra.mxu0 %vm1094_vm2, %v1783_v7 }
 0x52c   :  { %v8985_v8 = vpop.eup %8984  ;;  %8799 = vmatpush3.msra.mxu0 %v1024_v42  ;;  %8800 = vmatprep.mubr.msk.f32.mxu0 %vm9427_vm1, %v9426_v50 }
 0x52d   :  { %v1784_v48 = vmul.f32 %v8985_v8, %v9735_v62  ;;  %8808 = vmatprep.subr.mxu0 %v9426_v50 }
 0x52e   :  { %v8987_v51 = vpop.eup %8986 }
 0x52f   :  { %8796 = vmatmul.mubr.msk.f32.vlgmr.msra.gmra.mxu1 %vm1094_vm2, %v1784_v48  ;;  %v1785_v9 = vmul.f32 %v8987_v51, %v9737_v4  ;;  %v1765_v4 = vpop.xlane.xlu0 %1764 }
 0x530   :  { %8804 = vmatpush3.msra.mxu1 %v1025_v52  ;;  %8805 = vmatprep.mubr.msk.f32.mxu1 %vm9427_vm1, %v9426_v50  ;;  %8990 = vrcp.f32 %v1765_v4 }
 0x531   :  { %8801 = vmatmul.mubr.msk.f32.vlgmr.msra.gmra.mxu0 %vm1094_vm2, %v1785_v9  ;;  %8813 = vmatprep.subr.mxu1 %v9426_v50 }
 0x532   :  { %8810 = vmatprep.mubr.msk.f32.mxu0 %vm9427_vm1, %v9426_v50 }
 0x535   :  { %v8989_v32 = vpop.eup %8988 }
 0x536   :  { %v1786_v62 = vmul.f32 %v8989_v32, %v9755_v31 }
 0x538   :  { %8806 = vmatmul.mubr.msk.f32.vlgmr.msra.gmra.mxu1 %vm1094_vm2, %v1786_v62 }
 0x539   :  { %8815 = vmatprep.mubr.msk.f32.mxu1 %vm9427_vm1, %v9426_v50 }
 0x53d   :  { %v8991_v56 = vpop.eup %8990 }
 0x53e   :  { %v1787_v0 = vmul.f32 %v8991_v56, %v9747_v23 }
 0x55b   :  { %v1768_v10 = vpop.xlane.xlu1 %1767 }
 0x55c   :  { %v1771_v11 = vpop.xlane.xlu0 %1770  ;;  %8992 = vrcp.f32 %v1768_v10 }
 0x55d   :  { %8994 = vrcp.f32 %v1771_v11 }
 0x55f   :  { %v1774_v12 = vpop.xlane.xlu1 %1773 }
 0x560   :  { %v809_v13 = vpop.permute.xlu0 %808  ;;  %8996 = vrcp.f32 %v1774_v12 }
 0x561   :  { %v890_v16 = vcombine.low %v801_v61, %v809_v13  ;;  %v891_v17 = vcombine.high %v801_v61, %v809_v13 }
 0x563   :  { %v813_v18 = vpop.permute.xlu1 %812  ;;  %v898_v27 = vrot.slane %v890_v16, %v9551_v58  ;;  %v905_v29 = vrot.slane %v891_v17, %v9551_v58 }
 0x564   :  { %v906_v24 = vcombine.low %v805_v6, %v813_v18  ;;  %v907_v20 = vcombine.high %v805_v6, %v813_v18 }
 0x566   :  { %v914_v30 = vrot.slane %v906_v24, %v9551_v58  ;;  %v921_v46 = vrot.slane %v907_v20, %v9551_v58 }
 0x568   :  { %v922_v45 = vcombine.low %v898_v27, %v914_v30  ;;  %v923_v43 = vcombine.high %v898_v27, %v914_v30  ;;  %v938_v47 = vcombine.low %v905_v29, %v921_v46  ;;  %v939_v31 = vcombine.high %v905_v29, %v921_v46 }
 0x569   :  { %v8993_v33 = vpop.eup %8992 }
 0x56a   :  { %v930_v34 = vrot.slane %v922_v45, %v9563_v2  ;;  %v937_v35 = vrot.slane %v923_v43, %v9563_v2  ;;  %v946_v36 = vrot.slane %v938_v47, %v9563_v2  ;;  %v953_v37 = vrot.slane %v939_v31, %v9563_v2  ;;  %v8995_v6 = vpop.eup %8994 }
 0x56b   :  { %v1788_v1 = vmul.f32 %v8993_v33, %v9768_v57  ;;  %v1789_v48 = vmul.f32 %v8995_v6, %v9770_v59 }
 0x56c   :  { %v1026_v38 = vcombine.low %v930_v34, %v937_v35  ;;  %v8365_v40 = vcombine.high %v930_v34, %v937_v35  ;;  %v1042_v41 = vcombine.low %v946_v36, %v953_v37  ;;  %v8366_v42 = vcombine.high %v946_v36, %v953_v37 }
 0x56d   :  { %v8997_v3 = vpop.eup %8996 }
 0x56e   :  { %v1033_v52 = vrot.slane %v1026_v38, %v9551_v58  ;;  %v1041_v49 = vrot.slane %v8365_v40, %v9551_v58  ;;  %v1049_v5 = vrot.slane %v1042_v41, %v9551_v58  ;;  %v1057_v44 = vrot.slane %v8366_v42, %v9551_v58 }
 0x56f   :  { %v1790_v23 = vmul.f32 %v8997_v3, %v9776_v22 }
 0x570   :  { %v1058_v14 = vcombine.low %v1033_v52, %v1041_v49  ;;  %v1074_v53 = vcombine.low %v1049_v5, %v1057_v44  ;;  %v1059_v54 = vcombine.high %v1033_v52, %v1041_v49  ;;  %v1075_v55 = vcombine.high %v1049_v5, %v1057_v44 }
 0x572   :  { %v1066_v60 = vrot.slane %v1058_v14, %v9563_v2  ;;  %v1082_v19 = vrot.slane %v1074_v53, %v9563_v2  ;;  %v1073_v21 = vrot.slane %v1059_v54, %v9563_v2  ;;  %v1089_v61 = vrot.slane %v1075_v55, %v9563_v2 }
 0x574   :  { %v1090_v15 = vcombine.low %v1066_v60, %v1082_v19  ;;  %v1091_v63 = vcombine.high %v1066_v60, %v1082_v19  ;;  %v1092_v7 = vcombine.low %v1073_v21, %v1089_v61  ;;  %v1093_v8 = vcombine.high %v1073_v21, %v1089_v61 }
 0x576   :  { %8809 = vmatpush3.msra.mxu0 %v1090_v15  ;;  %8814 = vmatpush3.msra.mxu1 %v1091_v63 }
 0x577   :  { %8811 = vmatmul.mubr.msk.f32.vlgmr.msra.gmra.mxu0 %vm1094_vm2, %v1787_v0  ;;  %8816 = vmatmul.mubr.msk.f32.vlgmr.msra.gmra.mxu1 %vm1094_vm2, %v1788_v1 }
 0x578   :  { %8818 = vmatprep.subr.mxu0 %v9426_v50  ;;  %8823 = vmatprep.subr.mxu1 %v9426_v50 }
 0x579   :  { %8819 = vmatpush3.msra.mxu0 %v1092_v7  ;;  %8824 = vmatpush3.msra.mxu1 %v1093_v8 }
 0x57a   :  { %8820 = vmatprep.mubr.msk.f32.mxu0 %vm9427_vm1, %v9426_v50  ;;  %8825 = vmatprep.mubr.msk.f32.mxu1 %vm9427_vm1, %v9426_v50 }
 0x57b   :  { %8821 = vmatmul.mubr.msk.f32.vlgmr.msra.gmra.mxu0 %vm1094_vm2, %v1789_v48  ;;  %8826 = vmatmul.mubr.msk.f32.vlgmr.msra.gmra.mxu1 %vm1094_vm2, %v1790_v23 }
 0x5eb   :  { %v1860_v57 = vpop.f32.mrf.mxu0 }
 0x5ed   :  { %v8792_v51 = vpop.f32.mrf.mxu0 }
 0x5ef   :  { %v1933_v9 = vpop.f32.mrf.mxu1 }
 0x5f1   :  { %v2006_v32 = vpop.f32.mrf.mxu0  ;;  %v8797_v62 = vpop.f32.mrf.mxu1 }
 0x5f2   :  { %v2375_v10 = vcombine.low %v1860_v57, %v2006_v32  ;;  %v2376_v59 = vcombine.high %v1860_v57, %v2006_v32 }
 0x5f3   :  { %v8802_v4 = vpop.f32.mrf.mxu0 }
 0x5f4   :  { %v2383_v16 = vrot.slane %v2375_v10, %v9551_v58  ;;  %v2390_v17 = vrot.slane %v2376_v59, %v9551_v58  ;;  %v83_v59 = vld [vmem:[#allocation5 + $0x38] sm:$0xff] }
 0x5f5   :  { %8828 = vmatprep.subr.mxu0 %v83_v59 }
 0x5f6   :  { %8829 = vmatpush3.msra.mxu0 %v83_v59 }
 0x5f8   :  { %v2079_v11 = vpop.f32.mrf.mxu1 }
 0x5f9   :  { %v2391_v22 = vcombine.low %v1933_v9, %v2079_v11  ;;  %v2392_v12 = vcombine.high %v1933_v9, %v2079_v11  ;;  %v82_v11 = vld [vmem:[#allocation5 + $0x30] sm:$0xff] }
 0x5fa   :  { %v8807_v13 = vpop.f32.mrf.mxu1  ;;  %8830 = vmatprep.subr.mxu0 %v82_v11 }
 0x5fb   :  { %v2399_v18 = vrot.slane %v2391_v22, %v9551_v58  ;;  %v2406_v24 = vrot.slane %v2392_v12, %v9551_v58  ;;  %8831 = vmatpush3.msra.mxu0 %v82_v11 }
 0x5fd   :  { %v2407_v20 = vcombine.low %v2383_v16, %v2399_v18  ;;  %v2408_v27 = vcombine.high %v2383_v16, %v2399_v18  ;;  %v2423_v29 = vcombine.low %v2390_v17, %v2406_v24  ;;  %v2424_v30 = vcombine.high %v2390_v17, %v2406_v24 }
 0x5ff   :  { %v2415_v46 = vrot.slane %v2407_v20, %v9563_v2  ;;  %v2422_v45 = vrot.slane %v2408_v27, %v9563_v2  ;;  %v2431_v43 = vrot.slane %v2423_v29, %v9563_v2  ;;  %v2438_v47 = vrot.slane %v2424_v30, %v9563_v2  ;;  %v81_v27 = vld [vmem:[#allocation5 + $0x28] sm:$0xff]  ;;  %v80_v29 = vld [vmem:[#allocation5 + $0x20] sm:$0xff] }
 0x600   :  { %8832 = vmatprep.subr.mxu0 %v81_v27 }
 0x601   :  { %v2511_v31 = vcombine.low %v2415_v46, %v2422_v45  ;;  %v8391_v34 = vcombine.high %v2415_v46, %v2422_v45  ;;  %v2527_v35 = vcombine.low %v2431_v43, %v2438_v47  ;;  %v8392_v36 = vcombine.high %v2431_v43, %v2438_v47  ;;  %8833 = vmatpush3.msra.mxu0 %v81_v27  ;;  %v2812_v27 = vld [vmem:[#allocation8 + $0xc8] sm:$0xff] }
 0x602   :  { %8834 = vmatprep.subr.mxu0 %v80_v29 }
 0x603   :  { %v2518_v37 = vrot.slane %v2511_v31, %v9551_v58  ;;  %v2526_v38 = vrot.slane %v8391_v34, %v9551_v58  ;;  %v2534_v40 = vrot.slane %v2527_v35, %v9551_v58  ;;  %v2542_v41 = vrot.slane %v8392_v36, %v9551_v58  ;;  %8835 = vmatpush3.msra.mxu0 %v80_v29 }
 0x605   :  { %v2543_v42 = vcombine.low %v2518_v37, %v2526_v38  ;;  %v2559_v52 = vcombine.low %v2534_v40, %v2542_v41  ;;  %v2544_v49 = vcombine.high %v2518_v37, %v2526_v38  ;;  %v2560_v5 = vcombine.high %v2534_v40, %v2542_v41 }
 0x607   :  { %v9845_v44 = vrot.slane %v2543_v42, %v9563_v2  ;;  %v9848_v14 = vrot.slane %v2559_v52, %v9563_v2  ;;  %v2558_v55 = vrot.slane %v2544_v49, %v9563_v2  ;;  %v2574_v56 = vrot.slane %v2560_v5, %v9563_v2 }
 0x609   :  { %v2576_v53 = vcombine.high %v9845_v44, %v9848_v14  ;;  %v2575_v54 = vcombine.low %v9845_v44, %v9848_v14  ;;  %v2577_v33 = vcombine.low %v2558_v55, %v2574_v56  ;;  %v2578_v60 = vcombine.high %v2558_v55, %v2574_v56  ;;  %v9892_v14 = vld [vmem:[#allocation5 + $0x40] sm:$0xff] }
 0x60a   :  { %v9890_v44 = vsub.s32 1, %v9482_v25 }
 0x60b   :  { %2649 = vrot.lane.b32.xlu0 %v2576_v53, %s9415_s21 }
 0x60f   :  { %2657 = vrot.lane.b32.xlu0 %v2577_v33, %s9418_s30 }
 0x613   :  { %2665 = vrot.lane.b32.xlu0 %v2578_v60, %s9430_s15 }
 0x637   :  { %v2152_v19 = vpop.f32.mrf.mxu0  ;;  %v2225_v21 = vpop.f32.mrf.mxu1 }
 0x639   :  { %v8812_v61 = vpop.f32.mrf.mxu0  ;;  %v8817_v6 = vpop.f32.mrf.mxu1 }
 0x63b   :  { %v2298_v15 = vpop.f32.mrf.mxu0  ;;  %v2371_v63 = vpop.f32.mrf.mxu1 }
 0x63c   :  { %v2443_v0 = vcombine.low %v2152_v19, %v2298_v15  ;;  %v2444_v1 = vcombine.high %v2152_v19, %v2298_v15  ;;  %v2459_v3 = vcombine.low %v2225_v21, %v2371_v63  ;;  %v2460_v7 = vcombine.high %v2225_v21, %v2371_v63 }
 0x63d   :  { %v8822_v8 = vpop.f32.mrf.mxu0  ;;  %v8827_v48 = vpop.f32.mrf.mxu1 }
 0x63e   :  { %v2451_v23 = vrot.slane %v2443_v0, %v9551_v58  ;;  %v2458_v57 = vrot.slane %v2444_v1, %v9551_v58  ;;  %v2467_v51 = vrot.slane %v2459_v3, %v9551_v58  ;;  %v2474_v9 = vrot.slane %v2460_v7, %v9551_v58  ;;  %v9299_v7 = vld [vmem:[#allocation2 + $0x8] sm:$0xff] }
 0x640   :  { %v2475_v32 = vcombine.low %v2451_v23, %v2467_v51  ;;  %v2476_v62 = vcombine.high %v2451_v23, %v2467_v51  ;;  %v2491_v4 = vcombine.low %v2458_v57, %v2474_v9  ;;  %v2492_v10 = vcombine.high %v2458_v57, %v2474_v9  ;;  %v9300_v23 = vld [vmem:[#allocation2] sm:$0xff] }
 0x642   :  { %v2483_v22 = vrot.slane %v2475_v32, %v9563_v2  ;;  %v2490_v12 = vrot.slane %v2476_v62, %v9563_v2  ;;  %v2499_v13 = vrot.slane %v2491_v4, %v9563_v2  ;;  %v2506_v16 = vrot.slane %v2492_v10, %v9563_v2 }
 0x644   :  { %v2579_v17 = vcombine.low %v2483_v22, %v2490_v12  ;;  %v8393_v18 = vcombine.high %v2483_v22, %v2490_v12  ;;  %v2595_v24 = vcombine.low %v2499_v13, %v2506_v16  ;;  %v8394_v20 = vcombine.high %v2499_v13, %v2506_v16 }
 0x646   :  { %v2586_v30 = vrot.slane %v2579_v17, %v9551_v58  ;;  %v2594_v46 = vrot.slane %v8393_v18, %v9551_v58  ;;  %v2602_v45 = vrot.slane %v2595_v24, %v9551_v58  ;;  %v2610_v43 = vrot.slane %v8394_v20, %v9551_v58  ;;  %v2809_v17 = vld [vmem:[#allocation8 + $0x80] sm:$0xff]  ;;  %v2810_v24 = vld [vmem:[#allocation8 + $0x88] sm:$0xff] }
 0x647   :  { %v2811_v18 = vld [vmem:[#allocation8 + $0xc0] sm:$0xff] }
 0x648   :  { %v2611_v47 = vcombine.low %v2586_v30, %v2594_v46  ;;  %v2627_v31 = vcombine.low %v2602_v45, %v2610_v43  ;;  %v2612_v34 = vcombine.high %v2586_v30, %v2594_v46  ;;  %v2628_v35 = vcombine.high %v2602_v45, %v2610_v43  ;;  %v2805_v45 = vld [vmem:[#allocation8] sm:$0xff] }
 0x649   :  { %v8402_v20 = vcombine.high %v2809_v17, %v2811_v18  ;;  %v8401_v29 = vcombine.low %v2809_v17, %v2811_v18  ;;  %v8403_v30 = vcombine.low %v2810_v24, %v2812_v27  ;;  %v8404_v46 = vcombine.high %v2810_v24, %v2812_v27  ;;  %v2807_v43 = vld [vmem:[#allocation8 + $0x40] sm:$0xff]  ;;  %v3250_v17 = vld [vmem:[#allocation8 + $0x198] sm:$0xff] }
 0x64a   :  { %v2619_v36 = vrot.slane %v2611_v47, %v9563_v2  ;;  %v2635_v37 = vrot.slane %v2627_v31, %v9563_v2  ;;  %v2626_v41 = vrot.slane %v2612_v34, %v9563_v2  ;;  %v2642_v42 = vrot.slane %v2628_v35, %v9563_v2  ;;  %v2806_v47 = vld [vmem:[#allocation8 + $0x8] sm:$0xff]  ;;  %v3252_v24 = vld [vmem:[#allocation8 + $0x1d8] sm:$0xff] }
 0x64b   :  { %2890 = vmatprep.subr.bf16.mxu1 %v8402_v20  ;;  %2933 = vmatprep.subr.bf16.mxu0 %v8404_v46  ;;  %v8398_v31 = vcombine.high %v2805_v45, %v2807_v43  ;;  %v2808_v34 = vld [vmem:[#allocation8 + $0x48] sm:$0xff]  ;;  %v8397_v35 = vcombine.low %v2805_v45, %v2807_v43  ;;  %v8439_v27 = vcombine.low %v3250_v17, %v3252_v24  ;;  %v3247_v46 = vld [vmem:[#allocation8 + $0x150] sm:$0xff]  ;;  %v3246_v45 = vld [vmem:[#allocation8 + $0x118] sm:$0xff] }
 0x64c   :  { %v2644_v38 = vcombine.high %v2619_v36, %v2635_v37  ;;  %v2643_v40 = vcombine.low %v2619_v36, %v2635_v37  ;;  %v2645_v52 = vcombine.low %v2626_v41, %v2642_v42  ;;  %v2646_v49 = vcombine.high %v2626_v41, %v2642_v42  ;;  %2891 = vmatpush1.bf16.msra.mxu1 %v8401_v29  ;;  %v3038_v41 = vld [vmem:[#allocation8 + $0x98] sm:$0xff] }
 0x64d   :  { %v8399_v36 = vcombine.low %v2806_v47, %v2808_v34  ;;  %v8400_v37 = vcombine.high %v2806_v47, %v2808_v34  ;;  %2892 = vmatprep.subr.bf16.mxu1 %v8398_v31  ;;  %v9431_v42 = vmov 0   ;;  %v8440_v29 = vcombine.high %v3250_v17, %v3252_v24  ;;  %v3248_v47 = vld [vmem:[#allocation8 + $0x158] sm:$0xff] }
 0x64e   :  { %2651 = vrot.lane.b32.xlu1 %v2644_v38, %s9415_s21  ;;  %v3037_v38 = vld [vmem:[#allocation8 + $0x90] sm:$0xff]  ;;  %2910 = vmatprep.mubr.bf16.mxu1 %v9431_v42  ;;  %v8435_v34 = vcombine.low %v3246_v45, %v3248_v47 }
 0x650   :  { %2893 = vmatpush1.bf16.msra.mxu1 %v8397_v35  ;;  %v8436_v35 = vcombine.high %v3246_v45, %v3248_v47 }
 0x652   :  { %2659 = vrot.lane.b32.xlu1 %v2645_v52, %s9418_s30 }
 0x656   :  { %2667 = vrot.lane.b32.xlu1 %v2646_v49, %s9430_s15 }
 0x67d   :  { %v2650_v5 = vpop.permute.xlu0 %2649 }
 0x67e   :  { %v2671_v55 = vsel %vm1094_vm2, %v2575_v54, %v2650_v5  ;;  %v2682_v54 = vrot.slane %v9892_v14, %v9890_v44  ;;  %v3040_v5 = vld [vmem:[#allocation8 + $0xd8] sm:$0xff] }
 0x681   :  { %v2658_v53 = vpop.permute.xlu0 %2657 }
 0x682   :  { %v2674_v56 = vsel %vm2673_vm3, %v2671_v55, %v2658_v53  ;;  %v8421_v53 = vcombine.low %v3038_v41, %v3040_v5  ;;  %v8422_v55 = vcombine.high %v3038_v41, %v3040_v5  ;;  %v9938_v41 = vld [vmem:[#allocation8 + $0x1c8] sm:$0xff] }
 0x685   :  { %v2666_v33 = vpop.permute.xlu0 %2665 }
 0x686   :  { %v2677_v60 = vsel %vm2676_vm4, %v2674_v56, %v2666_v33 }
 0x687   :  { %8836 = vmatprep.mubr.msk.f32.mxu0 %vm85_vm0, %v2677_v60 }
 0x6c0   :  { %v2652_v19 = vpop.permute.xlu1 %2651 }
 0x6c1   :  { %v2672_v61 = vsel %vm1094_vm2, %v2643_v40, %v2652_v19  ;;  %v3039_v40 = vld [vmem:[#allocation8 + $0xd0] sm:$0xff] }
 0x6c2   :  { %v8419_v52 = vcombine.low %v3037_v38, %v3039_v40  ;;  %v8420_v49 = vcombine.high %v3037_v38, %v3039_v40  ;;  %v9934_v38 = vld [vmem:[#allocation8 + $0x188] sm:$0xff] }
 0x6c3   :  { %v8448_v5 = vcombine.high %v9934_v38, %v9938_v41 }
 0x6c4   :  { %v2660_v21 = vpop.permute.xlu1 %2659  ;;  %3115 = vmatprep.subr.bf16.mxu1 %v8420_v49  ;;  %v8447_v49 = vcombine.low %v9934_v38, %v9938_v41 }
 0x6c5   :  { %v2675_v6 = vsel %vm2673_vm3, %v2672_v61, %v2660_v21 }
 0x6c8   :  { %v2668_v15 = vpop.permute.xlu1 %2667 }
 0x6c9   :  { %v2678_v63 = vsel %vm2676_vm4, %v2675_v6, %v2668_v15  ;;  %v2794_v6 = vsub.s32 4, %v9482_v25 }
 0x6ca   :  { %8837 = vmatmul.mubr.msk.f32.vlgmr.msra.gmra.mxu0 %vm85_vm0, %v2678_v63 }
 0x6cb   :  { %2934 = vmatpush1.bf16.msra.mxu0 %v8403_v30  ;;  %2953 = vmatprep.mubr.bf16.mxu0 %v9431_v42  ;;  %v2795_v63 = vrot.slane %v9892_v14, %v2794_v6  ;;  %v3245_v30 = vld [vmem:[#allocation8 + $0x110] sm:$0xff] }
 0x6cc   :  { %2935 = vmatprep.subr.bf16.mxu0 %v8400_v37  ;;  %v8434_v43 = vcombine.high %v3245_v30, %v3247_v46  ;;  %v8433_v31 = vcombine.low %v3245_v30, %v3247_v46  ;;  %v9932_v37 = vld [vmem:[#allocation8 + $0x1c0] sm:$0xff] }
 0x6cf   :  { %2936 = vmatpush1.bf16.msra.mxu0 %v8399_v36  ;;  %v9930_v36 = vld [vmem:[#allocation8 + $0x180] sm:$0xff] }
 0x6d0   :  { %3158 = vmatprep.subr.bf16.mxu0 %v8422_v55  ;;  %v8446_v40 = vcombine.high %v9930_v36, %v9932_v37 }
 0x78a   :  { %v8838_v0 = vpop.f32.mrf.mxu0 }
 0x78b   :  { %v2761_v1 = vadd.f32 %v8838_v0, %v2682_v54 }
 0x78c   :  { %v2755_v3 = vpop.f32.mrf.mxu0 }
 0x78d   :  { %v9896_v8 = vadd.f32 %v9299_v7, %v2761_v1  ;;  %v2756_v48 = vadd.f32 %v2755_v3, %v2682_v54  ;;  %v2800_v54 = vsub.s32 5, %v9482_v25 }
 0x78f   :  { %v9898_v57 = vadd.f32 %v9300_v23, %v2756_v48  ;;  %v2769_v51 = vsel %vm85_vm0, %v9896_v8, 0.0  ;;  %v2801_v3 = vrot.slane %v9892_v14, %v2800_v54 }
 0x790   :  { %2770 = vadd.xlane.f32.xlu1 %v2769_v51  ;;  %v3033_v51 = vld [vmem:[#allocation8 + $0x10] sm:$0xff] }
 0x791   :  { %v2766_v9 = vsel %vm85_vm0, %v9898_v57, 0.0 }
 0x792   :  { %2767 = vadd.xlane.f32.xlu0 %v2766_v9  ;;  %v3035_v9 = vld [vmem:[#allocation8 + $0x50] sm:$0xff] }
 0x793   :  { %v8415_v14 = vcombine.low %v3033_v51, %v3035_v9 }
 0x819   :  { %v2771_v32 = vpop.xlane.xlu1 %2770 }
 0x81a   :  { %v2773_v62 = vmul.f32 0.03125, %v2771_v32  ;;  %v3034_v32 = vld [vmem:[#allocation8 + $0x18] sm:$0xff] }
 0x81b   :  { %v2768_v4 = vpop.xlane.xlu0 %2767 }
 0x81c   :  { %v2772_v10 = vmul.f32 0.03125, %v2768_v4  ;;  %v2775_v59 = vsub.f32 %v9896_v8, %v2773_v62  ;;  %v3036_v62 = vld [vmem:[#allocation8 + $0x58] sm:$0xff] }
 0x81e   :  { %v2774_v11 = vsub.f32 %v9898_v57, %v2772_v10  ;;  %v2777_v13 = vmul.f32 %v2775_v59, %v2775_v59 }
 0x820   :  { %v2776_v22 = vmul.f32 %v2774_v11, %v2774_v11  ;;  %v2781_v16 = vsel %vm85_vm0, %v2777_v13, 0.0  ;;  %v8418_v13 = vcombine.high %v3034_v32, %v3036_v62 }
 0x822   :  { %v2778_v12 = vsel %vm85_vm0, %v2776_v22, 0.0 }
 0x823   :  { %2779 = vadd.xlane.f32.xlu0 %v2778_v12  ;;  %v8416_v12 = vcombine.high %v3033_v51, %v3035_v9 }
 0x827   :  { %2782 = vadd.xlane.f32.xlu0 %v2781_v16  ;;  %v3251_v16 = vld [vmem:[#allocation8 + $0x1d0] sm:$0xff] }
 0x8ac   :  { %v2780_v56 = vpop.xlane.xlu0 %2779 }
 0x8ad   :  { %v2784_v33 = vmul.f32 0.03125, %v2780_v56 }
 0x8af   :  { %v2786_v60 = vadd.f32 1e-05, %v2784_v33 }
 0x8b0   :  { %v2783_v19 = vpop.xlane.xlu0 %2782 }
 0x8b1   :  { %8998 = vrsqrt.f32 %v2786_v60  ;;  %v2785_v21 = vmul.f32 0.03125, %v2783_v19 }
 0x8b3   :  { %v2787_v61 = vadd.f32 1e-05, %v2785_v21 }
 0x8b5   :  { %9000 = vrsqrt.f32 %v2787_v61  ;;  %v3041_v61 = vld [vmem:[#allocation7 + $0x4] sm:$0xf] }
 0x8b6   :  { %v3054_v9 = vrot.slane %v3041_v61, %v9485_v26 }
 0x8be   :  { %v8999_v15 = vpop.eup %8998 }
 0x8bf   :  { %v2790_v0 = vmul.f32 %v8999_v15, %v2774_v11  ;;  %v3249_v11 = vld [vmem:[#allocation8 + $0x190] sm:$0xff] }
 0x8c0   :  { %v8438_v18 = vcombine.high %v3249_v11, %v3251_v16  ;;  %v8437_v20 = vcombine.low %v3249_v11, %v3251_v16 }
 0x8c1   :  { %v2796_v7 = vmul.f32 %v2795_v63, %v2790_v0 }
 0x8c2   :  { %v9001_v1 = vpop.eup %9000 }
 0x8c3   :  { %v2791_v48 = vmul.f32 %v9001_v1, %v2775_v59  ;;  %v2802_v4 = vadd.f32 %v2801_v3, %v2796_v7  ;;  %v8417_v59 = vcombine.low %v3034_v32, %v3036_v62  ;;  %v3046_v7 = vrot.slane %v3041_v61, %v9495_v39 }
 0x8c4   :  { %v3050_v32 = vrot.slane %v3041_v61, %v9890_v44 }
 0x8c5   :  { %v2797_v23 = vmul.f32 %v2795_v63, %v2791_v48 }
 0x8c7   :  { %v2803_v10 = vadd.f32 %v2801_v3, %v2797_v23 }
 0x8c9   :  { %v9918_v22 = vpack.c.bf16 %v2803_v10, %v2802_v4  ;;  %v3058_v10 = vrot.slane %v3041_v61, %v9488_v28 }
 0x8cb   :  { %8405 = vmatmul.mubr.msk.bf16.vlgmr.msra.gmra.mxu1 %vm85_vm0, %v9918_v22  ;;  %8406 = vmatmul.mubr.msk.bf16.vlgmr.msra.gmra.mxu0 %vm85_vm0, %v9918_v22 }
 0x8cc   :  { %3116 = vmatpush1.bf16.msra.mxu1 %v8419_v52  ;;  %3159 = vmatpush1.bf16.msra.mxu0 %v8421_v53  ;;  %v8445_v52 = vcombine.low %v9930_v36, %v9932_v37  ;;  %v2813_v53 = vld [vmem:[#allocation7] sm:$0xf] }
 0x8cd   :  { %3117 = vmatprep.subr.bf16.mxu1 %v8416_v12  ;;  %3160 = vmatprep.subr.bf16.mxu0 %v8418_v13  ;;  %v2822_v55 = vrot.slane %v2813_v53, %v9890_v44  ;;  %v2830_v56 = vrot.slane %v2813_v53, %v9488_v28  ;;  %v2818_v16 = vrot.slane %v2813_v53, %v9495_v39 }
 0x8ce   :  { %3135 = vmatprep.mubr.bf16.mxu1 %v9431_v42  ;;  %3178 = vmatprep.mubr.bf16.mxu0 %v9431_v42  ;;  %v2826_v17 = vrot.slane %v2813_v53, %v9485_v26 }
 0x8d0   :  { %3118 = vmatpush1.bf16.msra.mxu1 %v8415_v14  ;;  %3161 = vmatpush1.bf16.msra.mxu0 %v8417_v59 }
 0x8d1   :  { %3309 = vmatprep.subr.bf16.mxu1 %v8438_v18  ;;  %3350 = vmatprep.subr.bf16.mxu0 %v8440_v29 }
 0x8d3   :  { %8423 = vmatmul.mubr.msk.bf16.vlgmr.msra.gmra.mxu1 %vm85_vm0, %v9918_v22  ;;  %8424 = vmatmul.mubr.msk.bf16.vlgmr.msra.gmra.mxu0 %vm85_vm0, %v9918_v22 }
 0x8d4   :  { %3310 = vmatpush1.bf16.xpose.msra.mxu1 %v8437_v20  ;;  %3351 = vmatpush1.bf16.xpose.msra.mxu0 %v8439_v27 }
 0x8d5   :  { %3311 = vmatprep.subr.bf16.mxu1 %v8434_v43  ;;  %3352 = vmatprep.subr.bf16.mxu0 %v8436_v35 }
 0x8dc   :  { %3312 = vmatpush1.bf16.xpose.msra.mxu1 %v8433_v31  ;;  %3353 = vmatpush1.bf16.xpose.msra.mxu0 %v8435_v34 }
 0x8dd   :  { %3431 = vmatprep.subr.bf16.mxu1 %v8446_v40  ;;  %3472 = vmatprep.subr.bf16.mxu0 %v8448_v5 }
 0x98b   :  { %v2912_v33 = vpop.f32.mrf.mxu1  ;;  %v2955_v60 = vpop.f32.mrf.mxu0 }
 0x98c   :  { %v9980_v35 = vadd.f32 %v2912_v33, %v2818_v16  ;;  %v9982_v40 = vadd.f32 %v2955_v60, %v2826_v17 }
 0x98d   :  { %v2914_v19 = vpop.f32.mrf.mxu1  ;;  %v2957_v21 = vpop.f32.mrf.mxu0 }
 0x98e   :  { %v9948_v15 = vadd.f32 %v2914_v19, %v2822_v55  ;;  %v9950_v63 = vadd.f32 %v2957_v21, %v2830_v56 }
 0x98f   :  { %v2916_v0 = vpop.f32.mrf.mxu1  ;;  %v2959_v1 = vpop.f32.mrf.mxu0 }
 0x990   :  { %v8408_v3 = vmul.f32 -1.442695, %v9948_v15  ;;  %v8410_v48 = vmul.f32 -1.442695, %v9950_v63  ;;  %v9991_v61 = vadd.f32 %v2916_v0, %v2818_v16 }
 0x991   :  { %v2918_v23 = vpop.f32.mrf.mxu1  ;;  %v2961_v51 = vpop.f32.mrf.mxu0 }
 0x992   :  { %9002 = vpow2.f32 %v8408_v3  ;;  %v9957_v62 = vadd.f32 %v2918_v23, %v2822_v55  ;;  %v9959_v4 = vadd.f32 %v2961_v51, %v2830_v56  ;;  %v9994_v3 = vadd.f32 %v2959_v1, %v2826_v17 }
 0x993   :  { %v3137_v12 = vpop.f32.mrf.mxu1  ;;  %v3180_v13 = vpop.f32.mrf.mxu0  ;;  %9004 = vpow2.f32 %v8410_v48  ;;  %v8407_v48 = vmul.f32 -1.442695, %v9980_v35  ;;  %v8409_v23 = vmul.f32 -1.442695, %v9982_v40  ;;  %v8411_v0 = vmul.f32 -1.442695, %v9991_v61 }
 0x994   :  { %v8412_v14 = vmul.f32 -1.442695, %v9957_v62  ;;  %v8414_v59 = vmul.f32 -1.442695, %v9959_v4  ;;  %v9964_v11 = vadd.f32 %v3137_v12, %v3046_v7  ;;  %v9968_v18 = vadd.f32 %v3180_v13, %v3054_v9 }
 0x995   :  { %v3139_v24 = vpop.f32.mrf.mxu1  ;;  %v3182_v20 = vpop.f32.mrf.mxu0 }
 0x996   :  { %9006 = vpow2.f32 %v8412_v14  ;;  %v8425_v27 = vmul.f32 -1.442695, %v9964_v11  ;;  %v9971_v29 = vadd.f32 %v3139_v24, %v3050_v32  ;;  %v9973_v30 = vadd.f32 %v3182_v20, %v3058_v10 }
 0x997   :  { %9008 = vpow2.f32 %v8414_v59  ;;  %v8427_v46 = vmul.f32 -1.442695, %v9968_v18  ;;  %v3141_v45 = vpop.f32.mrf.mxu1  ;;  %v3184_v43 = vpop.f32.mrf.mxu0 }
 0x998   :  { %9010 = vpow2.f32 %v8425_v27  ;;  %v8426_v47 = vmul.f32 -1.442695, %v9971_v29  ;;  %v8428_v31 = vmul.f32 -1.442695, %v9973_v30  ;;  %v9978_v34 = vadd.f32 %v3141_v45, %v3046_v7 }
 0x999   :  { %9012 = vpow2.f32 %v8427_v46  ;;  %v9984_v5 = vadd.f32 %v3184_v43, %v3054_v9  ;;  %v3143_v53 = vpop.f32.mrf.mxu1  ;;  %v3186_v55 = vpop.f32.mrf.mxu0  ;;  %v8413_v9 = vmul.f32 -1.442695, %v9994_v3 }
 0x99a   :  { %9014 = vpow2.f32 %v8426_v47  ;;  %v8429_v56 = vmul.f32 -1.442695, %v9978_v34  ;;  %v9987_v19 = vadd.f32 %v3143_v53, %v3050_v32  ;;  %v9989_v21 = vadd.f32 %v3186_v55, %v3058_v10 }
 0x99b   :  { %9016 = vpow2.f32 %v8428_v31  ;;  %v8431_v33 = vmul.f32 -1.442695, %v9984_v5 }
 0x99c   :  { %9018 = vpow2.f32 %v8429_v56  ;;  %v8430_v60 = vmul.f32 -1.442695, %v9987_v19  ;;  %v8432_v7 = vmul.f32 -1.442695, %v9989_v21 }
 0x99d   :  { %9020 = vpow2.f32 %v8431_v33 }
 0x99e   :  { %9022 = vpow2.f32 %v8430_v60 }
 0x99f   :  { %v9003_v51 = vpop.eup %9002  ;;  %9024 = vpow2.f32 %v8432_v7 }
 0x9a0   :  { %9026 = vpow2.f32 %v8407_v48  ;;  %v2989_v1 = vadd.f32 1.0, %v9003_v51  ;;  %v9005_v32 = vpop.eup %9004 }
 0x9a1   :  { %9028 = vpow2.f32 %v8409_v23  ;;  %v2991_v33 = vadd.f32 1.0, %v9005_v32 }
 0x9a2   :  { %9030 = vpow2.f32 %v8411_v0 }
 0x9a3   :  { %v9007_v10 = vpop.eup %9006  ;;  %9032 = vpow2.f32 %v8413_v9 }
 0x9a4   :  { %v9009_v12 = vpop.eup %9008  ;;  %v2993_v13 = vadd.f32 1.0, %v9007_v10  ;;  %9034 = vrcp.f32 %v2989_v1 }
 0x9a5   :  { %v9011_v14 = vpop.eup %9010  ;;  %v2995_v59 = vadd.f32 1.0, %v9009_v12 }
 0x9a6   :  { %v9013_v16 = vpop.eup %9012  ;;  %9036 = vrcp.f32 %v2993_v13  ;;  %v3213_v17 = vadd.f32 1.0, %v9011_v14 }
 0x9a7   :  { %v9015_v24 = vpop.eup %9014  ;;  %9038 = vrcp.f32 %v2995_v59  ;;  %v3215_v20 = vadd.f32 1.0, %v9013_v16 }
 0x9a8   :  { %v9017_v27 = vpop.eup %9016  ;;  %9040 = vrcp.f32 %v3213_v17  ;;  %v3214_v46 = vadd.f32 1.0, %v9015_v24 }
 0x9a9   :  { %v9019_v45 = vpop.eup %9018  ;;  %9042 = vrcp.f32 %v3215_v20  ;;  %v3216_v43 = vadd.f32 1.0, %v9017_v27 }
 0x9aa   :  { %v9021_v47 = vpop.eup %9020  ;;  %9044 = vrcp.f32 %v3214_v46  ;;  %v3217_v31 = vadd.f32 1.0, %v9019_v45 }
 0x9ab   :  { %v9023_v53 = vpop.eup %9022  ;;  %9046 = vrcp.f32 %v3216_v43  ;;  %v3219_v55 = vadd.f32 1.0, %v9021_v47 }
 0x9ac   :  { %v9025_v56 = vpop.eup %9024  ;;  %9048 = vrcp.f32 %v3217_v31  ;;  %v3218_v60 = vadd.f32 1.0, %v9023_v53 }
 0x9ad   :  { %9050 = vrcp.f32 %v3219_v55  ;;  %v3220_v7 = vadd.f32 1.0, %v9025_v56  ;;  %v9027_v48 = vpop.eup %9026 }
 0x9ae   :  { %9052 = vrcp.f32 %v3218_v60  ;;  %v9029_v23 = vpop.eup %9028  ;;  %v2988_v14 = vadd.f32 1.0, %v9027_v48  ;;  %v3021_v48 = vld [vmem:[#allocation8 + $0x100] sm:$0xff] }
 0x9af   :  { %9054 = vrcp.f32 %v3220_v7  ;;  %v9031_v51 = vpop.eup %9030  ;;  %v2990_v27 = vadd.f32 1.0, %v9029_v23  ;;  %v3023_v23 = vld [vmem:[#allocation8 + $0x140] sm:$0xff] }
 0x9b0   :  { %9056 = vrcp.f32 %v2991_v33  ;;  %v9033_v0 = vpop.eup %9032  ;;  %v2992_v16 = vadd.f32 1.0, %v9031_v51 }
 0x9b1   :  { %v9035_v9 = vpop.eup %9034  ;;  %v2994_v17 = vadd.f32 1.0, %v9033_v0  ;;  %9058 = vrcp.f32 %v2988_v14  ;;  %v3024_v0 = vld [vmem:[#allocation8 + $0x148] sm:$0xff] }
 0x9b2   :  { %9060 = vrcp.f32 %v2992_v16 }
 0x9b3   :  { %v9037_v1 = vpop.eup %9036  ;;  %9062 = vrcp.f32 %v2994_v17  ;;  %v3503_v17 = vld [vmem:[#allocation8 + $0x60] sm:$0xff] }
 0x9b4   :  { %v9039_v10 = vpop.eup %9038  ;;  %v3017_v56 = vmul.f32 %v9037_v1, %v9957_v62  ;;  %9064 = vrcp.f32 %v2990_v27  ;;  %v3504_v27 = vld [vmem:[#allocation8 + $0x68] sm:$0xff] }
 0x9b5   :  { %v9041_v12 = vpop.eup %9040 }
 0x9b6   :  { %v9043_v13 = vpop.eup %9042  ;;  %v3237_v33 = vmul.f32 %v9041_v12, %v9964_v11 }
 0x9b7   :  { %v9045_v59 = vpop.eup %9044 }
 0x9b8   :  { %v9047_v32 = vpop.eup %9046  ;;  %v3238_v47 = vmul.f32 %v9045_v59, %v9971_v29  ;;  %v3239_v29 = vmul.f32 %v9043_v13, %v9968_v18  ;;  %v3506_v18 = vld [vmem:[#allocation8 + $0xa8] sm:$0xff] }
 0x9b9   :  { %v9049_v24 = vpop.eup %9048  ;;  %v3240_v60 = vmul.f32 %v9047_v32, %v9973_v30  ;;  %v8442_v30 = vcombine.high %v3021_v48, %v3023_v23 }
 0x9ba   :  { %v9051_v20 = vpop.eup %9050  ;;  %v3241_v45 = vmul.f32 %v9049_v24, %v9978_v34  ;;  %v3019_v34 = vmul.f32 %v9039_v10, %v9959_v4  ;;  %v8441_v10 = vcombine.low %v3021_v48, %v3023_v23 }
 0x9bb   :  { %v9053_v46 = vpop.eup %9052  ;;  %v3243_v31 = vmul.f32 %v9051_v20, %v9984_v5  ;;  %v3022_v5 = vld [vmem:[#allocation8 + $0x108] sm:$0xff] }
 0x9bc   :  { %v9055_v43 = vpop.eup %9054  ;;  %v3242_v53 = vmul.f32 %v9053_v46, %v9987_v19  ;;  %v3013_v19 = vmul.f32 %v9035_v9, %v9948_v15  ;;  %v3253_v14 = vpack.c.bf16 %v3241_v45, %v3237_v33  ;;  %v8444_v12 = vcombine.high %v3022_v5, %v3024_v0  ;;  %v3505_v15 = vld [vmem:[#allocation8 + $0xa0] sm:$0xff]  ;;  %v3508_v9 = vld [vmem:[#allocation8 + $0xe8] sm:$0xff] }
 0x9bd   :  { %v9057_v55 = vpop.eup %9056  ;;  %v3244_v7 = vmul.f32 %v9055_v43, %v9989_v21  ;;  %v3255_v1 = vpack.c.bf16 %v3243_v31, %v3239_v29  ;;  %v8443_v59 = vcombine.low %v3022_v5, %v3024_v0  ;;  %v8456_v36 = vcombine.high %v3506_v18, %v3508_v9  ;;  %v3502_v20 = vld [vmem:[#allocation8 + $0x28] sm:$0xff]  ;;  %v3715_v29 = vld [vmem:[#allocation8 + $0x160] sm:$0xff] }
 0x9be   :  { %v3254_v51 = vpack.c.bf16 %v3242_v53, %v3238_v47  ;;  %v3015_v11 = vmul.f32 %v9057_v55, %v9950_v63  ;;  %v3030_v21 = vpack.c.bf16 %v3017_v56, %v3013_v19  ;;  %v3507_v63 = vld [vmem:[#allocation8 + $0xe0] sm:$0xff]  ;;  %v9059_v13 = vpop.eup %9058  ;;  %v8455_v47 = vcombine.low %v3506_v18, %v3508_v9  ;;  %v3718_v56 = vld [vmem:[#allocation8 + $0x1a8] sm:$0xff] }
 0x9bf   :  { %v3256_v62 = vpack.c.bf16 %v3244_v7, %v3240_v60  ;;  %v8454_v16 = vcombine.high %v3505_v15, %v3507_v63  ;;  %v9061_v32 = vpop.eup %9060  ;;  %v3012_v24 = vmul.f32 %v9059_v13, %v9980_v35  ;;  %v8453_v45 = vcombine.low %v3505_v15, %v3507_v63  ;;  %v3717_v35 = vld [vmem:[#allocation8 + $0x1a0] sm:$0xff]  ;;  %v3720_v60 = vld [vmem:[#allocation8 + $0x1e8] sm:$0xff] }
 0x9c0   :  { %3329 = vmatprep.mubr.bf16.mxu1 %v3254_v51  ;;  %v3032_v4 = vpack.c.bf16 %v3019_v34, %v3015_v11  ;;  %v9063_v37 = vpop.eup %9062  ;;  %v3016_v38 = vmul.f32 %v9061_v32, %v9991_v61  ;;  %v8452_v55 = vcombine.high %v3502_v20, %v3504_v27  ;;  %v8473_v48 = vcombine.low %v3718_v56, %v3720_v60  ;;  %v3713_v34 = vld [vmem:[#allocation8 + $0x120] sm:$0xff]  ;;  %v3714_v51 = vld [vmem:[#allocation8 + $0x128] sm:$0xff]  ;;  %v10030_v11 = vld [vmem:[#allocation8 + $0xb0] sm:$0xff] }
 0x9c1   :  { %3370 = vmatprep.mubr.bf16.mxu0 %v3256_v62  ;;  %3330 = vmatmul.mubr.bf16.vlgmr.msra.gmra.mxu1 %v3253_v14  ;;  %v3018_v41 = vmul.f32 %v9063_v37, %v9994_v3  ;;  %v8451_v3 = vcombine.low %v3502_v20, %v3504_v27  ;;  %v8474_v23 = vcombine.high %v3718_v56, %v3720_v60  ;;  %v3716_v0 = vld [vmem:[#allocation8 + $0x168] sm:$0xff] }
 0x9c2   :  { %3371 = vmatmul.mubr.bf16.vlgmr.msra.gmra.mxu0 %v3255_v1  ;;  %3432 = vmatpush1.bf16.xpose.msra.mxu1 %v8445_v52  ;;  %v9065_v52 = vpop.eup %9064  ;;  %v3029_v43 = vpack.c.bf16 %v3016_v38, %v3012_v24  ;;  %v8468_v5 = vcombine.high %v3713_v34, %v3715_v29  ;;  %v8467_v19 = vcombine.low %v3713_v34, %v3715_v29  ;;  %v10032_v1 = vld [vmem:[#allocation8 + $0xf0] sm:$0xff]  ;;  %v3509_v24 = vld [vmem:[#allocation7 + $0x8] sm:$0xf] }
 0x9c3   :  { %3473 = vmatpush1.bf16.xpose.msra.mxu0 %v8447_v49  ;;  %3451 = vmatprep.mubr.bf16.mxu1 %v3030_v21  ;;  %v3501_v49 = vld [vmem:[#allocation8 + $0x20] sm:$0xff]  ;;  %v3014_v46 = vmul.f32 %v9065_v52, %v9982_v40  ;;  %v8469_v14 = vcombine.low %v3714_v51, %v3716_v0  ;;  %v8470_v62 = vcombine.high %v3714_v51, %v3716_v0 }
 0x9c4   :  { %3492 = vmatprep.mubr.bf16.mxu0 %v3032_v4  ;;  %3433 = vmatprep.subr.bf16.mxu1 %v8442_v30  ;;  %v8450_v31 = vcombine.high %v3501_v49, %v3503_v17  ;;  %v8449_v61 = vcombine.low %v3501_v49, %v3503_v17  ;;  %v3719_v40 = vld [vmem:[#allocation8 + $0x1e0] sm:$0xff]  ;;  %v10034_v30 = vld [vmem:[#allocation8 + $0xb8] sm:$0xff]  ;;  %v8480_v21 = vcombine.high %v10030_v11, %v10032_v1 }
 0x9c5   :  { %3474 = vmatprep.subr.bf16.mxu0 %v8444_v12  ;;  %v3031_v53 = vpack.c.bf16 %v3018_v41, %v3014_v46  ;;  %v8472_v33 = vcombine.high %v3717_v35, %v3719_v40  ;;  %v8471_v7 = vcombine.low %v3717_v35, %v3719_v40  ;;  %v10038_v12 = vld [vmem:[#allocation8 + $0xf8] sm:$0xff]  ;;  %v8479_v4 = vcombine.low %v10030_v11, %v10032_v1  ;;  %v4065_v11 = vld [vmem:[#allocation8 + $0x1b0] sm:$0xff] }
 0x9c6   :  { %v8481_v15 = vcombine.low %v10034_v30, %v10038_v12  ;;  %v8482_v63 = vcombine.high %v10034_v30, %v10038_v12  ;;  %v3526_v40 = vrot.slane %v3509_v24, %v9488_v28  ;;  %v4067_v1 = vld [vmem:[#allocation8 + $0x1f0] sm:$0xff]  ;;  %v4068_v12 = vld [vmem:[#allocation8 + $0x1f8] sm:$0xff] }
 0x9c7   :  { %v8498_v30 = vcombine.high %v4065_v11, %v4067_v1 }
 0x9ca   :  { %3434 = vmatpush1.bf16.xpose.msra.mxu1 %v8441_v10 }
 0x9cb   :  { %3475 = vmatpush1.bf16.xpose.msra.mxu0 %v8443_v59  ;;  %3583 = vmatprep.subr.bf16.mxu1 %v8454_v16 }
 0x9cc   :  { %3626 = vmatprep.subr.bf16.mxu0 %v8456_v36 }
 0x9d1   :  { %3452 = vmatmul.mubr.bf16.vlgmr.msra.gmra.mxu1 %v3029_v43 }
 0x9d2   :  { %3493 = vmatmul.mubr.bf16.vlgmr.msra.gmra.mxu0 %v3031_v53  ;;  %3584 = vmatpush1.bf16.msra.mxu1 %v8453_v45  ;;  %v3522_v53 = vrot.slane %v3509_v24, %v9485_v26 }
 0x9d3   :  { %3627 = vmatpush1.bf16.msra.mxu0 %v8455_v47  ;;  %3585 = vmatprep.subr.bf16.mxu1 %v8450_v31  ;;  %v3514_v47 = vrot.slane %v3509_v24, %v9495_v39 }
 0x9d4   :  { %3628 = vmatprep.subr.bf16.mxu0 %v8452_v55  ;;  %3603 = vmatprep.mubr.bf16.mxu1 %v9431_v42 }
 0x9d5   :  { %3646 = vmatprep.mubr.bf16.mxu0 %v9431_v42 }
 0x9d6   :  { %3586 = vmatpush1.bf16.msra.mxu1 %v8449_v61 }
 0x9d7   :  { %3629 = vmatpush1.bf16.msra.mxu0 %v8451_v3  ;;  %3777 = vmatprep.subr.bf16.mxu1 %v8472_v33  ;;  %v3518_v3 = vrot.slane %v3509_v24, %v9890_v44 }
 0x9d8   :  { %3818 = vmatprep.subr.bf16.mxu0 %v8474_v23 }
 0x9d9   :  { %8457 = vmatmul.mubr.msk.bf16.vlgmr.msra.gmra.mxu1 %vm85_vm0, %v9918_v22 }
 0x9da   :  { %8458 = vmatmul.mubr.msk.bf16.vlgmr.msra.gmra.mxu0 %vm85_vm0, %v9918_v22  ;;  %3778 = vmatpush1.bf16.xpose.msra.mxu1 %v8471_v7 }
 0x9db   :  { %3819 = vmatpush1.bf16.xpose.msra.mxu0 %v8473_v48  ;;  %3779 = vmatprep.subr.bf16.mxu1 %v8468_v5 }
 0x9dc   :  { %3820 = vmatprep.subr.bf16.mxu0 %v8470_v62 }
 0x9e2   :  { %3780 = vmatpush1.bf16.xpose.msra.mxu1 %v8467_v19 }
 0x9e3   :  { %3821 = vmatpush1.bf16.xpose.msra.mxu0 %v8469_v14  ;;  %3931 = vmatprep.subr.bf16.mxu1 %v8480_v21 }
 0x9e4   :  { %3974 = vmatprep.subr.bf16.mxu0 %v8482_v63 }
 0xa81   :  { %v3331_v18 = vpop.f32.mrf.mxu1 }
 0xa82   :  { %v3372_v9 = vpop.f32.mrf.mxu0 }
 0xa83   :  { %v3373_v10 = vadd.f32 %v3372_v9, %v3331_v18  ;;  %v3333_v13 = vpop.f32.mrf.mxu1 }
 0xa84   :  { %v3374_v59 = vpop.f32.mrf.mxu0 }
 0xa85   :  { %v3334_v16 = vpop.f32.mrf.mxu1 }
 0xa86   :  { %v3375_v32 = vpop.f32.mrf.mxu0 }
 0xa87   :  { %v3376_v36 = vadd.f32 %v3375_v32, %v3334_v16  ;;  %v3336_v37 = vpop.f32.mrf.mxu1 }
 0xa88   :  { %v3377_v52 = vpop.f32.mrf.mxu0 }
 0xa91   :  { %v3453_v38 = vpop.f32.mrf.mxu1 }
 0xa92   :  { %v3454_v41 = vadd.f32 %v3453_v38, %v3373_v10  ;;  %v3494_v49 = vpop.f32.mrf.mxu0 }
 0xa93   :  { %v3455_v17 = vpop.f32.mrf.mxu1 }
 0xa94   :  { %v10046_v20 = vadd.f32 %v3494_v49, %v3454_v41  ;;  %v3496_v27 = vpop.f32.mrf.mxu0 }
 0xa95   :  { %v3456_v46 = vpop.f32.mrf.mxu1 }
 0xa96   :  { %v3457_v45 = vadd.f32 %v3456_v46, %v3376_v36  ;;  %v3497_v43 = vpop.f32.mrf.mxu0 }
 0xa97   :  { %v3458_v31 = vpop.f32.mrf.mxu1 }
 0xa98   :  { %v10050_v55 = vadd.f32 %v3497_v43, %v3457_v45  ;;  %v3499_v61 = vpop.f32.mrf.mxu0 }
 0xa99   :  { %v3605_v35 = vpop.f32.mrf.mxu1 }
 0xa9a   :  { %v10054_v56 = vadd.f32 %v3605_v35, %v3514_v47  ;;  %v3648_v33 = vpop.f32.mrf.mxu0 }
 0xa9b   :  { %v10056_v60 = vadd.f32 %v3648_v33, %v3522_v53  ;;  %v3607_v7 = vpop.f32.mrf.mxu1 }
 0xa9c   :  { %v8459_v48 = vmul.f32 -1.442695, %v10054_v56  ;;  %v3608_v23 = vadd.f32 %v3607_v7, %v3518_v3  ;;  %v3650_v34 = vpop.f32.mrf.mxu0 }
 0xa9d   :  { %v8461_v29 = vmul.f32 -1.442695, %v10056_v60  ;;  %v3651_v51 = vadd.f32 %v3650_v34, %v3526_v40  ;;  %v3609_v5 = vpop.f32.mrf.mxu1 }
 0xa9e   :  { %9066 = vpow2.f32 %v8459_v48  ;;  %v8460_v0 = vmul.f32 -1.442695, %v3608_v23  ;;  %v3610_v19 = vadd.f32 %v3609_v5, %v3514_v47  ;;  %v3652_v14 = vpop.f32.mrf.mxu0 }
 0xa9f   :  { %9068 = vpow2.f32 %v8461_v29  ;;  %v8462_v62 = vmul.f32 -1.442695, %v3651_v51  ;;  %v3653_v21 = vadd.f32 %v3652_v14, %v3522_v53  ;;  %v3611_v63 = vpop.f32.mrf.mxu1 }
 0xaa0   :  { %9070 = vpow2.f32 %v8460_v0  ;;  %v8463_v18 = vmul.f32 -1.442695, %v3610_v19  ;;  %v3612_v9 = vadd.f32 %v3611_v63, %v3518_v3  ;;  %v3654_v10 = vpop.f32.mrf.mxu0  ;;  %v3849_v63 = vld [vmem:[#allocation8 + $0x30] sm:$0xff] }
 0xaa1   :  { %9072 = vpow2.f32 %v8462_v62  ;;  %v8465_v13 = vmul.f32 -1.442695, %v3653_v21  ;;  %v3655_v59 = vadd.f32 %v3654_v10, %v3526_v40 }
 0xaa2   :  { %9074 = vpow2.f32 %v8463_v18  ;;  %v8464_v16 = vmul.f32 -1.442695, %v3612_v9  ;;  %v3851_v18 = vld [vmem:[#allocation8 + $0x70] sm:$0xff] }
 0xaa3   :  { %9076 = vpow2.f32 %v8465_v13  ;;  %v8466_v32 = vmul.f32 -1.442695, %v3655_v59 }
 0xaa4   :  { %9078 = vpow2.f32 %v8464_v16 }
 0xaa5   :  { %9080 = vpow2.f32 %v8466_v32  ;;  %v3850_v32 = vld [vmem:[#allocation8 + $0x38] sm:$0xff] }
 0xaab   :  { %v9067_v36 = vpop.eup %9066 }
 0xaac   :  { %v9069_v37 = vpop.eup %9068  ;;  %v3681_v52 = vadd.f32 1.0, %v9067_v36  ;;  %v3852_v36 = vld [vmem:[#allocation8 + $0x78] sm:$0xff] }
 0xaad   :  { %v9071_v38 = vpop.eup %9070  ;;  %v3683_v41 = vadd.f32 1.0, %v9069_v37 }
 0xaae   :  { %v9073_v49 = vpop.eup %9072  ;;  %9082 = vrcp.f32 %v3681_v52  ;;  %v3682_v17 = vadd.f32 1.0, %v9071_v38 }
 0xaaf   :  { %v9075_v24 = vpop.eup %9074  ;;  %9084 = vrcp.f32 %v3683_v41  ;;  %v3684_v27 = vadd.f32 1.0, %v9073_v49  ;;  %v8476_v49 = vcombine.high %v3849_v63, %v3851_v18 }
 0xab0   :  { %v9077_v46 = vpop.eup %9076  ;;  %9086 = vrcp.f32 %v3682_v17  ;;  %v3685_v45 = vadd.f32 1.0, %v9075_v24 }
 0xab1   :  { %v9079_v43 = vpop.eup %9078  ;;  %9088 = vrcp.f32 %v3684_v27  ;;  %v3687_v47 = vadd.f32 1.0, %v9077_v46  ;;  %v4064_v27 = vld [vmem:[#allocation8 + $0x178] sm:$0xff] }
 0xab2   :  { %v9081_v31 = vpop.eup %9080  ;;  %9090 = vrcp.f32 %v3685_v45  ;;  %v3686_v53 = vadd.f32 1.0, %v9079_v43 }
 0xab3   :  { %9092 = vrcp.f32 %v3687_v47  ;;  %v3688_v61 = vadd.f32 1.0, %v9081_v31 }
 0xab4   :  { %9094 = vrcp.f32 %v3686_v53 }
 0xab5   :  { %9096 = vrcp.f32 %v3688_v61  ;;  %v3857_v61 = vld [vmem:[#allocation7 + $0xc] sm:$0xf] }
 0xabb   :  { %v9083_v3 = vpop.eup %9082 }
 0xabc   :  { %v9085_v35 = vpop.eup %9084  ;;  %v3705_v10 = vmul.f32 %v9083_v3, %v10054_v56  ;;  %v8475_v56 = vcombine.low %v3849_v63, %v3851_v18  ;;  %v3874_v63 = vrot.slane %v3857_v61, %v9488_v28 }
 0xabd   :  { %v9087_v40 = vpop.eup %9086  ;;  %v3707_v37 = vmul.f32 %v9085_v35, %v10056_v60  ;;  %v8477_v60 = vcombine.low %v3850_v32, %v3852_v36 }
 0xabe   :  { %v9089_v33 = vpop.eup %9088  ;;  %v3706_v0 = vmul.f32 %v9087_v40, %v3608_v23 }
 0xabf   :  { %v9091_v7 = vpop.eup %9090  ;;  %v3708_v13 = vmul.f32 %v9089_v33, %v3651_v51 }
 0xac0   :  { %v9093_v48 = vpop.eup %9092  ;;  %v3709_v29 = vmul.f32 %v9091_v7, %v3610_v19  ;;  %v8478_v19 = vcombine.high %v3850_v32, %v3852_v36  ;;  %v3862_v7 = vrot.slane %v3857_v61, %v9495_v39 }
 0xac1   :  { %v9095_v34 = vpop.eup %9094  ;;  %v3711_v14 = vmul.f32 %v9093_v48, %v3653_v21  ;;  %v4061_v21 = vld [vmem:[#allocation8 + $0x130] sm:$0xff] }
 0xac2   :  { %v9097_v5 = vpop.eup %9096  ;;  %v3710_v62 = vmul.f32 %v9095_v34, %v3612_v9  ;;  %v3721_v38 = vpack.c.bf16 %v3709_v29, %v3705_v10  ;;  %v4063_v9 = vld [vmem:[#allocation8 + $0x170] sm:$0xff]  ;;  %v3870_v29 = vrot.slane %v3857_v61, %v9485_v26 }
 0xac3   :  { %v3712_v16 = vmul.f32 %v9097_v5, %v3655_v59  ;;  %v3723_v17 = vpack.c.bf16 %v3711_v14, %v3707_v37  ;;  %v4062_v59 = vld [vmem:[#allocation8 + $0x138] sm:$0xff]  ;;  %v8494_v24 = vcombine.high %v4061_v21, %v4063_v9  ;;  %v8493_v46 = vcombine.low %v4061_v21, %v4063_v9 }
 0xac4   :  { %v3722_v52 = vpack.c.bf16 %v3710_v62, %v3706_v0  ;;  %v8495_v45 = vcombine.low %v4062_v59, %v4064_v27  ;;  %v3866_v0 = vrot.slane %v3857_v61, %v9890_v44 }
 0xac5   :  { %v3724_v41 = vpack.c.bf16 %v3712_v16, %v3708_v13 }
 0xac6   :  { %3797 = vmatprep.mubr.bf16.mxu1 %v3722_v52 }
 0xac7   :  { %3838 = vmatprep.mubr.bf16.mxu0 %v3724_v41  ;;  %3798 = vmatmul.mubr.bf16.vlgmr.msra.gmra.mxu1 %v3721_v38 }
 0xac8   :  { %3839 = vmatmul.mubr.bf16.vlgmr.msra.gmra.mxu0 %v3723_v17  ;;  %3932 = vmatpush1.bf16.msra.mxu1 %v8479_v4  ;;  %v4066_v4 = vld [vmem:[#allocation8 + $0x1b8] sm:$0xff] }
 0xac9   :  { %3975 = vmatpush1.bf16.msra.mxu0 %v8481_v15  ;;  %3933 = vmatprep.subr.bf16.mxu1 %v8476_v49  ;;  %v8497_v15 = vcombine.low %v4065_v11, %v4067_v1  ;;  %v8499_v23 = vcombine.low %v4066_v4, %v4068_v12  ;;  %v8500_v51 = vcombine.high %v4066_v4, %v4068_v12 }
 0xaca   :  { %3976 = vmatprep.subr.bf16.mxu0 %v8478_v19  ;;  %3951 = vmatprep.mubr.bf16.mxu1 %v9431_v42 }
 0xacb   :  { %3994 = vmatprep.mubr.bf16.mxu0 %v9431_v42 }
 0xacc   :  { %3934 = vmatpush1.bf16.msra.mxu1 %v8475_v56 }
 0xacd   :  { %3977 = vmatpush1.bf16.msra.mxu0 %v8477_v60  ;;  %4125 = vmatprep.subr.bf16.mxu1 %v8498_v30 }
 0xace   :  { %4166 = vmatprep.subr.bf16.mxu0 %v8500_v51 }
 0xacf   :  { %8483 = vmatmul.mubr.msk.bf16.vlgmr.msra.gmra.mxu1 %vm85_vm0, %v9918_v22 }
 0xad0   :  { %8484 = vmatmul.mubr.msk.bf16.vlgmr.msra.gmra.mxu0 %vm85_vm0, %v9918_v22  ;;  %4126 = vmatpush1.bf16.xpose.msra.mxu1 %v8497_v15  ;;  %v8496_v22 = vcombine.high %v4062_v59, %v4064_v27 }
 0xad1   :  { %4167 = vmatpush1.bf16.xpose.msra.mxu0 %v8499_v23  ;;  %4127 = vmatprep.subr.bf16.mxu1 %v8494_v24 }
 0xad2   :  { %4168 = vmatprep.subr.bf16.mxu0 %v8496_v22 }
 0xad8   :  { %4128 = vmatpush1.bf16.xpose.msra.mxu1 %v8493_v46 }
 0xad9   :  { %4169 = vmatpush1.bf16.xpose.msra.mxu0 %v8495_v45 }
 0xada   :  { %8855 = vmatprep.subr.mxu0 %v9426_v50 }
 0xb87   :  { %v3799_v43 = vpop.f32.mrf.mxu1 }
 0xb88   :  { %v3840_v47 = vpop.f32.mrf.mxu0 }
 0xb89   :  { %v3841_v31 = vadd.f32 %v3840_v47, %v3799_v43  ;;  %v3801_v53 = vpop.f32.mrf.mxu1 }
 0xb8a   :  { %v3842_v3 = vpop.f32.mrf.mxu0 }
 0xb8b   :  { %v10076_v35 = vadd.f32 %v3841_v31, %v10046_v20  ;;  %v3802_v40 = vpop.f32.mrf.mxu1 }
 0xb8c   :  { %v3843_v33 = vpop.f32.mrf.mxu0 }
 0xb8d   :  { %v3844_v48 = vadd.f32 %v3843_v33, %v3802_v40  ;;  %v3804_v34 = vpop.f32.mrf.mxu1 }
 0xb8e   :  { %v3845_v5 = vpop.f32.mrf.mxu0 }
 0xb8f   :  { %v10082_v14 = vadd.f32 %v3844_v48, %v10050_v55  ;;  %v3953_v62 = vpop.f32.mrf.mxu1 }
 0xb90   :  { %v10085_v18 = vadd.f32 %v3953_v62, %v3862_v7  ;;  %v3996_v20 = vpop.f32.mrf.mxu0 }
 0xb91   :  { %v10087_v10 = vadd.f32 %v3996_v20, %v3870_v29  ;;  %v3955_v13 = vpop.f32.mrf.mxu1 }
 0xb92   :  { %v8485_v16 = vmul.f32 -1.442695, %v10085_v18  ;;  %v3956_v32 = vadd.f32 %v3955_v13, %v3866_v0  ;;  %v3998_v36 = vpop.f32.mrf.mxu0 }
 0xb93   :  { %v8487_v37 = vmul.f32 -1.442695, %v10087_v10  ;;  %v3999_v52 = vadd.f32 %v3998_v36, %v3874_v63  ;;  %v3957_v38 = vpop.f32.mrf.mxu1 }
 0xb94   :  { %9098 = vpow2.f32 %v8485_v16  ;;  %v8486_v55 = vmul.f32 -1.442695, %v3956_v32  ;;  %v3958_v41 = vadd.f32 %v3957_v38, %v3862_v7  ;;  %v4000_v49 = vpop.f32.mrf.mxu0 }
 0xb95   :  { %9100 = vpow2.f32 %v8487_v37  ;;  %v8488_v17 = vmul.f32 -1.442695, %v3999_v52  ;;  %v4001_v19 = vadd.f32 %v4000_v49, %v3870_v29  ;;  %v3959_v56 = vpop.f32.mrf.mxu1 }
 0xb96   :  { %9102 = vpow2.f32 %v8486_v55  ;;  %v8489_v60 = vmul.f32 -1.442695, %v3958_v41  ;;  %v3960_v11 = vadd.f32 %v3959_v56, %v3866_v0  ;;  %v4002_v1 = vpop.f32.mrf.mxu0 }
 0xb97   :  { %9104 = vpow2.f32 %v8488_v17  ;;  %v8491_v4 = vmul.f32 -1.442695, %v4001_v19  ;;  %v4003_v30 = vadd.f32 %v4002_v1, %v3874_v63  ;;  %v9301_v1 = vld [vmem:[#allocation5 + $0x40] sm:$0xff] }
 0xb98   :  { %9106 = vpow2.f32 %v8489_v60  ;;  %v8490_v12 = vmul.f32 -1.442695, %v3960_v11 }
 0xb99   :  { %9108 = vpow2.f32 %v8491_v4  ;;  %v8492_v15 = vmul.f32 -1.442695, %v4003_v30 }
 0xb9a   :  { %9110 = vpow2.f32 %v8490_v12 }
 0xb9b   :  { %9112 = vpow2.f32 %v8492_v15 }
 0xba1   :  { %v9099_v23 = vpop.eup %9098 }
 0xba2   :  { %v9101_v51 = vpop.eup %9100  ;;  %v4029_v21 = vadd.f32 1.0, %v9099_v23 }
 0xba3   :  { %v9103_v9 = vpop.eup %9102  ;;  %v4031_v59 = vadd.f32 1.0, %v9101_v51 }
 0xba4   :  { %v9105_v24 = vpop.eup %9104  ;;  %9114 = vrcp.f32 %v4029_v21  ;;  %v4030_v27 = vadd.f32 1.0, %v9103_v9 }
 0xba5   :  { %v9107_v46 = vpop.eup %9106  ;;  %9116 = vrcp.f32 %v4031_v59  ;;  %v4032_v45 = vadd.f32 1.0, %v9105_v24 }
 0xba6   :  { %v9109_v22 = vpop.eup %9108  ;;  %9118 = vrcp.f32 %v4030_v27  ;;  %v4033_v43 = vadd.f32 1.0, %v9107_v46 }
 0xba7   :  { %v9111_v47 = vpop.eup %9110  ;;  %9120 = vrcp.f32 %v4032_v45  ;;  %v4035_v31 = vadd.f32 1.0, %v9109_v22 }
 0xba8   :  { %v9113_v53 = vpop.eup %9112  ;;  %9122 = vrcp.f32 %v4033_v43  ;;  %v4034_v61 = vadd.f32 1.0, %v9111_v47 }
 0xba9   :  { %9124 = vrcp.f32 %v4035_v31  ;;  %v4036_v3 = vadd.f32 1.0, %v9113_v53 }
 0xbaa   :  { %9126 = vrcp.f32 %v4034_v61  ;;  %v4209_v61 = vld [vmem:[#allocation5 + $0x60] sm:$0xff] }
 0xbab   :  { %9128 = vrcp.f32 %v4036_v3  ;;  %v4208_v3 = vld [vmem:[#allocation5 + $0x58] sm:$0xff]  ;;  %8839 = vmatprep.subr.mxu1 %v4209_v61 }
 0xbb1   :  { %v9115_v40 = vpop.eup %9114 }
 0xbb2   :  { %v9117_v33 = vpop.eup %9116  ;;  %v4053_v16 = vmul.f32 %v9115_v40, %v10085_v18  ;;  %v4207_v40 = vld [vmem:[#allocation5 + $0x50] sm:$0xff] }
 0xbb3   :  { %v9119_v7 = vpop.eup %9118  ;;  %v4055_v38 = vmul.f32 %v9117_v33, %v10087_v10  ;;  %v4206_v33 = vld [vmem:[#allocation5 + $0x48] sm:$0xff] }
 0xbb4   :  { %v9121_v48 = vpop.eup %9120  ;;  %v4054_v63 = vmul.f32 %v9119_v7, %v3956_v32 }
 0xbb5   :  { %v9123_v34 = vpop.eup %9122  ;;  %v4056_v36 = vmul.f32 %v9121_v48, %v3999_v52 }
 0xbb6   :  { %v9125_v29 = vpop.eup %9124  ;;  %v4057_v0 = vmul.f32 %v9123_v34, %v3958_v41  ;;  %v4201_v41 = vsub.s32 6, %v9482_v25 }
 0xbb7   :  { %v9127_v5 = vpop.eup %9126  ;;  %v4059_v20 = vmul.f32 %v9125_v29, %v4001_v19 }
 0xbb8   :  { %v9129_v62 = vpop.eup %9128  ;;  %v4058_v13 = vmul.f32 %v9127_v5, %v3960_v11  ;;  %v4069_v49 = vpack.c.bf16 %v4057_v0, %v4053_v16  ;;  %v4202_v4 = vrot.slane %v9301_v1, %v4201_v41 }
 0xbb9   :  { %v4060_v37 = vmul.f32 %v9129_v62, %v4003_v30  ;;  %v4071_v56 = vpack.c.bf16 %v4059_v20, %v4055_v38  ;;  %v4214_v62 = vld [vmem:[#allocation5 + $0x88] sm:$0xff] }
 0xbba   :  { %v4070_v55 = vpack.c.bf16 %v4058_v13, %v4054_v63  ;;  %v4244_v63 = vrot.slane %v4214_v62, %v9485_v26  ;;  %v4250_v16 = vrot.slane %v4214_v62, %v9488_v28 }
 0xbbb   :  { %v4072_v17 = vpack.c.bf16 %v4060_v37, %v4056_v36 }
 0xbbc   :  { %4145 = vmatprep.mubr.bf16.mxu1 %v4070_v55 }
 0xbbd   :  { %4186 = vmatprep.mubr.bf16.mxu0 %v4072_v17  ;;  %4146 = vmatmul.mubr.bf16.vlgmr.msra.gmra.mxu1 %v4069_v49 }
 0xbbe   :  { %4187 = vmatmul.mubr.bf16.vlgmr.msra.gmra.mxu0 %v4071_v56  ;;  %8840 = vmatpush3.msra.mxu1 %v4209_v61 }
 0xbbf   :  { %8857 = vmatprep.mubr.msk.f32.mxu0 %vm9427_vm1, %v9426_v50  ;;  %8841 = vmatprep.subr.mxu1 %v4208_v3 }
 0xbc0   :  { %8842 = vmatpush3.msra.mxu1 %v4208_v3 }
 0xbc1   :  { %8843 = vmatprep.subr.mxu1 %v4207_v40 }
 0xbc2   :  { %8844 = vmatpush3.msra.mxu1 %v4207_v40 }
 0xbc3   :  { %8845 = vmatprep.subr.mxu1 %v4206_v33 }
 0xbc4   :  { %8846 = vmatpush3.msra.mxu1 %v4206_v33 }
 0xbc5   :  { %8850 = vmatprep.subr.mxu1 %v9426_v50 }
 0xc7d   :  { %v4147_v32 = vpop.f32.mrf.mxu1 }
 0xc7e   :  { %v4188_v19 = vpop.f32.mrf.mxu0 }
 0xc7f   :  { %v4189_v18 = vadd.f32 %v4188_v19, %v4147_v32  ;;  %v4149_v52 = vpop.f32.mrf.mxu1  ;;  %v4256_v32 = vrot.slane %v4214_v62, %v9495_v39 }
 0xc80   :  { %v4190_v60 = vpop.f32.mrf.mxu0 }
 0xc81   :  { %v4195_v10 = vadd.f32 %v4189_v18, %v10076_v35  ;;  %v4150_v11 = vpop.f32.mrf.mxu1 }
 0xc82   :  { %v4191_v30 = vpop.f32.mrf.mxu0 }
 0xc83   :  { %v4197_v12 = vadd.f32 %v4195_v10, %v9898_v57  ;;  %v4192_v15 = vadd.f32 %v4191_v30, %v4150_v11  ;;  %v4152_v23 = vpop.f32.mrf.mxu1 }
 0xc84   :  { %v4193_v51 = vpop.f32.mrf.mxu0 }
 0xc85   :  { %v4196_v21 = vadd.f32 %v4192_v15, %v10082_v14  ;;  %v10101_v9 = vadd.f32 %v4202_v4, %v4197_v12 }
 0xc87   :  { %v4198_v59 = vadd.f32 %v4196_v21, %v9896_v8  ;;  %v4215_v35 = vsel %vm85_vm0, %v10101_v9, 0.0 }
 0xc88   :  { %4216 = vadd.xlane.f32.xlu0 %v4215_v35 }
 0xc89   :  { %v10106_v24 = vadd.f32 %v4202_v4, %v4198_v59 }
 0xc8b   :  { %v4218_v27 = vsel %vm85_vm0, %v10106_v24, 0.0 }
 0xc8c   :  { %4219 = vadd.xlane.f32.xlu1 %v4218_v27 }
 0xd11   :  { %v4217_v57 = vpop.xlane.xlu0 %4216 }
 0xd12   :  { %v4221_v46 = vmul.f32 0.03125, %v4217_v57 }
 0xd14   :  { %v4223_v45 = vsub.f32 %v10101_v9, %v4221_v46 }
 0xd15   :  { %v4220_v22 = vpop.xlane.xlu1 %4219 }
 0xd16   :  { %v4222_v14 = vmul.f32 0.03125, %v4220_v22  ;;  %v4225_v43 = vmul.f32 %v4223_v45, %v4223_v45 }
 0xd18   :  { %v4224_v47 = vsub.f32 %v10106_v24, %v4222_v14  ;;  %v4227_v8 = vsel %vm85_vm0, %v4225_v43, 0.0 }
 0xd19   :  { %4228 = vadd.xlane.f32.xlu0 %v4227_v8 }
 0xd1a   :  { %v4226_v31 = vmul.f32 %v4224_v47, %v4224_v47 }
 0xd1c   :  { %v4230_v53 = vsel %vm85_vm0, %v4226_v31, 0.0 }
 0xd1d   :  { %4231 = vadd.xlane.f32.xlu1 %v4230_v53 }
 0xda2   :  { %v4229_v7 = vpop.xlane.xlu0 %4228 }
 0xda3   :  { %v4233_v48 = vmul.f32 0.03125, %v4229_v7 }
 0xda5   :  { %v4235_v34 = vadd.f32 1e-05, %v4233_v48 }
 0xda6   :  { %v4232_v29 = vpop.xlane.xlu1 %4231 }
 0xda7   :  { %9130 = vrsqrt.f32 %v4235_v34  ;;  %v4234_v5 = vmul.f32 0.03125, %v4232_v29 }
 0xda9   :  { %v4236_v0 = vadd.f32 1e-05, %v4234_v5 }
 0xdab   :  { %9132 = vrsqrt.f32 %v4236_v0 }
 0xdb4   :  { %v9131_v20 = vpop.eup %9130 }
 0xdb5   :  { %v4239_v13 = vmul.f32 %v9131_v20, %v4223_v45 }
 0xdb7   :  { %v4245_v36 = vmul.f32 %v4244_v63, %v4239_v13 }
 0xdb8   :  { %v9133_v37 = vpop.eup %9132 }
 0xdb9   :  { %v4240_v38 = vmul.f32 %v9133_v37, %v4224_v47  ;;  %v4251_v55 = vadd.f32 %v4250_v16, %v4245_v36 }
 0xdbb   :  { %v4246_v49 = vmul.f32 %v4244_v63, %v4240_v38  ;;  %8847 = vmatprep.mubr.msk.f32.mxu1 %vm85_vm0, %v4251_v55 }
 0xdbd   :  { %v4252_v17 = vadd.f32 %v4250_v16, %v4246_v49 }
 0xdbf   :  { %8848 = vmatmul.mubr.msk.f32.vlgmr.msra.gmra.mxu1 %vm85_vm0, %v4252_v17 }
 0xdc0   :  { %8852 = vmatprep.mubr.msk.f32.mxu1 %vm9427_vm1, %v9426_v50 }
 0xe7f   :  { %v8849_v56 = vpop.f32.mrf.mxu1 }
 0xe80   :  { %v10124_v52 = vadd.f32 %v8849_v56, %v4256_v32 }
 0xe81   :  { %v4329_v19 = vpop.f32.mrf.mxu1 }
 0xe82   :  { %v4330_v18 = vadd.f32 %v4329_v19, %v4256_v32 }
 0xe84   :  { %4346 = vrot.lane.b32.xlu1 %v4330_v18, %s9422_s2  ;;  %4340 = vrot.lane.b32.xlu0 %v4330_v18, %s9423_s3 }
 0xe88   :  { %4352 = vrot.lane.b32.xlu1 %v4330_v18, %s9424_s13  ;;  %4348 = vrot.lane.b32.xlu0 %v10124_v52, %s9422_s2 }
 0xe8c   :  { %4342 = vrot.lane.b32.xlu1 %v10124_v52, %s9423_s3  ;;  %4630 = vrot.lane.b32.xlu0 %v4330_v18, %s9425_s14 }
 0xe90   :  { %4354 = vrot.lane.b32.xlu1 %v10124_v52, %s9424_s13 }
 0xef6   :  { %v4347_v60 = vpop.permute.xlu1 %4346  ;;  %v4341_v10 = vpop.permute.xlu0 %4340 }
 0xef7   :  { %4638 = vrot.lane.b32.xlu0 %v4347_v60, %s9425_s14  ;;  %4634 = vrot.lane.b32.xlu1 %v4341_v10, %s9425_s14  ;;  %v4358_v11 = vcombine.low %v4330_v18, %v4347_v60  ;;  %v4359_v1 = vcombine.high %v4330_v18, %v4347_v60 }
 0xef9   :  { %v4366_v15 = vrot.slane %v4358_v11, %v9551_v58  ;;  %v4373_v23 = vrot.slane %v4359_v1, %v9551_v58 }
 0xefa   :  { %v4353_v4 = vpop.permute.xlu1 %4352  ;;  %v10143_v59 = vpop.permute.xlu0 %4348 }
 0xefb   :  { %v4374_v30 = vcombine.low %v4341_v10, %v4353_v4  ;;  %v4375_v12 = vcombine.high %v4341_v10, %v4353_v4  ;;  %4632 = vrot.lane.b32.xlu0 %v10124_v52, %s9425_s14  ;;  %4642 = vrot.lane.b32.xlu1 %v4353_v4, %s9425_s14  ;;  %v4426_v17 = vcombine.low %v10124_v52, %v10143_v59 }
 0xefc   :  { %v4427_v56 = vcombine.high %v10124_v52, %v10143_v59 }
 0xefd   :  { %v4382_v51 = vrot.slane %v4374_v30, %v9551_v58  ;;  %v4389_v21 = vrot.slane %v4375_v12, %v9551_v58 }
 0xefe   :  { %v10145_v35 = vpop.permute.xlu1 %4342 }
 0xeff   :  { %v4390_v27 = vcombine.low %v4366_v15, %v4382_v51  ;;  %v4391_v57 = vcombine.high %v4366_v15, %v4382_v51  ;;  %v4406_v46 = vcombine.low %v4373_v23, %v4389_v21  ;;  %v4407_v45 = vcombine.high %v4373_v23, %v4389_v21  ;;  %4640 = vrot.lane.b32.xlu0 %v10143_v59, %s9425_s14 }
 0xf00   :  { %4636 = vrot.lane.b32.xlu1 %v10145_v35, %s9425_s14 }
 0xf01   :  { %v4398_v22 = vrot.slane %v4390_v27, %v9563_v2  ;;  %v4405_v14 = vrot.slane %v4391_v57, %v9563_v2  ;;  %v4414_v43 = vrot.slane %v4406_v46, %v9563_v2  ;;  %v4421_v47 = vrot.slane %v4407_v45, %v9563_v2 }
 0xf02   :  { %v10155_v8 = vpop.permute.xlu1 %4354 }
 0xf03   :  { %v4494_v31 = vcombine.low %v4398_v22, %v4405_v14  ;;  %v8503_v53 = vcombine.high %v4398_v22, %v4405_v14  ;;  %v4510_v61 = vcombine.low %v4414_v43, %v4421_v47  ;;  %v8504_v3 = vcombine.high %v4414_v43, %v4421_v47  ;;  %4926 = vrot.lane.b32.xlu0 %v4330_v18, %s9421_s10 }
 0xf04   :  { %4644 = vrot.lane.b32.xlu1 %v10155_v8, %s9425_s14  ;;  %v4442_v55 = vcombine.low %v10145_v35, %v10155_v8  ;;  %v4443_v49 = vcombine.high %v10145_v35, %v10155_v8  ;;  %v4434_v18 = vrot.slane %v4426_v17, %v9551_v58 }
 0xf05   :  { %v4501_v40 = vrot.slane %v4494_v31, %v9551_v58  ;;  %v4509_v33 = vrot.slane %v8503_v53, %v9551_v58  ;;  %v4517_v7 = vrot.slane %v4510_v61, %v9551_v58  ;;  %v4525_v48 = vrot.slane %v8504_v3, %v9551_v58 }
 0xf06   :  { %v4450_v32 = vrot.slane %v4442_v55, %v9551_v58  ;;  %v4457_v19 = vrot.slane %v4443_v49, %v9551_v58 }
 0xf07   :  { %v4526_v34 = vcombine.low %v4501_v40, %v4509_v33  ;;  %v4542_v29 = vcombine.low %v4517_v7, %v4525_v48  ;;  %v4527_v5 = vcombine.high %v4501_v40, %v4509_v33  ;;  %v4543_v0 = vcombine.high %v4517_v7, %v4525_v48 }
 0xf08   :  { %4930 = vrot.lane.b32.xlu1 %v4341_v10, %s9421_s10  ;;  %v4631_v10 = vpop.permute.xlu0 %4630  ;;  %v4458_v11 = vcombine.low %v4434_v18, %v4450_v32  ;;  %v4459_v1 = vcombine.high %v4434_v18, %v4450_v32 }
 0xf09   :  { %v10166_v62 = vrot.slane %v4526_v34, %v9563_v2  ;;  %v10169_v63 = vrot.slane %v4542_v29, %v9563_v2  ;;  %v10172_v20 = vrot.slane %v4527_v5, %v9563_v2  ;;  %v10175_v13 = vrot.slane %v4543_v0, %v9563_v2 }
 0xf0a   :  { %v4466_v23 = vrot.slane %v4458_v11, %v9563_v2  ;;  %v4473_v51 = vrot.slane %v4459_v1, %v9563_v2 }
 0xf0b   :  { %v4558_v16 = vcombine.low %v10166_v62, %v10169_v63  ;;  %v4559_v36 = vcombine.high %v10166_v62, %v10169_v63  ;;  %v4560_v37 = vcombine.low %v10172_v20, %v10175_v13  ;;  %v4561_v38 = vcombine.high %v10172_v20, %v10175_v13 }
 0xf0c   :  { %4934 = vrot.lane.b32.xlu1 %v4347_v60, %s9421_s10  ;;  %v4441_v60 = vrot.slane %v4427_v56, %v9551_v58  ;;  %v4562_v22 = vcombine.low %v4466_v23, %v4473_v51  ;;  %v8505_v14 = vcombine.high %v4466_v23, %v4473_v51 }
 0xf0e   :  { %v4475_v30 = vcombine.high %v4441_v60, %v4457_v19  ;;  %v10208_v48 = vrot.slane %v4562_v22, %v9551_v58  ;;  %v10211_v34 = vrot.slane %v8505_v14, %v9551_v58 }
 0xf10   :  { %4938 = vrot.lane.b32.xlu1 %v4353_v4, %s9421_s10  ;;  %v4474_v4 = vcombine.low %v4441_v60, %v4457_v19  ;;  %v4489_v27 = vrot.slane %v4475_v30, %v9563_v2  ;;  %v4594_v30 = vcombine.low %v10208_v48, %v10211_v34 }
 0xf12   :  { %v4482_v21 = vrot.slane %v4474_v4, %v9563_v2 }
 0xf14   :  { %v4578_v43 = vcombine.low %v4482_v21, %v4489_v27  ;;  %v8506_v47 = vcombine.high %v4482_v21, %v4489_v27 }
 0xf16   :  { %v10214_v29 = vrot.slane %v4578_v43, %v9551_v58  ;;  %v10217_v5 = vrot.slane %v8506_v47, %v9551_v58 }
 0xf18   :  { %v4611_v22 = vcombine.high %v10214_v29, %v10217_v5 }
 0xf69   :  { %v4635_v12 = vpop.permute.xlu1 %4634  ;;  %v4639_v15 = vpop.permute.xlu0 %4638 }
 0xf6a   :  { %v4654_v57 = vcombine.low %v4631_v10, %v4639_v15  ;;  %v4655_v46 = vcombine.high %v4631_v10, %v4639_v15 }
 0xf6c   :  { %v4662_v3 = vrot.slane %v4654_v57, %v9551_v58  ;;  %v4669_v40 = vrot.slane %v4655_v46, %v9551_v58  ;;  %v4595_v46 = vcombine.high %v10208_v48, %v10211_v34 }
 0xf6d   :  { %v4633_v45 = vpop.permute.xlu0 %4632  ;;  %v4643_v31 = vpop.permute.xlu1 %4642 }
 0xf6e   :  { %v4670_v53 = vcombine.low %v4635_v12, %v4643_v31  ;;  %v4671_v61 = vcombine.high %v4635_v12, %v4643_v31  ;;  %v4610_v12 = vcombine.low %v10214_v29, %v10217_v5 }
 0xf70   :  { %v4678_v33 = vrot.slane %v4670_v53, %v9551_v58  ;;  %v4685_v7 = vrot.slane %v4671_v61, %v9551_v58 }
 0xf71   :  { %v4641_v32 = vpop.permute.xlu0 %4640 }
 0xf72   :  { %v4637_v0 = vpop.permute.xlu1 %4636  ;;  %v4686_v55 = vcombine.low %v4662_v3, %v4678_v33  ;;  %v4687_v49 = vcombine.high %v4662_v3, %v4678_v33  ;;  %v4702_v17 = vcombine.low %v4669_v40, %v4685_v7  ;;  %v4703_v56 = vcombine.high %v4669_v40, %v4685_v7 }
 0xf73   :  { %v4722_v11 = vcombine.low %v4633_v45, %v4641_v32  ;;  %v4723_v1 = vcombine.high %v4633_v45, %v4641_v32 }
 0xf74   :  { %v4694_v19 = vrot.slane %v4686_v55, %v9563_v2  ;;  %v4701_v18 = vrot.slane %v4687_v49, %v9563_v2  ;;  %v4710_v60 = vrot.slane %v4702_v17, %v9563_v2  ;;  %v4717_v10 = vrot.slane %v4703_v56, %v9563_v2 }
 0xf75   :  { %v4730_v31 = vrot.slane %v4722_v11, %v9551_v58  ;;  %v4737_v53 = vrot.slane %v4723_v1, %v9551_v58 }
 0xf76   :  { %v4645_v4 = vpop.permute.xlu1 %4644  ;;  %v4790_v15 = vcombine.low %v4694_v19, %v4701_v18  ;;  %v8507_v23 = vcombine.high %v4694_v19, %v4701_v18  ;;  %v4806_v51 = vcombine.low %v4710_v60, %v4717_v10  ;;  %v8508_v21 = vcombine.high %v4710_v60, %v4717_v10 }
 0xf77   :  { %v4738_v27 = vcombine.low %v4637_v0, %v4645_v4  ;;  %v4739_v57 = vcombine.high %v4637_v0, %v4645_v4  ;;  %v10243_v10 = vrot.slane %v4594_v30, %v9563_v2 }
 0xf78   :  { %v4797_v45 = vrot.slane %v4790_v15, %v9551_v58  ;;  %v4805_v14 = vrot.slane %v8507_v23, %v9551_v58  ;;  %v4813_v43 = vrot.slane %v4806_v51, %v9551_v58  ;;  %v4821_v47 = vrot.slane %v8508_v21, %v9551_v58  ;;  %v4927_v23 = vpop.permute.xlu0 %4926 }
 0xf79   :  { %v4746_v61 = vrot.slane %v4738_v27, %v9551_v58  ;;  %v4753_v3 = vrot.slane %v4739_v57, %v9551_v58 }
 0xf7a   :  { %v4931_v40 = vpop.permute.xlu1 %4930  ;;  %v4822_v33 = vcombine.low %v4797_v45, %v4805_v14  ;;  %v4823_v7 = vcombine.high %v4797_v45, %v4805_v14  ;;  %v4838_v0 = vcombine.low %v4813_v43, %v4821_v47  ;;  %v4839_v55 = vcombine.high %v4813_v43, %v4821_v47 }
 0xf7b   :  { %v4754_v49 = vcombine.low %v4730_v31, %v4746_v61  ;;  %v4755_v17 = vcombine.high %v4730_v31, %v4746_v61  ;;  %v4770_v56 = vcombine.low %v4737_v53, %v4753_v3  ;;  %v4771_v32 = vcombine.high %v4737_v53, %v4753_v3 }
 0xf7c   :  { %v4830_v19 = vrot.slane %v4822_v33, %v9563_v2  ;;  %v4846_v18 = vrot.slane %v4838_v0, %v9563_v2  ;;  %v4837_v60 = vrot.slane %v4823_v7, %v9563_v2  ;;  %v4853_v45 = vrot.slane %v4839_v55, %v9563_v2 }
 0xf7d   :  { %v4762_v11 = vrot.slane %v4754_v49, %v9563_v2  ;;  %v4769_v1 = vrot.slane %v4755_v17, %v9563_v2  ;;  %v4778_v4 = vrot.slane %v4770_v56, %v9563_v2  ;;  %v4785_v15 = vrot.slane %v4771_v32, %v9563_v2 }
 0xf7e   :  { %v4935_v51 = vpop.permute.xlu1 %4934  ;;  %v4854_v27 = vcombine.low %v4830_v19, %v4846_v18  ;;  %v4855_v57 = vcombine.high %v4830_v19, %v4846_v18  ;;  %v4618_v61 = vrot.slane %v4610_v12, %v9563_v2  ;;  %v4856_v56 = vcombine.low %v4837_v60, %v4853_v45 }
 0xf7f   :  { %v4950_v21 = vcombine.low %v4927_v23, %v4935_v51  ;;  %v4858_v14 = vcombine.low %v4762_v11, %v4769_v1  ;;  %v8509_v43 = vcombine.high %v4762_v11, %v4769_v1  ;;  %v4874_v47 = vcombine.low %v4778_v4, %v4785_v15 }
 0xf80   :  { %v8510_v30 = vcombine.high %v4778_v4, %v4785_v15  ;;  %v4951_v31 = vcombine.high %v4927_v23, %v4935_v51  ;;  %8851 = vmatpush3.xpose.msk.msra.mxu1 %vm1094_vm2, %v4854_v27  ;;  %8856 = vmatpush3.xpose.msk.msra.mxu0 %vm1094_vm2, %v4855_v57  ;;  %v4857_v32 = vcombine.high %v4837_v60, %v4853_v45 }
 0xf81   :  { %v4958_v53 = vrot.slane %v4950_v21, %v9551_v58  ;;  %v4865_v3 = vrot.slane %v4858_v14, %v9551_v58  ;;  %v4873_v33 = vrot.slane %v8509_v43, %v9551_v58  ;;  %v4881_v7 = vrot.slane %v4874_v47, %v9551_v58  ;;  %8860 = vmatprep.subr.mxu1 %v9426_v50 }
 0xf82   :  { %v4889_v0 = vrot.slane %v8510_v30, %v9551_v58  ;;  %v4939_v55 = vpop.permute.xlu1 %4938  ;;  %8865 = vmatprep.subr.mxu0 %v9426_v50  ;;  %v4965_v1 = vrot.slane %v4951_v31, %v9551_v58  ;;  %v4609_v47 = vrot.slane %v4595_v46, %v9563_v2  ;;  %v4627_v20 = vcombine.high %v10243_v10, %v4618_v61 }
 0xf83   :  { %v4966_v49 = vcombine.low %v4931_v40, %v4939_v55  ;;  %v4967_v17 = vcombine.high %v4931_v40, %v4939_v55  ;;  %v4890_v19 = vcombine.low %v4865_v3, %v4873_v33  ;;  %v4891_v18 = vcombine.high %v4865_v3, %v4873_v33  ;;  %8853 = vmatmul.mubr.msk.f32.vlgmr.msra.gmra.mxu1 %vm1094_vm2, %v4558_v16 }
 0xf84   :  { %v4906_v12 = vcombine.low %v4881_v7, %v4889_v0  ;;  %v4907_v11 = vcombine.high %v4881_v7, %v4889_v0  ;;  %8858 = vmatmul.mubr.msk.f32.vlgmr.msra.gmra.mxu0 %vm1094_vm2, %v4559_v36  ;;  %8861 = vmatpush3.xpose.msk.msra.mxu1 %vm1094_vm2, %v4856_v56 }
 0xf85   :  { %v4974_v4 = vrot.slane %v4966_v49, %v9551_v58  ;;  %v4981_v15 = vrot.slane %v4967_v17, %v9551_v58  ;;  %8866 = vmatpush3.xpose.msk.msra.mxu0 %vm1094_vm2, %v4857_v32  ;;  %8862 = vmatprep.mubr.msk.f32.mxu1 %vm9427_vm1, %v9426_v50  ;;  %v4898_v16 = vrot.slane %v4890_v19, %v9563_v2 }
 0xf86   :  { %v4914_v40 = vrot.slane %v4906_v12, %v9563_v2  ;;  %v4905_v60 = vrot.slane %v4891_v18, %v9563_v2  ;;  %8867 = vmatprep.mubr.msk.f32.mxu0 %vm9427_vm1, %v9426_v50  ;;  %8870 = vmatprep.subr.mxu1 %v9426_v50  ;;  %v4921_v36 = vrot.slane %v4907_v11, %v9563_v2 }
 0xf87   :  { %v4982_v23 = vcombine.low %v4958_v53, %v4974_v4  ;;  %v4983_v51 = vcombine.high %v4958_v53, %v4974_v4  ;;  %v4998_v21 = vcombine.low %v4965_v1, %v4981_v15  ;;  %v4999_v27 = vcombine.high %v4965_v1, %v4981_v15  ;;  %8863 = vmatmul.mubr.msk.f32.vlgmr.msra.gmra.mxu1 %vm1094_vm2, %v4560_v37 }
 0xf88   :  { %v4922_v62 = vcombine.low %v4898_v16, %v4914_v40  ;;  %v4923_v63 = vcombine.high %v4898_v16, %v4914_v40  ;;  %8868 = vmatmul.mubr.msk.f32.vlgmr.msra.gmra.mxu0 %vm1094_vm2, %v4561_v38  ;;  %8875 = vmatprep.subr.mxu0 %v9426_v50  ;;  %v4626_v37 = vcombine.low %v10243_v10, %v4618_v61 }
 0xf89   :  { %v4990_v57 = vrot.slane %v4982_v23, %v9563_v2  ;;  %v4997_v45 = vrot.slane %v4983_v51, %v9563_v2  ;;  %v5006_v14 = vrot.slane %v4998_v21, %v9563_v2  ;;  %v5013_v43 = vrot.slane %v4999_v27, %v9563_v2  ;;  %8872 = vmatprep.mubr.msk.f32.mxu1 %vm9427_vm1, %v9426_v50 }
 0xf8a   :  { %8871 = vmatpush3.xpose.msk.msra.mxu1 %vm1094_vm2, %v4922_v62  ;;  %8876 = vmatpush3.xpose.msk.msra.mxu0 %vm1094_vm2, %v4923_v63  ;;  %v4924_v13 = vcombine.low %v4905_v60, %v4921_v36  ;;  %v4625_v38 = vrot.slane %v4611_v22, %v9563_v2  ;;  %v4925_v10 = vcombine.high %v4905_v60, %v4921_v36 }
 0xf8b   :  { %v5086_v30 = vcombine.low %v4990_v57, %v4997_v45  ;;  %v8511_v31 = vcombine.high %v4990_v57, %v4997_v45  ;;  %v5102_v53 = vcombine.low %v5006_v14, %v5013_v43  ;;  %v8512_v3 = vcombine.high %v5006_v14, %v5013_v43  ;;  %8877 = vmatprep.mubr.msk.f32.mxu0 %vm9427_vm1, %v9426_v50 }
 0xf8c   :  { %8880 = vmatprep.subr.mxu1 %v9426_v50  ;;  %8885 = vmatprep.subr.mxu0 %v9426_v50  ;;  %v4628_v61 = vcombine.low %v4609_v47, %v4625_v38  ;;  %v4629_v7 = vcombine.high %v4609_v47, %v4625_v38 }
 0xf8d   :  { %v5093_v48 = vrot.slane %v5086_v30, %v9551_v58  ;;  %v5101_v34 = vrot.slane %v8511_v31, %v9551_v58  ;;  %v5109_v46 = vrot.slane %v5102_v53, %v9551_v58  ;;  %v5117_v33 = vrot.slane %v8512_v3, %v9551_v58  ;;  %8873 = vmatmul.mubr.msk.f32.vlgmr.msra.gmra.mxu1 %vm1094_vm2, %v4626_v37 }
 0xf8e   :  { %8878 = vmatmul.mubr.msk.f32.vlgmr.msra.gmra.mxu0 %vm1094_vm2, %v4627_v20  ;;  %8881 = vmatpush3.xpose.msk.msra.mxu1 %vm1094_vm2, %v4924_v13 }
 0xf8f   :  { %v5118_v29 = vcombine.low %v5093_v48, %v5101_v34  ;;  %v5134_v5 = vcombine.low %v5109_v46, %v5117_v33  ;;  %v5119_v22 = vcombine.high %v5093_v48, %v5101_v34  ;;  %8886 = vmatpush3.xpose.msk.msra.mxu0 %vm1094_vm2, %v4925_v10  ;;  %8882 = vmatprep.mubr.msk.f32.mxu1 %vm9427_vm1, %v9426_v50 }
 0xf90   :  { %v5135_v0 = vcombine.high %v5109_v46, %v5117_v33  ;;  %8887 = vmatprep.mubr.msk.f32.mxu0 %vm9427_vm1, %v9426_v50  ;;  %8890 = vmatprep.subr.mxu1 %v9426_v50 }
 0xf91   :  { %v5126_v55 = vrot.slane %v5118_v29, %v9563_v2  ;;  %v5142_v49 = vrot.slane %v5134_v5, %v9563_v2  ;;  %v10329_v17 = vrot.slane %v5119_v22, %v9563_v2  ;;  %8883 = vmatmul.mubr.msk.f32.vlgmr.msra.gmra.mxu1 %vm1094_vm2, %v4628_v61  ;;  %8895 = vmatprep.subr.mxu0 %v9426_v50 }
 0xf92   :  { %v10334_v56 = vrot.slane %v5135_v0, %v9563_v2  ;;  %8888 = vmatmul.mubr.msk.f32.vlgmr.msra.gmra.mxu0 %vm1094_vm2, %v4629_v7  ;;  %8892 = vmatprep.mubr.msk.f32.mxu1 %vm9427_vm1, %v9426_v50 }
 0xf93   :  { %v5150_v32 = vcombine.low %v5126_v55, %v5142_v49  ;;  %v5151_v19 = vcombine.high %v5126_v55, %v5142_v49  ;;  %8897 = vmatprep.mubr.msk.f32.mxu0 %vm9427_vm1, %v9426_v50 }
 0xf94   :  { %v5152_v18 = vcombine.low %v10329_v17, %v10334_v56  ;;  %v5153_v12 = vcombine.high %v10329_v17, %v10334_v56 }
 0xf95   :  { %8891 = vmatpush3.msra.mxu1 %v5150_v32  ;;  %8896 = vmatpush3.msra.mxu0 %v5151_v19 }
 0xf96   :  { %8900 = vmatprep.subr.mxu1 %v9426_v50  ;;  %8905 = vmatprep.subr.mxu0 %v9426_v50 }
0x1043   :  { %v5294_v11 = vpop.f32.mrf.mxu1 }
0x1044   :  { %v5370_v1 = vpop.f32.mrf.mxu0  ;;  %v5830_v4 = vsel %vm1094_vm2, %v5294_v11, -inf }
0x1045   :  { %v5833_v15 = vsel %vm1094_vm2, %v5370_v1, -inf  ;;  %5831 = vmax.xlane.f32.xlu0 %v5830_v4  ;;  %v8854_v16 = vpop.f32.mrf.mxu1 }
0x1046   :  { %5834 = vmax.xlane.f32.xlu1 %v5833_v15  ;;  %v8859_v40 = vpop.f32.mrf.mxu0 }
0x1047   :  { %v5446_v60 = vpop.f32.mrf.mxu1 }
0x1048   :  { %v5522_v23 = vpop.f32.mrf.mxu0  ;;  %v5836_v51 = vsel %vm1094_vm2, %v5446_v60, -inf }
0x1049   :  { %5837 = vmax.xlane.f32.xlu0 %v5836_v51  ;;  %v8864_v21 = vpop.f32.mrf.mxu1  ;;  %v5839_v63 = vsel %vm1094_vm2, %v5522_v23, -inf }
0x104a   :  { %v8869_v27 = vpop.f32.mrf.mxu0 }
0x104d   :  { %v5598_v62 = vpop.f32.mrf.mxu1  ;;  %5840 = vmax.xlane.f32.xlu0 %v5839_v63 }
0x104e   :  { %v5674_v36 = vpop.f32.mrf.mxu0  ;;  %v5842_v43 = vsel %vm1094_vm2, %v5598_v62, -inf }
0x104f   :  { %v5845_v57 = vsel %vm1094_vm2, %v5674_v36, -inf  ;;  %v8874_v45 = vpop.f32.mrf.mxu1 }
0x1050   :  { %5846 = vmax.xlane.f32.xlu1 %v5845_v57  ;;  %v8879_v14 = vpop.f32.mrf.mxu0 }
0x1051   :  { %v5750_v37 = vpop.f32.mrf.mxu1  ;;  %5843 = vmax.xlane.f32.xlu0 %v5842_v43 }
0x1052   :  { %v5826_v47 = vpop.f32.mrf.mxu0  ;;  %v5848_v3 = vsel %vm1094_vm2, %v5750_v37, -inf }
0x1053   :  { %v5851_v30 = vsel %vm1094_vm2, %v5826_v47, -inf  ;;  %v8884_v31 = vpop.f32.mrf.mxu1 }
0x1054   :  { %5852 = vmax.xlane.f32.xlu1 %v5851_v30  ;;  %v8889_v53 = vpop.f32.mrf.mxu0 }
0x1055   :  { %5849 = vmax.xlane.f32.xlu0 %v5848_v3 }
0x1065   :  { %4932 = vrot.lane.b32.xlu1 %v10145_v35, %s9421_s10 }
0x106b   :  { %4928 = vrot.lane.b32.xlu0 %v10124_v52, %s9421_s10 }
0x10ce   :  { %v5832_v20 = vpop.xlane.xlu0 %5831 }
0x10cf   :  { %v5835_v13 = vpop.xlane.xlu1 %5834  ;;  %v5854_v38 = vsub.f32 %v5294_v11, %v5832_v20 }
0x10d0   :  { %v5855_v48 = vsub.f32 %v5370_v1, %v5835_v13 }
0x10d1   :  { %v5862_v34 = vmul.f32 1.442695, %v5854_v38 }
0x10d2   :  { %v5864_v46 = vmul.f32 1.442695, %v5855_v48  ;;  %v5838_v33 = vpop.xlane.xlu0 %5837 }
0x10d3   :  { %9134 = vpow2.f32 %v5862_v34  ;;  %v5856_v10 = vsub.f32 %v5446_v60, %v5838_v33 }
0x10d4   :  { %9136 = vpow2.f32 %v5864_v46 }
0x10d5   :  { %v5866_v29 = vmul.f32 1.442695, %v5856_v10 }
0x10d6   :  { %v5841_v5 = vpop.xlane.xlu0 %5840 }
0x10d7   :  { %9138 = vpow2.f32 %v5866_v29  ;;  %v5857_v22 = vsub.f32 %v5522_v23, %v5841_v5 }
0x10d9   :  { %v5847_v61 = vpop.xlane.xlu1 %5846  ;;  %v5868_v35 = vmul.f32 1.442695, %v5857_v22 }
0x10da   :  { %v5859_v7 = vsub.f32 %v5674_v36, %v5847_v61  ;;  %v5844_v0 = vpop.xlane.xlu0 %5843 }
0x10db   :  { %9140 = vpow2.f32 %v5868_v35  ;;  %v5858_v52 = vsub.f32 %v5598_v62, %v5844_v0 }
0x10dc   :  { %v5872_v55 = vmul.f32 1.442695, %v5859_v7 }
0x10dd   :  { %v5853_v49 = vpop.xlane.xlu1 %5852  ;;  %v5870_v32 = vmul.f32 1.442695, %v5858_v52 }
0x10de   :  { %9142 = vpow2.f32 %v5872_v55  ;;  %v5861_v19 = vsub.f32 %v5826_v47, %v5853_v49  ;;  %v5850_v11 = vpop.xlane.xlu0 %5849 }
0x10df   :  { %9144 = vpow2.f32 %v5870_v32  ;;  %v5860_v1 = vsub.f32 %v5750_v37, %v5850_v11 }
0x10e0   :  { %v9135_v4 = vpop.eup %9134  ;;  %v5876_v15 = vmul.f32 1.442695, %v5861_v19 }
0x10e1   :  { %v9137_v16 = vpop.eup %9136  ;;  %v5874_v40 = vmul.f32 1.442695, %v5860_v1  ;;  %v5878_v60 = vsel %vm1094_vm2, %v9135_v4, 0.0  ;;  %v4933_v31 = vpop.permute.xlu1 %4932 }
0x10e2   :  { %9146 = vpow2.f32 %v5876_v15  ;;  %v5881_v23 = vsel %vm1094_vm2, %v9137_v16, 0.0  ;;  %5879 = vadd.xlane.f32.xlu0 %v5878_v60  ;;  %v4929_v30 = vpop.permute.xlu0 %4928 }
0x10e3   :  { %9148 = vpow2.f32 %v5874_v40  ;;  %5882 = vadd.xlane.f32.xlu1 %v5881_v23 }
0x10e4   :  { %v9139_v51 = vpop.eup %9138 }
0x10e5   :  { %v5884_v21 = vsel %vm1094_vm2, %v9139_v51, 0.0 }
0x10e6   :  { %5885 = vadd.xlane.f32.xlu0 %v5884_v21 }
0x10e8   :  { %v9141_v27 = vpop.eup %9140 }
0x10e9   :  { %v5887_v62 = vsel %vm1094_vm2, %v9141_v27, 0.0 }
0x10ea   :  { %5888 = vadd.xlane.f32.xlu1 %v5887_v62 }
0x10eb   :  { %v10363_v63 = vpop.eup %9142 }
0x10ec   :  { %v10365_v36 = vpop.eup %9144  ;;  %v5893_v57 = vsel %vm1094_vm2, %v10363_v63, 0.0 }
0x10ed   :  { %v5890_v45 = vsel %vm1094_vm2, %v10365_v36, 0.0 }
0x10ee   :  { %5894 = vadd.xlane.f32.xlu1 %v5893_v57  ;;  %5891 = vadd.xlane.f32.xlu0 %v5890_v45 }
0x10ef   :  { %v10371_v14 = vpop.eup %9146 }
0x10f0   :  { %v10373_v43 = vpop.eup %9148  ;;  %v5899_v37 = vsel %vm1094_vm2, %v10371_v14, 0.0 }
0x10f1   :  { %v5896_v47 = vsel %vm1094_vm2, %v10373_v43, 0.0 }
0x10f2   :  { %5900 = vadd.xlane.f32.xlu1 %v5899_v37  ;;  %5897 = vadd.xlane.f32.xlu0 %v5896_v47 }
0x1103   :  { %4940 = vrot.lane.b32.xlu1 %v10155_v8, %s9421_s10 }
0x1108   :  { %4936 = vrot.lane.b32.xlu0 %v10143_v59, %s9421_s10 }
0x116b   :  { %v5880_v53 = vpop.xlane.xlu0 %5879 }
0x116c   :  { %v5883_v3 = vpop.xlane.xlu1 %5882  ;;  %9150 = vrcp.f32 %v5880_v53 }
0x116d   :  { %9152 = vrcp.f32 %v5883_v3 }
0x116f   :  { %v5886_v20 = vpop.xlane.xlu0 %5885 }
0x1170   :  { %9154 = vrcp.f32 %v5886_v20 }
0x1173   :  { %v5889_v13 = vpop.xlane.xlu1 %5888 }
0x1174   :  { %9156 = vrcp.f32 %v5889_v13 }
0x1177   :  { %v5895_v38 = vpop.xlane.xlu1 %5894  ;;  %v5892_v48 = vpop.xlane.xlu0 %5891 }
0x1178   :  { %9158 = vrcp.f32 %v5895_v38 }
0x1179   :  { %v9151_v34 = vpop.eup %9150  ;;  %9160 = vrcp.f32 %v5892_v48 }
0x117a   :  { %v9153_v46 = vpop.eup %9152  ;;  %v5910_v33 = vmul.f32 %v9151_v34, %v9135_v4 }
0x117b   :  { %v5901_v10 = vpop.xlane.xlu1 %5900  ;;  %v5898_v8 = vpop.xlane.xlu0 %5897  ;;  %v5911_v29 = vmul.f32 %v9153_v46, %v9137_v16 }
0x117c   :  { %8893 = vmatmul.mubr.msk.f32.vlgmr.msra.gmra.mxu1 %vm1094_vm2, %v5910_v33  ;;  %9162 = vrcp.f32 %v5901_v10 }
0x117d   :  { %v9155_v59 = vpop.eup %9154  ;;  %8898 = vmatmul.mubr.msk.f32.vlgmr.msra.gmra.mxu0 %vm1094_vm2, %v5911_v29  ;;  %8901 = vmatpush3.msra.mxu1 %v5152_v18  ;;  %9164 = vrcp.f32 %v5898_v8 }
0x117e   :  { %8906 = vmatpush3.msra.mxu0 %v5153_v12  ;;  %8902 = vmatprep.mubr.msk.f32.mxu1 %vm9427_vm1, %v9426_v50  ;;  %v5912_v5 = vmul.f32 %v9155_v59, %v9139_v51 }
0x117f   :  { %v4941_v22 = vpop.permute.xlu1 %4940  ;;  %v4937_v61 = vpop.permute.xlu0 %4936  ;;  %8907 = vmatprep.mubr.msk.f32.mxu0 %vm9427_vm1, %v9426_v50  ;;  %8910 = vmatprep.subr.mxu1 %v9426_v50 }
0x1180   :  { %v5034_v7 = vcombine.low %v4933_v31, %v4941_v22  ;;  %v5035_v35 = vcombine.high %v4933_v31, %v4941_v22  ;;  %v5018_v0 = vcombine.low %v4929_v30, %v4937_v61  ;;  %v5019_v18 = vcombine.high %v4929_v30, %v4937_v61  ;;  %8903 = vmatmul.mubr.msk.f32.vlgmr.msra.gmra.mxu1 %vm1094_vm2, %v5912_v5 }
0x1181   :  { %v9157_v17 = vpop.eup %9156  ;;  %8915 = vmatprep.subr.mxu0 %v9426_v50  ;;  %8912 = vmatprep.mubr.msk.f32.mxu1 %vm9427_vm1, %v9426_v50 }
0x1182   :  { %v5042_v56 = vrot.slane %v5034_v7, %v9551_v58  ;;  %v5049_v12 = vrot.slane %v5035_v35, %v9551_v58  ;;  %v5026_v55 = vrot.slane %v5018_v0, %v9551_v58  ;;  %v5033_v52 = vrot.slane %v5019_v18, %v9551_v58 }
0x1183   :  { %v5913_v49 = vmul.f32 %v9157_v17, %v9141_v27 }
0x1184   :  { %v5050_v32 = vcombine.low %v5026_v55, %v5042_v56  ;;  %v5051_v19 = vcombine.high %v5026_v55, %v5042_v56  ;;  %v5066_v11 = vcombine.low %v5033_v52, %v5049_v12  ;;  %v5067_v1 = vcombine.high %v5033_v52, %v5049_v12 }
0x1185   :  { %8908 = vmatmul.mubr.msk.f32.vlgmr.msra.gmra.mxu0 %vm1094_vm2, %v5913_v49  ;;  %v9159_v37 = vpop.eup %9158 }
0x1186   :  { %v5058_v4 = vrot.slane %v5050_v32, %v9563_v2  ;;  %v5065_v15 = vrot.slane %v5051_v19, %v9563_v2  ;;  %v5074_v16 = vrot.slane %v5066_v11, %v9563_v2  ;;  %v5081_v40 = vrot.slane %v5067_v1, %v9563_v2  ;;  %8917 = vmatprep.mubr.msk.f32.mxu0 %vm9427_vm1, %v9426_v50  ;;  %v9161_v3 = vpop.eup %9160 }
0x1187   :  { %v5914_v10 = vmul.f32 %v9161_v3, %v10365_v36  ;;  %v5915_v8 = vmul.f32 %v9159_v37, %v10363_v63 }
0x1188   :  { %v5154_v60 = vcombine.low %v5058_v4, %v5065_v15  ;;  %v8513_v23 = vcombine.high %v5058_v4, %v5065_v15  ;;  %v5170_v51 = vcombine.low %v5074_v16, %v5081_v40  ;;  %v8514_v21 = vcombine.high %v5074_v16, %v5081_v40 }
0x1189   :  { %v9163_v34 = vpop.eup %9162 }
0x118a   :  { %v5161_v27 = vrot.slane %v5154_v60, %v9551_v58  ;;  %v5169_v62 = vrot.slane %v8513_v23, %v9551_v58  ;;  %v5177_v57 = vrot.slane %v5170_v51, %v9551_v58  ;;  %v5185_v45 = vrot.slane %v8514_v21, %v9551_v58  ;;  %v9165_v29 = vpop.eup %9164 }
0x118b   :  { %v5916_v22 = vmul.f32 %v9165_v29, %v10373_v43  ;;  %v5917_v36 = vmul.f32 %v9163_v34, %v10371_v14 }
0x118c   :  { %v5186_v47 = vcombine.low %v5161_v27, %v5169_v62  ;;  %v5202_v30 = vcombine.low %v5177_v57, %v5185_v45  ;;  %v5187_v31 = vcombine.high %v5161_v27, %v5169_v62  ;;  %v5203_v53 = vcombine.high %v5177_v57, %v5185_v45 }
0x118e   :  { %v5194_v20 = vrot.slane %v5186_v47, %v9563_v2  ;;  %v5210_v13 = vrot.slane %v5202_v30, %v9563_v2  ;;  %v5201_v38 = vrot.slane %v5187_v31, %v9563_v2  ;;  %v5217_v48 = vrot.slane %v5203_v53, %v9563_v2 }
0x1190   :  { %v5218_v46 = vcombine.low %v5194_v20, %v5210_v13  ;;  %v5219_v33 = vcombine.high %v5194_v20, %v5210_v13  ;;  %v5220_v59 = vcombine.low %v5201_v38, %v5217_v48  ;;  %v5221_v5 = vcombine.high %v5201_v38, %v5217_v48 }
0x1192   :  { %8911 = vmatpush3.msra.mxu1 %v5218_v46  ;;  %8916 = vmatpush3.msra.mxu0 %v5219_v33 }
0x1193   :  { %8913 = vmatmul.mubr.msk.f32.vlgmr.msra.gmra.mxu1 %vm1094_vm2, %v5914_v10  ;;  %8918 = vmatmul.mubr.msk.f32.vlgmr.msra.gmra.mxu0 %vm1094_vm2, %v5915_v8 }
0x1194   :  { %8920 = vmatprep.subr.mxu1 %v9426_v50  ;;  %8925 = vmatprep.subr.mxu0 %v9426_v50 }
0x1195   :  { %8921 = vmatpush3.msra.mxu1 %v5220_v59  ;;  %8926 = vmatpush3.msra.mxu0 %v5221_v5 }
0x1196   :  { %8922 = vmatprep.mubr.msk.f32.mxu1 %vm9427_vm1, %v9426_v50  ;;  %8927 = vmatprep.mubr.msk.f32.mxu0 %vm9427_vm1, %v9426_v50 }
0x1197   :  { %8923 = vmatmul.mubr.msk.f32.vlgmr.msra.gmra.mxu1 %vm1094_vm2, %v5916_v22  ;;  %8928 = vmatmul.mubr.msk.f32.vlgmr.msra.gmra.mxu0 %vm1094_vm2, %v5917_v36 }
0x1198   :  { %7037 = vmatprep.mubr.bf16.mxu0 %v9431_v42 }
0x123c   :  { %v5987_v63 = vpop.f32.mrf.mxu1 }
0x123d   :  { %v6060_v61 = vpop.f32.mrf.mxu0 }
0x123e   :  { %v8894_v7 = vpop.f32.mrf.mxu1 }
0x123f   :  { %v8899_v35 = vpop.f32.mrf.mxu0 }
0x1240   :  { %v6133_v0 = vpop.f32.mrf.mxu1 }
0x1241   :  { %v6502_v18 = vcombine.low %v5987_v63, %v6133_v0  ;;  %v6503_v14 = vcombine.high %v5987_v63, %v6133_v0 }
0x1242   :  { %v8904_v43 = vpop.f32.mrf.mxu1 }
0x1243   :  { %v6510_v50 = vrot.slane %v6502_v18, %v9551_v58  ;;  %v6517_v52 = vrot.slane %v6503_v14, %v9551_v58 }
0x1245   :  { %v6206_v17 = vpop.f32.mrf.mxu0 }
0x1246   :  { %v6518_v56 = vcombine.low %v6060_v61, %v6206_v17  ;;  %v6519_v12 = vcombine.high %v6060_v61, %v6206_v17 }
0x1247   :  { %v8909_v55 = vpop.f32.mrf.mxu0 }
0x1248   :  { %v6526_v49 = vrot.slane %v6518_v56, %v9551_v58  ;;  %v6533_v32 = vrot.slane %v6519_v12, %v9551_v58 }
0x124a   :  { %v6534_v19 = vcombine.low %v6510_v50, %v6526_v49  ;;  %v6535_v11 = vcombine.high %v6510_v50, %v6526_v49  ;;  %v6550_v1 = vcombine.low %v6517_v52, %v6533_v32  ;;  %v6551_v4 = vcombine.high %v6517_v52, %v6533_v32  ;;  %v4213_v52 = vld [vmem:[#allocation5 + $0x80] sm:$0xff] }
0x124b   :  { %8930 = vmatprep.subr.mxu1 %v4213_v52 }
0x124c   :  { %v6542_v15 = vrot.slane %v6534_v19, %v9563_v2  ;;  %v6549_v16 = vrot.slane %v6535_v11, %v9563_v2  ;;  %v6558_v40 = vrot.slane %v6550_v1, %v9563_v2  ;;  %v6565_v60 = vrot.slane %v6551_v4, %v9563_v2  ;;  %v4212_v1 = vld [vmem:[#allocation5 + $0x78] sm:$0xff]  ;;  %8931 = vmatpush3.msra.mxu1 %v4213_v52 }
0x124d   :  { %8932 = vmatprep.subr.mxu1 %v4212_v1 }
0x124e   :  { %v6638_v23 = vcombine.low %v6542_v15, %v6549_v16  ;;  %v8539_v51 = vcombine.high %v6542_v15, %v6549_v16  ;;  %v6654_v21 = vcombine.low %v6558_v40, %v6565_v60  ;;  %v8540_v27 = vcombine.high %v6558_v40, %v6565_v60  ;;  %v4211_v60 = vld [vmem:[#allocation5 + $0x70] sm:$0xff]  ;;  %8933 = vmatpush3.msra.mxu1 %v4212_v1 }
0x124f   :  { %8934 = vmatprep.subr.mxu1 %v4211_v60  ;;  %v6935_v1 = vld [vmem:[#allocation8 + $0x280] sm:$0xff] }
0x1250   :  { %v6645_v62 = vrot.slane %v6638_v23, %v9551_v58  ;;  %v6653_v57 = vrot.slane %v8539_v51, %v9551_v58  ;;  %v6661_v45 = vrot.slane %v6654_v21, %v9551_v58  ;;  %v6669_v37 = vrot.slane %v8540_v27, %v9551_v58  ;;  %8935 = vmatpush3.msra.mxu1 %v4211_v60 }
0x1252   :  { %v6670_v47 = vcombine.low %v6645_v62, %v6653_v57  ;;  %v6686_v30 = vcombine.low %v6661_v45, %v6669_v37  ;;  %v6671_v31 = vcombine.high %v6645_v62, %v6653_v57  ;;  %v6687_v53 = vcombine.high %v6661_v45, %v6669_v37  ;;  %v4210_v62 = vld [vmem:[#allocation5 + $0x68] sm:$0xff] }
0x1253   :  { %v6279_v3 = vpop.f32.mrf.mxu1  ;;  %v6352_v20 = vpop.f32.mrf.mxu0  ;;  %8936 = vmatprep.subr.mxu1 %v4210_v62 }
0x1254   :  { %v10447_v13 = vrot.slane %v6670_v47, %v9563_v2  ;;  %v10450_v38 = vrot.slane %v6686_v30, %v9563_v2  ;;  %v6685_v46 = vrot.slane %v6671_v31, %v9563_v2  ;;  %v6701_v33 = vrot.slane %v6687_v53, %v9563_v2  ;;  %8937 = vmatpush3.msra.mxu1 %v4210_v62  ;;  %v6932_v62 = vld [vmem:[#allocation8 + $0x208] sm:$0xff] }
0x1255   :  { %v8914_v48 = vpop.f32.mrf.mxu1  ;;  %v8919_v34 = vpop.f32.mrf.mxu0 }
0x1256   :  { %v6703_v10 = vcombine.high %v10447_v13, %v10450_v38  ;;  %v6702_v8 = vcombine.low %v10447_v13, %v10450_v38  ;;  %v6704_v35 = vcombine.low %v6685_v46, %v6701_v33  ;;  %v6705_v50 = vcombine.high %v6685_v46, %v6701_v33  ;;  %v10492_v13 = vld [vmem:[#allocation5 + $0x88] sm:$0xff] }
0x1257   :  { %v6425_v29 = vpop.f32.mrf.mxu1  ;;  %v6498_v59 = vpop.f32.mrf.mxu0  ;;  %v6807_v38 = vrot.slane %v10492_v13, %v9890_v44 }
0x1258   :  { %6776 = vrot.lane.b32.xlu0 %v6703_v10, %s9415_s21  ;;  %v6570_v5 = vcombine.low %v6279_v3, %v6425_v29  ;;  %v6571_v22 = vcombine.high %v6279_v3, %v6425_v29  ;;  %v6586_v36 = vcombine.low %v6352_v20, %v6498_v59  ;;  %v6587_v63 = vcombine.high %v6352_v20, %v6498_v59 }
0x1259   :  { %v8924_v61 = vpop.f32.mrf.mxu1  ;;  %v8929_v7 = vpop.f32.mrf.mxu0 }
0x125a   :  { %v6578_v0 = vrot.slane %v6570_v5, %v9551_v58  ;;  %v6585_v43 = vrot.slane %v6571_v22, %v9551_v58  ;;  %v6594_v18 = vrot.slane %v6586_v36, %v9551_v58  ;;  %v6601_v14 = vrot.slane %v6587_v63, %v9551_v58 }
0x125c   :  { %v6602_v17 = vcombine.low %v6578_v0, %v6594_v18  ;;  %v6603_v56 = vcombine.high %v6578_v0, %v6594_v18  ;;  %v6618_v12 = vcombine.low %v6585_v43, %v6601_v14  ;;  %v6619_v55 = vcombine.high %v6585_v43, %v6601_v14  ;;  %6784 = vrot.lane.b32.xlu0 %v6704_v35, %s9418_s30 }
0x125e   :  { %v6610_v49 = vrot.slane %v6602_v17, %v9563_v2  ;;  %v6617_v32 = vrot.slane %v6603_v56, %v9563_v2  ;;  %v6626_v19 = vrot.slane %v6618_v12, %v9563_v2  ;;  %v6633_v11 = vrot.slane %v6619_v55, %v9563_v2 }
0x1260   :  { %6792 = vrot.lane.b32.xlu0 %v6705_v50, %s9430_s15  ;;  %v6706_v4 = vcombine.low %v6610_v49, %v6617_v32  ;;  %v8541_v15 = vcombine.high %v6610_v49, %v6617_v32  ;;  %v6722_v16 = vcombine.low %v6626_v19, %v6633_v11  ;;  %v8542_v40 = vcombine.high %v6626_v19, %v6633_v11 }
0x1262   :  { %v6713_v23 = vrot.slane %v6706_v4, %v9551_v58  ;;  %v6721_v51 = vrot.slane %v8541_v15, %v9551_v58  ;;  %v6729_v21 = vrot.slane %v6722_v16, %v9551_v58  ;;  %v6737_v27 = vrot.slane %v8542_v40, %v9551_v58  ;;  %v6937_v4 = vld [vmem:[#allocation8 + $0x2c0] sm:$0xff]  ;;  %v6936_v15 = vld [vmem:[#allocation8 + $0x288] sm:$0xff] }
0x1263   :  { %v8550_v16 = vcombine.high %v6935_v1, %v6937_v4  ;;  %v6938_v40 = vld [vmem:[#allocation8 + $0x2c8] sm:$0xff]  ;;  %v8549_v60 = vcombine.low %v6935_v1, %v6937_v4 }
0x1264   :  { %v6738_v57 = vcombine.low %v6713_v23, %v6721_v51  ;;  %v6754_v45 = vcombine.low %v6729_v21, %v6737_v27  ;;  %v6739_v37 = vcombine.high %v6713_v23, %v6721_v51  ;;  %v6755_v47 = vcombine.high %v6729_v21, %v6737_v27  ;;  %v6931_v21 = vld [vmem:[#allocation8 + $0x200] sm:$0xff] }
0x1265   :  { %v8551_v23 = vcombine.low %v6936_v15, %v6938_v40  ;;  %v8552_v51 = vcombine.high %v6936_v15, %v6938_v40  ;;  %7017 = vmatprep.subr.bf16.mxu0 %v8550_v16  ;;  %v6933_v27 = vld [vmem:[#allocation8 + $0x240] sm:$0xff]  ;;  %v7372_v15 = vld [vmem:[#allocation8 + $0x310] sm:$0xff]  ;;  %v7373_v40 = vld [vmem:[#allocation8 + $0x318] sm:$0xff] }
0x1266   :  { %v6746_v30 = vrot.slane %v6738_v57, %v9563_v2  ;;  %v6762_v31 = vrot.slane %v6754_v45, %v9563_v2  ;;  %v6753_v20 = vrot.slane %v6739_v37, %v9563_v2  ;;  %v6769_v58 = vrot.slane %v6755_v47, %v9563_v2  ;;  %7018 = vmatpush1.bf16.msra.mxu0 %v8549_v60  ;;  %v6934_v37 = vld [vmem:[#allocation8 + $0x248] sm:$0xff]  ;;  %v7374_v16 = vld [vmem:[#allocation8 + $0x350] sm:$0xff] }
0x1267   :  { %7060 = vmatprep.subr.bf16.mxu1 %v8552_v51  ;;  %v8545_v57 = vcombine.low %v6931_v21, %v6933_v27  ;;  %v8546_v45 = vcombine.high %v6931_v21, %v6933_v27  ;;  %v8547_v47 = vcombine.low %v6932_v62, %v6934_v37  ;;  %v8582_v60 = vcombine.high %v7372_v15, %v7374_v16 }
0x1268   :  { %v6771_v53 = vcombine.high %v6746_v30, %v6762_v31  ;;  %v6770_v3 = vcombine.low %v6746_v30, %v6762_v31  ;;  %v6772_v48 = vcombine.low %v6753_v20, %v6769_v58  ;;  %v6773_v34 = vcombine.high %v6753_v20, %v6769_v58  ;;  %v7164_v31 = vld [vmem:[#allocation8 + $0x290] sm:$0xff] }
0x1269   :  { %v8548_v30 = vcombine.high %v6932_v62, %v6934_v37  ;;  %7019 = vmatprep.subr.bf16.mxu0 %v8546_v45  ;;  %v8581_v51 = vcombine.low %v7372_v15, %v7374_v16  ;;  %v10528_v62 = vld [vmem:[#allocation8 + $0x380] sm:$0xff]  ;;  %v10532_v45 = vld [vmem:[#allocation8 + $0x388] sm:$0xff] }
0x126a   :  { %6778 = vrot.lane.b32.xlu1 %v6771_v53, %s9415_s21  ;;  %v7166_v53 = vld [vmem:[#allocation8 + $0x2d0] sm:$0xff]  ;;  %7020 = vmatpush1.bf16.msra.mxu0 %v8545_v57  ;;  %v10530_v57 = vld [vmem:[#allocation8 + $0x3c0] sm:$0xff] }
0x126b   :  { %v8567_v20 = vcombine.low %v7164_v31, %v7166_v53  ;;  %v8568_v58 = vcombine.high %v7164_v31, %v7166_v53  ;;  %v8593_v37 = vcombine.low %v10528_v62, %v10530_v57 }
0x126d   :  { %7242 = vmatprep.subr.bf16.mxu0 %v8568_v58 }
0x126e   :  { %6786 = vrot.lane.b32.xlu1 %v6772_v48, %s9418_s30  ;;  %v7167_v48 = vld [vmem:[#allocation8 + $0x2d8] sm:$0xff] }
0x1272   :  { %6794 = vrot.lane.b32.xlu1 %v6773_v34, %s9430_s15 }
0x12ca   :  { %v6777_v46 = vpop.permute.xlu0 %6776 }
0x12cb   :  { %v6798_v10 = vsel %vm1094_vm2, %v6702_v8, %v6777_v46 }
0x12ce   :  { %v6785_v33 = vpop.permute.xlu0 %6784 }
0x12cf   :  { %v6800_v29 = vsel %vm2673_vm3, %v6798_v10, %v6785_v33 }
0x12d2   :  { %v6793_v59 = vpop.permute.xlu0 %6792 }
0x12d3   :  { %v6802_v2 = vsel %vm2676_vm4, %v6800_v29, %v6793_v59 }
0x12d4   :  { %8938 = vmatprep.mubr.msk.f32.mxu1 %vm85_vm0, %v6802_v2 }
0x12dc   :  { %v6779_v5 = vpop.permute.xlu1 %6778 }
0x12dd   :  { %v6799_v36 = vsel %vm1094_vm2, %v6770_v3, %v6779_v5  ;;  %v7165_v3 = vld [vmem:[#allocation8 + $0x298] sm:$0xff] }
0x12de   :  { %v8569_v34 = vcombine.low %v7165_v3, %v7167_v48  ;;  %v8570_v46 = vcombine.high %v7165_v3, %v7167_v48  ;;  %v6940_v3 = vld [vmem:[#allocation7 + $0x10] sm:$0xf] }
0x12df   :  { %v6957_v58 = vrot.slane %v6940_v3, %v9488_v28 }
0x12e0   :  { %v6787_v22 = vpop.permute.xlu1 %6786 }
0x12e1   :  { %v6801_v63 = vsel %vm2673_vm3, %v6799_v36, %v6787_v22  ;;  %v6920_v36 = vrot.slane %v10492_v13, %v2794_v6 }
0x12e4   :  { %v6795_v61 = vpop.permute.xlu1 %6794 }
0x12e5   :  { %v6803_v7 = vsel %vm2676_vm4, %v6801_v63, %v6795_v61 }
0x12e6   :  { %8939 = vmatmul.mubr.msk.f32.vlgmr.msra.gmra.mxu1 %vm85_vm0, %v6803_v7  ;;  %v6926_v7 = vrot.slane %v10492_v13, %v2800_v54  ;;  %v7376_v13 = vld [vmem:[#allocation8 + $0x390] sm:$0xff] }
0x12e7   :  { %7080 = vmatprep.mubr.bf16.mxu1 %v9431_v42  ;;  %7061 = vmatpush1.bf16.msra.mxu1 %v8551_v23  ;;  %v7375_v23 = vld [vmem:[#allocation8 + $0x358] sm:$0xff] }
0x12e8   :  { %7062 = vmatprep.subr.bf16.mxu1 %v8548_v30  ;;  %v8583_v21 = vcombine.low %v7373_v40, %v7375_v23  ;;  %v8584_v27 = vcombine.high %v7373_v40, %v7375_v23  ;;  %v10538_v30 = vld [vmem:[#allocation8 + $0x3c8] sm:$0xff] }
0x12e9   :  { %v8595_v31 = vcombine.low %v10532_v45, %v10538_v30  ;;  %v8596_v53 = vcombine.high %v10532_v45, %v10538_v30 }
0x12eb   :  { %7063 = vmatpush1.bf16.msra.mxu1 %v8547_v47  ;;  %v8594_v47 = vcombine.high %v10528_v62, %v10530_v57 }
0x12ec   :  { %7285 = vmatprep.subr.bf16.mxu1 %v8570_v46 }
0x13a6   :  { %v8940_v8 = vpop.f32.mrf.mxu1 }
0x13a7   :  { %v6886_v35 = vadd.f32 %v8940_v8, %v6807_v38 }
0x13a8   :  { %v6880_v0 = vpop.f32.mrf.mxu1 }
0x13a9   :  { %v10497_v43 = vadd.f32 %v6886_v35, %v10106_v24  ;;  %v6881_v18 = vadd.f32 %v6880_v0, %v6807_v38  ;;  %v7160_v0 = vld [vmem:[#allocation8 + $0x210] sm:$0xff] }
0x13ab   :  { %v10500_v14 = vadd.f32 %v6881_v18, %v10101_v9  ;;  %v6894_v17 = vsel %vm85_vm0, %v10497_v43, 0.0  ;;  %v7162_v18 = vld [vmem:[#allocation8 + $0x250] sm:$0xff] }
0x13ac   :  { %6895 = vadd.xlane.f32.xlu1 %v6894_v17  ;;  %v7161_v17 = vld [vmem:[#allocation8 + $0x218] sm:$0xff]  ;;  %v8563_v6 = vcombine.low %v7160_v0, %v7162_v18 }
0x13ad   :  { %v6891_v56 = vsel %vm85_vm0, %v10500_v14, 0.0 }
0x13ae   :  { %6892 = vadd.xlane.f32.xlu0 %v6891_v56  ;;  %v7163_v56 = vld [vmem:[#allocation8 + $0x258] sm:$0xff] }
0x13af   :  { %v8565_v54 = vcombine.low %v7161_v17, %v7163_v56 }
0x1435   :  { %v6896_v12 = vpop.xlane.xlu1 %6895 }
0x1436   :  { %v6898_v55 = vmul.f32 0.03125, %v6896_v12 }
0x1437   :  { %v6893_v50 = vpop.xlane.xlu0 %6892 }
0x1438   :  { %v6897_v52 = vmul.f32 0.03125, %v6893_v50  ;;  %v6900_v49 = vsub.f32 %v10497_v43, %v6898_v55 }
0x143a   :  { %v6899_v24 = vsub.f32 %v10500_v14, %v6897_v52  ;;  %v6902_v19 = vmul.f32 %v6900_v49, %v6900_v49  ;;  %v8564_v52 = vcombine.high %v7160_v0, %v7162_v18 }
0x143c   :  { %v6901_v32 = vmul.f32 %v6899_v24, %v6899_v24  ;;  %v6906_v11 = vsel %vm85_vm0, %v6902_v19, 0.0  ;;  %v7379_v19 = vld [vmem:[#allocation8 + $0x3d8] sm:$0xff] }
0x143e   :  { %v6903_v9 = vsel %vm85_vm0, %v6901_v32, 0.0  ;;  %v8566_v32 = vcombine.high %v7161_v17, %v7163_v56 }
0x143f   :  { %6904 = vadd.xlane.f32.xlu0 %v6903_v9 }
0x1443   :  { %6907 = vadd.xlane.f32.xlu0 %v6906_v11 }
0x14c8   :  { %v6905_v33 = vpop.xlane.xlu0 %6904 }
0x14c9   :  { %v6909_v10 = vmul.f32 0.03125, %v6905_v33 }
0x14cb   :  { %v6911_v29 = vadd.f32 1e-05, %v6909_v10  ;;  %v7168_v10 = vld [vmem:[#allocation7 + $0x14] sm:$0xf] }
0x14cc   :  { %v6908_v59 = vpop.xlane.xlu0 %6907  ;;  %v7185_v18 = vrot.slane %v7168_v10, %v9488_v28 }
0x14cd   :  { %9166 = vrsqrt.f32 %v6911_v29  ;;  %v6910_v2 = vmul.f32 0.03125, %v6908_v59 }
0x14cf   :  { %v6912_v5 = vadd.f32 1e-05, %v6910_v2 }
0x14d1   :  { %9168 = vrsqrt.f32 %v6912_v5 }
0x14da   :  { %v9167_v22 = vpop.eup %9166 }
0x14db   :  { %v6915_v63 = vmul.f32 %v9167_v22, %v6899_v24  ;;  %v7377_v24 = vld [vmem:[#allocation8 + $0x398] sm:$0xff] }
0x14dc   :  { %v8587_v1 = vcombine.low %v7377_v24, %v7379_v19  ;;  %v8588_v4 = vcombine.high %v7377_v24, %v7379_v19 }
0x14dd   :  { %v6921_v38 = vmul.f32 %v6920_v36, %v6915_v63 }
0x14de   :  { %v9169_v61 = vpop.eup %9168 }
0x14df   :  { %v6916_v8 = vmul.f32 %v9169_v61, %v6900_v49  ;;  %v6927_v12 = vadd.f32 %v6926_v7, %v6921_v38  ;;  %v7378_v49 = vld [vmem:[#allocation8 + $0x3d0] sm:$0xff]  ;;  %v7181_v38 = vrot.slane %v7168_v10, %v9485_v26 }
0x14e0   :  { %v8586_v9 = vcombine.high %v7376_v13, %v7378_v49  ;;  %v8585_v11 = vcombine.low %v7376_v13, %v7378_v49 }
0x14e1   :  { %v6922_v35 = vmul.f32 %v6920_v36, %v6916_v8  ;;  %v7173_v36 = vrot.slane %v7168_v10, %v9495_v39  ;;  %v7177_v8 = vrot.slane %v7168_v10, %v9890_v44 }
0x14e3   :  { %v6928_v55 = vadd.f32 %v6926_v7, %v6922_v35 }
0x14e5   :  { %v10516_v50 = vpack.c.bf16 %v6928_v55, %v6927_v12 }
0x14e7   :  { %8553 = vmatmul.mubr.msk.bf16.vlgmr.msra.gmra.mxu0 %vm85_vm0, %v10516_v50  ;;  %8554 = vmatmul.mubr.msk.bf16.vlgmr.msra.gmra.mxu1 %vm85_vm0, %v10516_v50 }
0x14e8   :  { %7243 = vmatpush1.bf16.msra.mxu0 %v8567_v20  ;;  %7286 = vmatpush1.bf16.msra.mxu1 %v8569_v34  ;;  %v6949_v20 = vrot.slane %v6940_v3, %v9890_v44 }
0x14e9   :  { %7244 = vmatprep.subr.bf16.mxu0 %v8564_v52  ;;  %7287 = vmatprep.subr.bf16.mxu1 %v8566_v32  ;;  %v6945_v32 = vrot.slane %v6940_v3, %v9495_v39 }
0x14ea   :  { %7262 = vmatprep.mubr.bf16.mxu0 %v9431_v42  ;;  %7305 = vmatprep.mubr.bf16.mxu1 %v9431_v42 }
0x14ec   :  { %7245 = vmatpush1.bf16.msra.mxu0 %v8563_v6  ;;  %7288 = vmatpush1.bf16.msra.mxu1 %v8565_v54  ;;  %v6953_v6 = vrot.slane %v6940_v3, %v9485_v26 }
0x14ed   :  { %7436 = vmatprep.subr.bf16.mxu0 %v8586_v9  ;;  %7477 = vmatprep.subr.bf16.mxu1 %v8588_v4 }
0x14ef   :  { %8571 = vmatmul.mubr.msk.bf16.vlgmr.msra.gmra.mxu0 %vm85_vm0, %v10516_v50  ;;  %8572 = vmatmul.mubr.msk.bf16.vlgmr.msra.gmra.mxu1 %vm85_vm0, %v10516_v50 }
0x14f0   :  { %7437 = vmatpush1.bf16.xpose.msra.mxu0 %v8585_v11  ;;  %7478 = vmatpush1.bf16.xpose.msra.mxu1 %v8587_v1 }
0x14f1   :  { %7438 = vmatprep.subr.bf16.mxu0 %v8582_v60  ;;  %7479 = vmatprep.subr.bf16.mxu1 %v8584_v27 }
0x14f8   :  { %7439 = vmatpush1.bf16.xpose.msra.mxu0 %v8581_v51  ;;  %7480 = vmatpush1.bf16.xpose.msra.mxu1 %v8583_v21 }
0x14f9   :  { %7558 = vmatprep.subr.bf16.mxu0 %v8594_v47  ;;  %7599 = vmatprep.subr.bf16.mxu1 %v8596_v53 }
0x15a7   :  { %v7039_v48 = vpop.f32.mrf.mxu0  ;;  %v7082_v34 = vpop.f32.mrf.mxu1 }
0x15a8   :  { %v10578_v60 = vadd.f32 %v7039_v48, %v6945_v32  ;;  %v10580_v23 = vadd.f32 %v7082_v34, %v6953_v6 }
0x15a9   :  { %v7041_v46 = vpop.f32.mrf.mxu0  ;;  %v7084_v33 = vpop.f32.mrf.mxu1 }
0x15aa   :  { %v10546_v29 = vadd.f32 %v7041_v46, %v6949_v20  ;;  %v10548_v59 = vadd.f32 %v7084_v33, %v6957_v58  ;;  %v8555_v33 = vmul.f32 -1.442695, %v10578_v60  ;;  %v8557_v10 = vmul.f32 -1.442695, %v10580_v23 }
0x15ab   :  { %v7043_v2 = vpop.f32.mrf.mxu0  ;;  %v7086_v5 = vpop.f32.mrf.mxu1 }
0x15ac   :  { %v8556_v22 = vmul.f32 -1.442695, %v10546_v29  ;;  %v8558_v63 = vmul.f32 -1.442695, %v10548_v59  ;;  %v10592_v48 = vadd.f32 %v7086_v5, %v6953_v6 }
0x15ad   :  { %v7045_v61 = vpop.f32.mrf.mxu0  ;;  %v7088_v7 = vpop.f32.mrf.mxu1 }
0x15ae   :  { %9170 = vpow2.f32 %v8556_v22  ;;  %v10555_v35 = vadd.f32 %v7045_v61, %v6949_v20  ;;  %v10557_v0 = vadd.f32 %v7088_v7, %v6957_v58  ;;  %v10589_v20 = vadd.f32 %v7043_v2, %v6945_v32 }
0x15af   :  { %v7264_v17 = vpop.f32.mrf.mxu0  ;;  %v7307_v56 = vpop.f32.mrf.mxu1  ;;  %9172 = vpow2.f32 %v8558_v63 }
0x15b0   :  { %v8560_v12 = vmul.f32 -1.442695, %v10555_v35  ;;  %v8562_v55 = vmul.f32 -1.442695, %v10557_v0  ;;  %v10562_v52 = vadd.f32 %v7264_v17, %v7173_v36  ;;  %v10566_v54 = vadd.f32 %v7307_v56, %v7181_v38 }
0x15b1   :  { %v7266_v13 = vpop.f32.mrf.mxu0  ;;  %v7309_v49 = vpop.f32.mrf.mxu1  ;;  %v8559_v2 = vmul.f32 -1.442695, %v10589_v20 }
0x15b2   :  { %9174 = vpow2.f32 %v8560_v12  ;;  %v8573_v24 = vmul.f32 -1.442695, %v10562_v52  ;;  %v10569_v9 = vadd.f32 %v7266_v13, %v7177_v8  ;;  %v10571_v19 = vadd.f32 %v7309_v49, %v7185_v18 }
0x15b3   :  { %9176 = vpow2.f32 %v8562_v55  ;;  %v8575_v11 = vmul.f32 -1.442695, %v10566_v54  ;;  %v7268_v1 = vpop.f32.mrf.mxu0  ;;  %v7311_v4 = vpop.f32.mrf.mxu1 }
0x15b4   :  { %9178 = vpow2.f32 %v8573_v24  ;;  %v8574_v15 = vmul.f32 -1.442695, %v10569_v9  ;;  %v8576_v16 = vmul.f32 -1.442695, %v10571_v19  ;;  %v10576_v40 = vadd.f32 %v7268_v1, %v7173_v36 }
0x15b5   :  { %9180 = vpow2.f32 %v8575_v11  ;;  %v10582_v51 = vadd.f32 %v7311_v4, %v7181_v38  ;;  %v7270_v21 = vpop.f32.mrf.mxu0  ;;  %v7313_v27 = vpop.f32.mrf.mxu1  ;;  %v8561_v36 = vmul.f32 -1.442695, %v10592_v48 }
0x15b6   :  { %9182 = vpow2.f32 %v8574_v15  ;;  %v8577_v47 = vmul.f32 -1.442695, %v10576_v40  ;;  %v10585_v53 = vadd.f32 %v7270_v21, %v7177_v8  ;;  %v10587_v3 = vadd.f32 %v7313_v27, %v7185_v18 }
0x15b7   :  { %9184 = vpow2.f32 %v8576_v16  ;;  %v8579_v58 = vmul.f32 -1.442695, %v10582_v51 }
0x15b8   :  { %9186 = vpow2.f32 %v8577_v47  ;;  %v8578_v34 = vmul.f32 -1.442695, %v10585_v53  ;;  %v8580_v46 = vmul.f32 -1.442695, %v10587_v3 }
0x15b9   :  { %9188 = vpow2.f32 %v8579_v58 }
0x15ba   :  { %9190 = vpow2.f32 %v8578_v34 }
0x15bb   :  { %v9171_v22 = vpop.eup %9170  ;;  %9192 = vpow2.f32 %v8580_v46 }
0x15bc   :  { %9194 = vpow2.f32 %v8555_v33  ;;  %v7116_v5 = vadd.f32 1.0, %v9171_v22  ;;  %v9173_v63 = vpop.eup %9172 }
0x15bd   :  { %9196 = vpow2.f32 %v8557_v10  ;;  %v7118_v16 = vadd.f32 1.0, %v9173_v63 }
0x15be   :  { %9198 = vpow2.f32 %v8559_v2 }
0x15bf   :  { %v9175_v61 = vpop.eup %9174  ;;  %9200 = vpow2.f32 %v8561_v36 }
0x15c0   :  { %v9177_v7 = vpop.eup %9176  ;;  %v7120_v38 = vadd.f32 1.0, %v9175_v61  ;;  %9202 = vrcp.f32 %v7116_v5 }
0x15c1   :  { %v9179_v8 = vpop.eup %9178  ;;  %v7122_v18 = vadd.f32 1.0, %v9177_v7 }
0x15c2   :  { %v9181_v17 = vpop.eup %9180  ;;  %9204 = vrcp.f32 %v7120_v38  ;;  %v7340_v56 = vadd.f32 1.0, %v9179_v8 }
0x15c3   :  { %v9183_v12 = vpop.eup %9182  ;;  %9206 = vrcp.f32 %v7122_v18  ;;  %v7342_v55 = vadd.f32 1.0, %v9181_v17 }
0x15c4   :  { %v9185_v32 = vpop.eup %9184  ;;  %9208 = vrcp.f32 %v7340_v56  ;;  %v7341_v6 = vadd.f32 1.0, %v9183_v12 }
0x15c5   :  { %v9187_v13 = vpop.eup %9186  ;;  %9210 = vrcp.f32 %v7342_v55  ;;  %v7343_v49 = vadd.f32 1.0, %v9185_v32 }
0x15c6   :  { %v9189_v24 = vpop.eup %9188  ;;  %9212 = vrcp.f32 %v7341_v6  ;;  %v7344_v11 = vadd.f32 1.0, %v9187_v13 }
0x15c7   :  { %v9191_v1 = vpop.eup %9190  ;;  %9214 = vrcp.f32 %v7343_v49  ;;  %v7346_v4 = vadd.f32 1.0, %v9189_v24 }
0x15c8   :  { %v9193_v15 = vpop.eup %9192  ;;  %9216 = vrcp.f32 %v7344_v11  ;;  %v7345_v21 = vadd.f32 1.0, %v9191_v1 }
0x15c9   :  { %9218 = vrcp.f32 %v7346_v4  ;;  %v7347_v27 = vadd.f32 1.0, %v9193_v15  ;;  %v9195_v47 = vpop.eup %9194  ;;  %v7148_v15 = vld [vmem:[#allocation8 + $0x300] sm:$0xff] }
0x15ca   :  { %9220 = vrcp.f32 %v7345_v21  ;;  %v9197_v58 = vpop.eup %9196  ;;  %v7115_v5 = vadd.f32 1.0, %v9195_v47 }
0x15cb   :  { %9222 = vrcp.f32 %v7347_v27  ;;  %v9199_v34 = vpop.eup %9198  ;;  %v7117_v17 = vadd.f32 1.0, %v9197_v58  ;;  %v7151_v27 = vld [vmem:[#allocation8 + $0x348] sm:$0xff] }
0x15cc   :  { %9224 = vrcp.f32 %v7118_v16  ;;  %v9201_v46 = vpop.eup %9200  ;;  %v7119_v7 = vadd.f32 1.0, %v9199_v34  ;;  %v7150_v16 = vld [vmem:[#allocation8 + $0x340] sm:$0xff] }
0x15cd   :  { %v9203_v33 = vpop.eup %9202  ;;  %v7121_v38 = vadd.f32 1.0, %v9201_v46  ;;  %9226 = vrcp.f32 %v7115_v5  ;;  %v7635_v46 = vld [vmem:[#allocation8 + $0x2e8] sm:$0xff]  ;;  %v7630_v5 = vld [vmem:[#allocation8 + $0x260] sm:$0xff] }
0x15ce   :  { %9228 = vrcp.f32 %v7119_v7  ;;  %v7629_v7 = vld [vmem:[#allocation8 + $0x228] sm:$0xff] }
0x15cf   :  { %v9205_v10 = vpop.eup %9204  ;;  %9230 = vrcp.f32 %v7121_v38 }
0x15d0   :  { %v9207_v22 = vpop.eup %9206  ;;  %v7144_v24 = vmul.f32 %v9205_v10, %v10555_v35  ;;  %9232 = vrcp.f32 %v7117_v17 }
0x15d1   :  { %v9209_v2 = vpop.eup %9208 }
0x15d2   :  { %v9211_v36 = vpop.eup %9210  ;;  %v7364_v11 = vmul.f32 %v9209_v2, %v10562_v52 }
0x15d3   :  { %v9213_v61 = vpop.eup %9212 }
0x15d4   :  { %v9215_v63 = vpop.eup %9214  ;;  %v7365_v32 = vmul.f32 %v9213_v61, %v10569_v9  ;;  %v7366_v9 = vmul.f32 %v9211_v36, %v10566_v54  ;;  %v7633_v54 = vld [vmem:[#allocation8 + $0x2a8] sm:$0xff] }
0x15d5   :  { %v9217_v8 = vpop.eup %9216  ;;  %v7367_v1 = vmul.f32 %v9215_v63, %v10571_v19  ;;  %v8590_v19 = vcombine.high %v7148_v15, %v7150_v16  ;;  %v8604_v62 = vcombine.high %v7633_v54, %v7635_v46  ;;  %v7631_v63 = vld [vmem:[#allocation8 + $0x268] sm:$0xff]  ;;  %v8603_v17 = vcombine.low %v7633_v54, %v7635_v46 }
0x15d6   :  { %v9219_v18 = vpop.eup %9218  ;;  %v7368_v12 = vmul.f32 %v9217_v8, %v10576_v40  ;;  %v7146_v40 = vmul.f32 %v9207_v22, %v10557_v0 }
0x15d7   :  { %v9221_v56 = vpop.eup %9220  ;;  %v7370_v6 = vmul.f32 %v9219_v18, %v10582_v51  ;;  %v7149_v51 = vld [vmem:[#allocation8 + $0x308] sm:$0xff] }
0x15d8   :  { %v9223_v55 = vpop.eup %9222  ;;  %v7369_v13 = vmul.f32 %v9221_v56, %v10585_v53  ;;  %v7140_v53 = vmul.f32 %v9203_v33, %v10546_v29  ;;  %v7380_v47 = vpack.c.bf16 %v7368_v12, %v7364_v11  ;;  %v8592_v34 = vcombine.high %v7149_v51, %v7151_v27  ;;  %v7632_v29 = vld [vmem:[#allocation8 + $0x2a0] sm:$0xff] }
0x15d9   :  { %v9225_v49 = vpop.eup %9224  ;;  %v7371_v4 = vmul.f32 %v9223_v55, %v10587_v3  ;;  %v7382_v58 = vpack.c.bf16 %v7370_v6, %v7366_v9  ;;  %v8589_v33 = vcombine.low %v7148_v15, %v7150_v16  ;;  %v8591_v22 = vcombine.low %v7149_v51, %v7151_v27  ;;  %v7841_v15 = vld [vmem:[#allocation8 + $0x328] sm:$0xff]  ;;  %v10628_v27 = vld [vmem:[#allocation8 + $0x2b0] sm:$0xff] }
0x15da   :  { %v7381_v21 = vpack.c.bf16 %v7369_v13, %v7365_v32  ;;  %v7142_v52 = vmul.f32 %v9225_v49, %v10548_v59  ;;  %v7157_v3 = vpack.c.bf16 %v7144_v24, %v7140_v53  ;;  %v7634_v59 = vld [vmem:[#allocation8 + $0x2e0] sm:$0xff]  ;;  %v9227_v10 = vpop.eup %9226  ;;  %v8600_v55 = vcombine.high %v7629_v7, %v7631_v63  ;;  %v7845_v32 = vld [vmem:[#allocation8 + $0x3a8] sm:$0xff]  ;;  %v10630_v53 = vld [vmem:[#allocation8 + $0x2f0] sm:$0xff] }
0x15db   :  { %v7383_v35 = vpack.c.bf16 %v7371_v4, %v7367_v1  ;;  %v8602_v2 = vcombine.high %v7632_v29, %v7634_v59  ;;  %v9229_v36 = vpop.eup %9228  ;;  %v7139_v61 = vmul.f32 %v9227_v10, %v10578_v60  ;;  %v8601_v8 = vcombine.low %v7632_v29, %v7634_v59  ;;  %v7844_v60 = vld [vmem:[#allocation8 + $0x3a0] sm:$0xff]  ;;  %v7847_v13 = vld [vmem:[#allocation8 + $0x3e8] sm:$0xff] }
0x15dc   :  { %7456 = vmatprep.mubr.bf16.mxu0 %v7381_v21  ;;  %v7159_v0 = vpack.c.bf16 %v7146_v40, %v7142_v52  ;;  %v9231_v57 = vpop.eup %9230  ;;  %v7143_v45 = vmul.f32 %v9229_v36, %v10589_v20  ;;  %v8621_v24 = vcombine.low %v7845_v32, %v7847_v13  ;;  %v8622_v11 = vcombine.high %v7845_v32, %v7847_v13  ;;  %v7840_v1 = vld [vmem:[#allocation8 + $0x320] sm:$0xff]  ;;  %v7843_v40 = vld [vmem:[#allocation8 + $0x368] sm:$0xff] }
0x15dd   :  { %7497 = vmatprep.mubr.bf16.mxu1 %v7383_v35  ;;  %7457 = vmatmul.mubr.bf16.vlgmr.msra.gmra.mxu0 %v7380_v47  ;;  %v7145_v30 = vmul.f32 %v9231_v57, %v10592_v48  ;;  %v8599_v48 = vcombine.low %v7629_v7, %v7631_v63  ;;  %v7842_v4 = vld [vmem:[#allocation8 + $0x360] sm:$0xff]  ;;  %v8617_v21 = vcombine.low %v7841_v15, %v7843_v40  ;;  %v10632_v47 = vld [vmem:[#allocation8 + $0x2b8] sm:$0xff] }
0x15de   :  { %7498 = vmatmul.mubr.bf16.vlgmr.msra.gmra.mxu1 %v7382_v58  ;;  %7559 = vmatpush1.bf16.xpose.msra.mxu0 %v8593_v37  ;;  %v9233_v37 = vpop.eup %9232  ;;  %v7156_v18 = vpack.c.bf16 %v7143_v45, %v7139_v61  ;;  %v8616_v16 = vcombine.high %v7840_v1, %v7842_v4  ;;  %v8615_v9 = vcombine.low %v7840_v1, %v7842_v4  ;;  %v10638_v58 = vld [vmem:[#allocation8 + $0x2f8] sm:$0xff] }
0x15df   :  { %7600 = vmatpush1.bf16.xpose.msra.mxu1 %v8595_v31  ;;  %7578 = vmatprep.mubr.bf16.mxu0 %v7157_v3  ;;  %v7628_v31 = vld [vmem:[#allocation8 + $0x220] sm:$0xff]  ;;  %v7141_v38 = vmul.f32 %v9233_v37, %v10580_v23  ;;  %v8618_v51 = vcombine.high %v7841_v15, %v7843_v40  ;;  %v8627_v35 = vcombine.low %v10628_v27, %v10630_v53  ;;  %v7636_v45 = vld [vmem:[#allocation7 + $0x18] sm:$0xf] }
0x15e0   :  { %7619 = vmatprep.mubr.bf16.mxu1 %v7159_v0  ;;  %7560 = vmatprep.subr.bf16.mxu0 %v8590_v19  ;;  %v8598_v56 = vcombine.high %v7628_v31, %v7630_v5  ;;  %v8597_v20 = vcombine.low %v7628_v31, %v7630_v5  ;;  %v7846_v23 = vld [vmem:[#allocation8 + $0x3e0] sm:$0xff]  ;;  %v8628_v52 = vcombine.high %v10628_v27, %v10630_v53  ;;  %v8192_v27 = vld [vmem:[#allocation8 + $0x3b0] sm:$0xff] }
0x15e1   :  { %7601 = vmatprep.subr.bf16.mxu1 %v8592_v34  ;;  %v7158_v12 = vpack.c.bf16 %v7145_v30, %v7141_v38  ;;  %v8620_v6 = vcombine.high %v7844_v60, %v7846_v23  ;;  %v8619_v49 = vcombine.low %v7844_v60, %v7846_v23  ;;  %v8629_v19 = vcombine.low %v10632_v47, %v10638_v58  ;;  %v8194_v53 = vld [vmem:[#allocation8 + $0x3f0] sm:$0xff] }
0x15e2   :  { %v8630_v3 = vcombine.high %v10632_v47, %v10638_v58  ;;  %v7641_v63 = vrot.slane %v7636_v45, %v9495_v39  ;;  %v8646_v47 = vcombine.high %v8192_v27, %v8194_v53  ;;  %v8195_v58 = vld [vmem:[#allocation8 + $0x3f8] sm:$0xff] }
0x15e6   :  { %7561 = vmatpush1.bf16.xpose.msra.mxu0 %v8589_v33 }
0x15e7   :  { %7602 = vmatpush1.bf16.xpose.msra.mxu1 %v8591_v22  ;;  %7710 = vmatprep.subr.bf16.mxu0 %v8602_v2 }
0x15e8   :  { %7753 = vmatprep.subr.bf16.mxu1 %v8604_v62 }
0x15ed   :  { %7579 = vmatmul.mubr.bf16.vlgmr.msra.gmra.mxu0 %v7156_v18 }
0x15ee   :  { %7620 = vmatmul.mubr.bf16.vlgmr.msra.gmra.mxu1 %v7158_v12  ;;  %7711 = vmatpush1.bf16.msra.mxu0 %v8601_v8  ;;  %v7649_v8 = vrot.slane %v7636_v45, %v9485_v26 }
0x15ef   :  { %7754 = vmatpush1.bf16.msra.mxu1 %v8603_v17  ;;  %7712 = vmatprep.subr.bf16.mxu0 %v8598_v56  ;;  %v7645_v56 = vrot.slane %v7636_v45, %v9890_v44 }
0x15f0   :  { %7755 = vmatprep.subr.bf16.mxu1 %v8600_v55  ;;  %7730 = vmatprep.mubr.bf16.mxu0 %v9431_v42  ;;  %v7653_v55 = vrot.slane %v7636_v45, %v9488_v28 }
0x15f1   :  { %7773 = vmatprep.mubr.bf16.mxu1 %v9431_v42 }
0x15f2   :  { %7713 = vmatpush1.bf16.msra.mxu0 %v8597_v20 }
0x15f3   :  { %7756 = vmatpush1.bf16.msra.mxu1 %v8599_v48  ;;  %7904 = vmatprep.subr.bf16.mxu0 %v8620_v6 }
0x15f4   :  { %7945 = vmatprep.subr.bf16.mxu1 %v8622_v11 }
0x15f5   :  { %8605 = vmatmul.mubr.msk.bf16.vlgmr.msra.gmra.mxu0 %vm85_vm0, %v10516_v50 }
0x15f6   :  { %8606 = vmatmul.mubr.msk.bf16.vlgmr.msra.gmra.mxu1 %vm85_vm0, %v10516_v50  ;;  %7905 = vmatpush1.bf16.xpose.msra.mxu0 %v8619_v49 }
0x15f7   :  { %7946 = vmatpush1.bf16.xpose.msra.mxu1 %v8621_v24  ;;  %7906 = vmatprep.subr.bf16.mxu0 %v8616_v16 }
0x15f8   :  { %7947 = vmatprep.subr.bf16.mxu1 %v8618_v51 }
0x15fe   :  { %7907 = vmatpush1.bf16.xpose.msra.mxu0 %v8615_v9 }
0x15ff   :  { %7948 = vmatpush1.bf16.xpose.msra.mxu1 %v8617_v21  ;;  %8058 = vmatprep.subr.bf16.mxu0 %v8628_v52 }
0x1600   :  { %8101 = vmatprep.subr.bf16.mxu1 %v8630_v3 }
0x169d   :  { %v7458_v34 = vpop.f32.mrf.mxu0 }
0x169e   :  { %v7499_v0 = vpop.f32.mrf.mxu1 }
0x169f   :  { %v7500_v29 = vadd.f32 %v7499_v0, %v7458_v34  ;;  %v7460_v59 = vpop.f32.mrf.mxu0 }
0x16a0   :  { %v7501_v54 = vpop.f32.mrf.mxu1 }
0x16a1   :  { %v7461_v46 = vpop.f32.mrf.mxu0 }
0x16a2   :  { %v7502_v33 = vpop.f32.mrf.mxu1 }
0x16a3   :  { %v7503_v10 = vadd.f32 %v7502_v33, %v7461_v46  ;;  %v7463_v22 = vpop.f32.mrf.mxu0 }
0x16a4   :  { %v7504_v2 = vpop.f32.mrf.mxu1 }
0x16ad   :  { %v7580_v36 = vpop.f32.mrf.mxu0 }
0x16ae   :  { %v7581_v62 = vadd.f32 %v7580_v36, %v7500_v29  ;;  %v7621_v57 = vpop.f32.mrf.mxu1 }
0x16af   :  { %v7582_v37 = vpop.f32.mrf.mxu0 }
0x16b0   :  { %v10644_v30 = vadd.f32 %v7621_v57, %v7581_v62  ;;  %v7623_v31 = vpop.f32.mrf.mxu1 }
0x16b1   :  { %v7583_v5 = vpop.f32.mrf.mxu0 }
0x16b2   :  { %v7584_v61 = vadd.f32 %v7583_v5, %v7503_v10  ;;  %v7624_v7 = vpop.f32.mrf.mxu1 }
0x16b3   :  { %v7585_v38 = vpop.f32.mrf.mxu0 }
0x16b4   :  { %v10648_v18 = vadd.f32 %v7624_v7, %v7584_v61  ;;  %v7626_v17 = vpop.f32.mrf.mxu1 }
0x16b5   :  { %v7732_v12 = vpop.f32.mrf.mxu0 }
0x16b6   :  { %v10652_v20 = vadd.f32 %v7732_v12, %v7641_v63  ;;  %v7775_v48 = vpop.f32.mrf.mxu1 }
0x16b7   :  { %v10654_v60 = vadd.f32 %v7775_v48, %v7649_v8  ;;  %v7734_v23 = vpop.f32.mrf.mxu0 }
0x16b8   :  { %v8607_v32 = vmul.f32 -1.442695, %v10652_v20  ;;  %v7735_v6 = vadd.f32 %v7734_v23, %v7645_v56  ;;  %v7777_v13 = vpop.f32.mrf.mxu1 }
0x16b9   :  { %v8609_v49 = vmul.f32 -1.442695, %v10654_v60  ;;  %v7778_v24 = vadd.f32 %v7777_v13, %v7653_v55  ;;  %v7736_v11 = vpop.f32.mrf.mxu0 }
0x16ba   :  { %9234 = vpow2.f32 %v8607_v32  ;;  %v8608_v1 = vmul.f32 -1.442695, %v7735_v6  ;;  %v7737_v4 = vadd.f32 %v7736_v11, %v7641_v63  ;;  %v7779_v15 = vpop.f32.mrf.mxu1  ;;  %v7976_v11 = vld [vmem:[#allocation8 + $0x230] sm:$0xff] }
0x16bb   :  { %9236 = vpow2.f32 %v8609_v49  ;;  %v8610_v16 = vmul.f32 -1.442695, %v7778_v24  ;;  %v7780_v40 = vadd.f32 %v7779_v15, %v7649_v8  ;;  %v7738_v9 = vpop.f32.mrf.mxu0 }
0x16bc   :  { %9238 = vpow2.f32 %v8608_v1  ;;  %v8611_v21 = vmul.f32 -1.442695, %v7737_v4  ;;  %v7739_v51 = vadd.f32 %v7738_v9, %v7645_v56  ;;  %v7781_v52 = vpop.f32.mrf.mxu1  ;;  %v7978_v1 = vld [vmem:[#allocation8 + $0x270] sm:$0xff] }
0x16bd   :  { %9240 = vpow2.f32 %v8610_v16  ;;  %v8613_v3 = vmul.f32 -1.442695, %v7780_v40  ;;  %v7782_v34 = vadd.f32 %v7781_v52, %v7653_v55  ;;  %v7979_v52 = vld [vmem:[#allocation8 + $0x278] sm:$0xff] }
0x16be   :  { %9242 = vpow2.f32 %v8611_v21  ;;  %v8612_v0 = vmul.f32 -1.442695, %v7739_v51  ;;  %v7977_v21 = vld [vmem:[#allocation8 + $0x238] sm:$0xff] }
0x16bf   :  { %9244 = vpow2.f32 %v8613_v3  ;;  %v8614_v29 = vmul.f32 -1.442695, %v7782_v34 }
0x16c0   :  { %9246 = vpow2.f32 %v8612_v0 }
0x16c1   :  { %9248 = vpow2.f32 %v8614_v29 }
0x16c7   :  { %v9235_v59 = vpop.eup %9234 }
0x16c8   :  { %v9237_v54 = vpop.eup %9236  ;;  %v7808_v46 = vadd.f32 1.0, %v9235_v59 }
0x16c9   :  { %v9239_v33 = vpop.eup %9238  ;;  %v7810_v10 = vadd.f32 1.0, %v9237_v54  ;;  %v8624_v54 = vcombine.high %v7976_v11, %v7978_v1 }
0x16ca   :  { %v9241_v22 = vpop.eup %9240  ;;  %9250 = vrcp.f32 %v7808_v46  ;;  %v7809_v2 = vadd.f32 1.0, %v9239_v33  ;;  %v8191_v33 = vld [vmem:[#allocation8 + $0x378] sm:$0xff] }
0x16cb   :  { %v9243_v36 = vpop.eup %9242  ;;  %9252 = vrcp.f32 %v7810_v10  ;;  %v7811_v62 = vadd.f32 1.0, %v9241_v22 }
0x16cc   :  { %v9245_v57 = vpop.eup %9244  ;;  %9254 = vrcp.f32 %v7809_v2  ;;  %v7812_v37 = vadd.f32 1.0, %v9243_v36 }
0x16cd   :  { %v9247_v45 = vpop.eup %9246  ;;  %9256 = vrcp.f32 %v7811_v62  ;;  %v7814_v31 = vadd.f32 1.0, %v9245_v57 }
0x16ce   :  { %v9249_v5 = vpop.eup %9248  ;;  %9258 = vrcp.f32 %v7812_v37  ;;  %v7813_v61 = vadd.f32 1.0, %v9247_v45  ;;  %v7984_v37 = vld [vmem:[#allocation7 + $0x1c] sm:$0xf] }
0x16cf   :  { %9260 = vrcp.f32 %v7814_v31  ;;  %v7815_v7 = vadd.f32 1.0, %v9249_v5 }
0x16d0   :  { %9262 = vrcp.f32 %v7813_v61 }
0x16d1   :  { %9264 = vrcp.f32 %v7815_v7  ;;  %v7989_v7 = vrot.slane %v7984_v37, %v9495_v39 }
0x16d7   :  { %v9251_v63 = vpop.eup %9250 }
0x16d8   :  { %v9253_v38 = vpop.eup %9252  ;;  %v7832_v15 = vmul.f32 %v9251_v63, %v10652_v20  ;;  %v8623_v20 = vcombine.low %v7976_v11, %v7978_v1 }
0x16d9   :  { %v9255_v8 = vpop.eup %9254  ;;  %v7834_v3 = vmul.f32 %v9253_v38, %v10654_v60  ;;  %v8625_v60 = vcombine.low %v7977_v21, %v7979_v52 }
0x16da   :  { %v9257_v17 = vpop.eup %9256  ;;  %v7833_v32 = vmul.f32 %v9255_v8, %v7735_v6  ;;  %v7997_v8 = vrot.slane %v7984_v37, %v9485_v26 }
0x16db   :  { %v9259_v56 = vpop.eup %9258  ;;  %v7835_v16 = vmul.f32 %v9257_v17, %v7778_v24 }
0x16dc   :  { %v9261_v12 = vpop.eup %9260  ;;  %v7836_v48 = vmul.f32 %v9259_v56, %v7737_v4  ;;  %v8626_v4 = vcombine.high %v7977_v21, %v7979_v52  ;;  %v7993_v56 = vrot.slane %v7984_v37, %v9890_v44 }
0x16dd   :  { %v9263_v55 = vpop.eup %9262  ;;  %v7838_v13 = vmul.f32 %v9261_v12, %v7780_v40  ;;  %v8190_v40 = vld [vmem:[#allocation8 + $0x370] sm:$0xff] }
0x16de   :  { %v9265_v23 = vpop.eup %9264  ;;  %v7837_v49 = vmul.f32 %v9263_v55, %v7739_v51  ;;  %v7848_v29 = vpack.c.bf16 %v7836_v48, %v7832_v15  ;;  %v8189_v51 = vld [vmem:[#allocation8 + $0x338] sm:$0xff]  ;;  %v8001_v48 = vrot.slane %v7984_v37, %v9488_v28 }
0x16df   :  { %v7839_v9 = vmul.f32 %v9265_v23, %v7782_v34  ;;  %v7850_v46 = vpack.c.bf16 %v7838_v13, %v7834_v3  ;;  %v8643_v22 = vcombine.low %v8189_v51, %v8191_v33 }
0x16e0   :  { %v7849_v0 = vpack.c.bf16 %v7837_v49, %v7833_v32 }
0x16e1   :  { %v7851_v59 = vpack.c.bf16 %v7839_v9, %v7835_v16 }
0x16e2   :  { %7924 = vmatprep.mubr.bf16.mxu0 %v7849_v0 }
0x16e3   :  { %7965 = vmatprep.mubr.bf16.mxu1 %v7851_v59  ;;  %7925 = vmatmul.mubr.bf16.vlgmr.msra.gmra.mxu0 %v7848_v29 }
0x16e4   :  { %7966 = vmatmul.mubr.bf16.vlgmr.msra.gmra.mxu1 %v7850_v46  ;;  %8059 = vmatpush1.bf16.msra.mxu0 %v8627_v35  ;;  %v8193_v35 = vld [vmem:[#allocation8 + $0x3b8] sm:$0xff] }
0x16e5   :  { %8102 = vmatpush1.bf16.msra.mxu1 %v8629_v19  ;;  %8060 = vmatprep.subr.bf16.mxu0 %v8624_v54  ;;  %v8645_v19 = vcombine.low %v8192_v27, %v8194_v53  ;;  %v8647_v6 = vcombine.low %v8193_v35, %v8195_v58  ;;  %v8648_v24 = vcombine.high %v8193_v35, %v8195_v58 }
0x16e6   :  { %8103 = vmatprep.subr.bf16.mxu1 %v8626_v4  ;;  %8078 = vmatprep.mubr.bf16.mxu0 %v9431_v42 }
0x16e7   :  { %8121 = vmatprep.mubr.bf16.mxu1 %v9431_v42  ;;  %v8188_v42 = vld [vmem:[#allocation8 + $0x330] sm:$0xff] }
0x16e8   :  { %8061 = vmatpush1.bf16.msra.mxu0 %v8623_v20  ;;  %v8642_v34 = vcombine.high %v8188_v42, %v8190_v40  ;;  %v8641_v10 = vcombine.low %v8188_v42, %v8190_v40 }
0x16e9   :  { %8104 = vmatpush1.bf16.msra.mxu1 %v8625_v60  ;;  %8252 = vmatprep.subr.bf16.mxu0 %v8646_v47 }
0x16ea   :  { %8293 = vmatprep.subr.bf16.mxu1 %v8648_v24 }
0x16eb   :  { %8631 = vmatmul.mubr.msk.bf16.vlgmr.msra.gmra.mxu0 %vm85_vm0, %v10516_v50 }
0x16ec   :  { %8632 = vmatmul.mubr.msk.bf16.vlgmr.msra.gmra.mxu1 %vm85_vm0, %v10516_v50  ;;  %8253 = vmatpush1.bf16.xpose.msra.mxu0 %v8645_v19  ;;  %v8644_v50 = vcombine.high %v8189_v51, %v8191_v33 }
0x16ed   :  { %8294 = vmatpush1.bf16.xpose.msra.mxu1 %v8647_v6  ;;  %8254 = vmatprep.subr.bf16.mxu0 %v8642_v34 }
0x16ee   :  { %8295 = vmatprep.subr.bf16.mxu1 %v8644_v50 }
0x16f4   :  { %8255 = vmatpush1.bf16.xpose.msra.mxu0 %v8641_v10 }
0x16f5   :  { %8296 = vmatpush1.bf16.xpose.msra.mxu1 %v8643_v22 }
0x17a3   :  { %v7926_v2 = vpop.f32.mrf.mxu0 }
0x17a4   :  { %v7967_v36 = vpop.f32.mrf.mxu1 }
0x17a5   :  { %v7968_v62 = vadd.f32 %v7967_v36, %v7926_v2  ;;  %v7928_v57 = vpop.f32.mrf.mxu0 }
0x17a6   :  { %v7969_v45 = vpop.f32.mrf.mxu1 }
0x17a7   :  { %v10673_v31 = vadd.f32 %v7968_v62, %v10644_v30  ;;  %v7929_v5 = vpop.f32.mrf.mxu0 }
0x17a8   :  { %v7970_v61 = vpop.f32.mrf.mxu1 }
0x17a9   :  { %v7971_v63 = vadd.f32 %v7970_v61, %v7929_v5  ;;  %v7931_v38 = vpop.f32.mrf.mxu0 }
0x17aa   :  { %v7972_v17 = vpop.f32.mrf.mxu1 }
0x17ab   :  { %v10679_v12 = vadd.f32 %v7971_v63, %v10648_v18  ;;  %v8080_v55 = vpop.f32.mrf.mxu0 }
0x17ac   :  { %v10682_v23 = vadd.f32 %v8080_v55, %v7989_v7  ;;  %v8123_v30 = vpop.f32.mrf.mxu1 }
0x17ad   :  { %v10684_v32 = vadd.f32 %v8123_v30, %v7997_v8  ;;  %v8082_v13 = vpop.f32.mrf.mxu0 }
0x17ae   :  { %v8633_v39 = vmul.f32 -1.442695, %v10682_v23  ;;  %v8083_v49 = vadd.f32 %v8082_v13, %v7993_v56  ;;  %v8125_v11 = vpop.f32.mrf.mxu1 }
0x17af   :  { %v8635_v26 = vmul.f32 -1.442695, %v10684_v32  ;;  %v8126_v1 = vadd.f32 %v8125_v11, %v8001_v48  ;;  %v8084_v44 = vpop.f32.mrf.mxu0 }
0x17b0   :  { %9266 = vpow2.f32 %v8633_v39  ;;  %v8634_v18 = vmul.f32 -1.442695, %v8083_v49  ;;  %v8085_v15 = vadd.f32 %v8084_v44, %v7989_v7  ;;  %v8127_v16 = vpop.f32.mrf.mxu1 }
0x17b1   :  { %9268 = vpow2.f32 %v8635_v26  ;;  %v8636_v28 = vmul.f32 -1.442695, %v8126_v1  ;;  %v8128_v9 = vadd.f32 %v8127_v16, %v7997_v8  ;;  %v8086_v21 = vpop.f32.mrf.mxu0 }
0x17b2   :  { %9270 = vpow2.f32 %v8634_v18  ;;  %v8637_v52 = vmul.f32 -1.442695, %v8085_v15  ;;  %v8087_v3 = vadd.f32 %v8086_v21, %v7993_v56  ;;  %v8129_v0 = vpop.f32.mrf.mxu1 }
0x17b3   :  { %9272 = vpow2.f32 %v8636_v28  ;;  %v8639_v29 = vmul.f32 -1.442695, %v8128_v9  ;;  %v8130_v59 = vadd.f32 %v8129_v0, %v8001_v48 }
0x17b4   :  { %9274 = vpow2.f32 %v8637_v52  ;;  %v8638_v54 = vmul.f32 -1.442695, %v8087_v3 }
0x17b5   :  { %9276 = vpow2.f32 %v8639_v29  ;;  %v8640_v46 = vmul.f32 -1.442695, %v8130_v59 }
0x17b6   :  { %9278 = vpow2.f32 %v8638_v54 }
0x17b7   :  { %9280 = vpow2.f32 %v8640_v46 }
0x17bd   :  { %v9267_v4 = vpop.eup %9266 }
0x17be   :  { %v9269_v20 = vpop.eup %9268  ;;  %v8156_v60 = vadd.f32 1.0, %v9267_v4 }
0x17bf   :  { %v9271_v27 = vpop.eup %9270  ;;  %v8158_v53 = vadd.f32 1.0, %v9269_v20 }
0x17c0   :  { %v9273_v35 = vpop.eup %9272  ;;  %9282 = vrcp.f32 %v8156_v60  ;;  %v8157_v47 = vadd.f32 1.0, %v9271_v27 }
0x17c1   :  { %v9275_v58 = vpop.eup %9274  ;;  %9284 = vrcp.f32 %v8158_v53  ;;  %v8159_v19 = vadd.f32 1.0, %v9273_v35 }
0x17c2   :  { %v9277_v6 = vpop.eup %9276  ;;  %9286 = vrcp.f32 %v8157_v47  ;;  %v8160_v24 = vadd.f32 1.0, %v9275_v58 }
0x17c3   :  { %v9279_v42 = vpop.eup %9278  ;;  %9288 = vrcp.f32 %v8159_v19  ;;  %v8162_v40 = vadd.f32 1.0, %v9277_v6 }
0x17c4   :  { %v9281_v51 = vpop.eup %9280  ;;  %9290 = vrcp.f32 %v8160_v24  ;;  %v8161_v34 = vadd.f32 1.0, %v9279_v42 }
0x17c5   :  { %9292 = vrcp.f32 %v8162_v40  ;;  %v8163_v33 = vadd.f32 1.0, %v9281_v51 }
0x17c6   :  { %9294 = vrcp.f32 %v8161_v34 }
0x17c7   :  { %9296 = vrcp.f32 %v8163_v33 }
0x17cd   :  { %v9283_v10 = vpop.eup %9282 }
0x17ce   :  { %v9285_v22 = vpop.eup %9284  ;;  %v8180_v63 = vmul.f32 %v9283_v10, %v10682_v23  ;;  %v9303_v23 = vld [vmem:[#allocation5 + $0x88] sm:$0xff] }
0x17cf   :  { %v9287_v50 = vpop.eup %9286  ;;  %v8182_v17 = vmul.f32 %v9285_v22, %v10684_v32 }
0x17d0   :  { %v9289_v2 = vpop.eup %9288  ;;  %v8181_v5 = vmul.f32 %v9287_v50, %v8083_v49 }
0x17d1   :  { %v9291_v36 = vpop.eup %9290  ;;  %v8183_v38 = vmul.f32 %v9289_v2, %v8126_v1  ;;  %v8329_v1 = vrot.slane %v9303_v23, %v4201_v41 }
0x17d2   :  { %v9293_v62 = vpop.eup %9292  ;;  %v8184_v37 = vmul.f32 %v9291_v36, %v8085_v15 }
0x17d3   :  { %v9295_v57 = vpop.eup %9294  ;;  %v8186_v61 = vmul.f32 %v9293_v62, %v8128_v9 }
0x17d4   :  { %v9297_v45 = vpop.eup %9296  ;;  %v8185_v7 = vmul.f32 %v9295_v57, %v8087_v3  ;;  %v8196_v55 = vpack.c.bf16 %v8184_v37, %v8180_v63 }
0x17d5   :  { %v8187_v8 = vmul.f32 %v9297_v45, %v8130_v59  ;;  %v8198_v30 = vpack.c.bf16 %v8186_v61, %v8182_v17 }
0x17d6   :  { %v8197_v56 = vpack.c.bf16 %v8185_v7, %v8181_v5 }
0x17d7   :  { %v8199_v48 = vpack.c.bf16 %v8187_v8, %v8183_v38 }
0x17d8   :  { %8272 = vmatprep.mubr.bf16.mxu0 %v8197_v56 }
0x17d9   :  { %8313 = vmatprep.mubr.bf16.mxu1 %v8199_v48  ;;  %8273 = vmatmul.mubr.bf16.vlgmr.msra.gmra.mxu0 %v8196_v55 }
0x17da   :  { %8314 = vmatmul.mubr.bf16.vlgmr.msra.gmra.mxu1 %v8198_v30 }
0x1899   :  { %v8274_v13 = vpop.f32.mrf.mxu0 }
0x189a   :  { %v8315_v39 = vpop.f32.mrf.mxu1 }
0x189b   :  { %v8316_v11 = vadd.f32 %v8315_v39, %v8274_v13  ;;  %v8276_v49 = vpop.f32.mrf.mxu0 }
0x189c   :  { %v8317_v26 = vpop.f32.mrf.mxu1 }
0x189d   :  { %v8322_v44 = vadd.f32 %v8316_v11, %v10673_v31  ;;  %v8277_v32 = vpop.f32.mrf.mxu0 }
0x189e   :  { %v8318_v18 = vpop.f32.mrf.mxu1 }
0x189f   :  { %v8324_v15 = vadd.f32 %v8322_v44, %v10500_v14  ;;  %v8319_v16 = vadd.f32 %v8318_v18, %v8277_v32  ;;  %v8279_v28 = vpop.f32.mrf.mxu0 }
0x18a0   :  { %v8320_v9 = vpop.f32.mrf.mxu1 }
0x18a1   :  { %v8330_v21 = vadd.f32 %v8329_v1, %v8324_v15  ;;  %v8323_v52 = vadd.f32 %v8319_v16, %v10679_v12 }
0x18a3   :  { %8332 = vst.msk [vmem:[#allocation10] sm:$0xff] %vm85_vm0, %v8330_v21  ;;  %v8325_v31 = vadd.f32 %v8323_v52, %v10497_v43 }
0x18a5   :  { %v8331_v3 = vadd.f32 %v8329_v1, %v8325_v31 }
0x18a7   :  { %8333 = vst.msk [vmem:[#allocation10 + $0x8] sm:$0xff] %vm85_vm0, %v8331_v3 }
0x18a8   :  { %9395 = shalt.err (!%p9392_p10)
}
0x18a9   :  { %8345 = dma.vmem_to_hbm [thread:$0]  %s8340_s17, 256, %s10708_s4, [#allocation4], %s9414_s20, %s9414_s20, %s9415_s21  }
0x18aa   :  { %9410 = dma.done.wait [#allocation4], 256  }
0x18ab   :  { %9411 = vsyncadd [#allocation4], 4294967040 }
0x18ac   :  { %8349 = vsyncpa [#allocation3], 1 }
0x18ad   :  { %8350 = vsyncpa [#allocation6], 1 }
0x18ae   :  { %8351 = vsyncpa [#allocation9], 1 }
0x18af   :  { %8352 = vsyncpa [#allocation4], 1 }

</bundles_post_ra>
